<compile_context>
chip_gen: v7x
topology: tpu7x:2x2x1
jax: 0.10.0
libtpu: 0.0.40
codegen_flags: <defaults>
</compile_context>

<pallas_src>
import jax
import jax.numpy as jnp
from jax import lax
from jax.experimental import pallas as pl
from jax.experimental.pallas import tpu as pltpu

LATENT_DIM = 100
LABEL_DIM = 10
BN_EPS = 1e-5

FC_OUT = 384                        # nn.Linear(latent_dim + label_dim, 384)
C0, H0, W0 = 32, 3, 4               # x.view(B, 32, 3, 4)
OUT_C, OUT_H, OUT_W = 4, 12, 8      # x[:, :, :12, :8]
OUT_FEATS = OUT_C * OUT_H * OUT_W   # 384
IN_LANES = 128                      # [z(100) | one-hot(10) | 18 zero lanes]
MAX_TILE_B = 256                    # v6e/v7x MXU row width


def _round_up(x, m):
    return ((x + m - 1) // m) * m


def _choose_tile_b(batch):
    """Batch-tile rows: multiple of 8 sublanes, capped at 256 MXU rows, and (for
    batches big enough to split) >=2 grid steps so v7x's two TensorCores both work."""
    if batch <= 8:
        return 8
    return min(_round_up(pl.cdiv(batch, 2), 8), MAX_TILE_B)


# ---------------------------------------------------------------------------
# Fused generator kernel: 4 lane-dense GEMMs + add/max/tanh epilogues per tile
# ---------------------------------------------------------------------------
def _generator_kernel(x_ref, w_in_ref, m1_ref, t1_ref, m2_ref, t2_ref,
                      m3_ref, t3_ref, out_ref):
    f32, bf16 = jnp.float32, jnp.bfloat16

    # fc: embedding + label path pre-folded into w_in, fc bias folded into t1
    h = jnp.dot(x_ref[...].astype(bf16), w_in_ref[...],
                preferred_element_type=f32)                        # (TB, 384)

    # deconv1 (32->16, stride 2) + BatchNorm (scale folded into m1) + ReLU
    y = jnp.dot(h.astype(bf16), m1_ref[...], preferred_element_type=f32)
    y = jnp.maximum(y + t1_ref[...], 0.0)                          # (TB, 768)

    # deconv2 (16->8, stride 2) + BatchNorm (scale folded into m2) + ReLU
    y = jnp.dot(y.astype(bf16), m2_ref[...], preferred_element_type=f32)
    y = jnp.maximum(y + t2_ref[...], 0.0)                          # (TB, 1536)

    # deconv3 (8->4, stride 1) + bias + Tanh, [:, :, :12, :8] crop folded into m3
    y = jnp.dot(y.astype(bf16), m3_ref[...], preferred_element_type=f32)
    out_ref[...] = jnp.tanh(y + t3_ref[...]).astype(out_ref.dtype)  # (TB, 384)


# ---------------------------------------------------------------------------
# Public forward: one pallas_call, grid over batch tiles
# ---------------------------------------------------------------------------
def generator_forward(prepared, z, labels):
    B = z.shape[0]
    tile_b = _choose_tile_b(B)
    padded_b = _round_up(B, tile_b)

    # lane-aligned first-GEMM input: [z | one-hot(label) | zero pad] -> (B, 128)
    onehot = jax.nn.one_hot(labels, LABEL_DIM, dtype=jnp.float32)
    x = jnp.concatenate(
        [z.astype(jnp.float32), onehot,
         jnp.zeros((B, IN_LANES - LATENT_DIM - LABEL_DIM), jnp.float32)], axis=1)
    if padded_b != B:
        x = jnp.pad(x, ((0, padded_b - B), (0, 0)))

    def resident(a):   # full-array block, constant index map -> stays VMEM-resident
        nd = a.ndim
        return pl.BlockSpec(a.shape, lambda b: (0,) * nd)

    p = prepared
    out = pl.pallas_call(
        _generator_kernel,
        out_shape=jax.ShapeDtypeStruct((padded_b, OUT_FEATS), jnp.float32),
        grid=(padded_b // tile_b,),
        in_specs=[
            pl.BlockSpec((tile_b, IN_LANES), lambda b: (b, 0)),
            resident(p["w_in"]),
            resident(p["m1"]), resident(p["t1"]),
            resident(p["m2"]), resident(p["t2"]),
            resident(p["m3"]), resident(p["t3"]),
        ],
        out_specs=pl.BlockSpec((tile_b, OUT_FEATS), lambda b: (b, 0)),
        compiler_params=pltpu.CompilerParams(
            dimension_semantics=("parallel",),       # independent batch tiles
            vmem_limit_bytes=64 * 1024 * 1024),
    )(x, p["w_in"], p["m1"], p["t1"], p["m2"], p["t2"], p["m3"], p["t3"])

    return out[:B].reshape(B, OUT_C, OUT_H, OUT_W)   # free row-major reshape to NCHW


# ---------------------------------------------------------------------------
# One-time parameter preparation (PyTorch layouts -> GEMM-ready folded operands)
# ---------------------------------------------------------------------------
def _conv_transpose_nchw(x, wt, stride, out_pad):
    """PyTorch ConvTranspose2d(k=3, padding=1) forward without bias, NCHW layout."""
    k = wt.shape[2]
    wc = jnp.flip(wt, (2, 3)).transpose(1, 0, 2, 3)   # (Cout, Cin, kH, kW)
    lo = k - 1 - 1                                    # padding = 1 in the module
    return lax.conv_general_dilated(
        x, wc, window_strides=(1, 1),
        padding=[(lo, lo + out_pad), (lo, lo + out_pad)],
        lhs_dilation=(stride, stride),
        dimension_numbers=("NCHW", "OIHW", "NCHW"))


def prepare_params(params):
    """Fold PyTorch-layout params into kernel-resident GEMM operands (runs once)."""
    f32, bf16 = jnp.float32, jnp.bfloat16

    fc_w, fc_b = params["fc_w"], params["fc_b"]        # (384, 110), (384,)
    wz = fc_w[:, :LATENT_DIM].T                        # (100, 384)
    wl = params["emb_w"] @ fc_w[:, LATENT_DIM:].T      # (10, 384): embedding folded in
    w_in = jnp.concatenate(                            # lane-aligned (128, 384)
        [wz, wl, jnp.zeros((IN_LANES - LATENT_DIM - LABEL_DIM, FC_OUT), f32)], axis=0)

    def convT_matrix(wt, h, w, stride, out_pad):
        cin = wt.shape[0]
        eye = jnp.eye(cin * h * w, dtype=f32).reshape(cin * h * w, cin, h, w)
        y = _conv_transpose_nchw(eye, wt, stride, out_pad)
        _, cout, ho, wo = y.shape
        return y.reshape(cin * h * w, cout * ho * wo), (ho, wo)

    m1, (h1, w1) = convT_matrix(params["deconv1_w"], H0, W0, 2, 1)   # (384, 16*6*8)
    m2, (h2, w2) = convT_matrix(params["deconv2_w"], h1, w1, 2, 1)   # (768, 8*12*16)
    m3, (h3, w3) = convT_matrix(params["deconv3_w"], h2, w2, 1, 0)   # (1536, 4*12*16)
    assert (h1, w1) == (6, 8) and (h2, w2) == (12, 16) and (h3, w3) == (12, 16)

    # TODO(synk): BatchNorm is folded in eval mode (running stats); training-mode
    #             batch statistics are not implemented in the fused kernel.
    def bn_fold(prefix, conv_b, hw):
        g, b = params[prefix + "_gamma"], params[prefix + "_beta"]
        m, v = params[prefix + "_mean"], params[prefix + "_var"]
        s = g * lax.rsqrt(v + BN_EPS)
        shift = (conv_b - m) * s + b
        return jnp.repeat(s, hw)[None, :], jnp.repeat(shift, hw)[None, :]

    s1, sh1 = bn_fold("bn1", params["deconv1_b"], h1 * w1)           # (1, 768)
    s2, sh2 = bn_fold("bn2", params["deconv2_b"], h2 * w2)           # (1, 1536)

    # fold BN scales into the matrix columns (f32, before the bf16 cast) and the
    # fc bias through m1 into the layer-1 shift
    m1s = m1 * s1
    m2s = m2 * s2
    t1 = sh1 + fc_b.reshape(1, FC_OUT) @ m1s
    t2 = sh2

    # fold the final x[:, :, :12, :8] crop into deconv3's matrix / bias columns
    keep = (jnp.arange(OUT_C)[:, None, None] * (h3 * w3)
            + jnp.arange(OUT_H)[None, :, None] * w3
            + jnp.arange(OUT_W)[None, None, :]).reshape(-1)          # (384,)
    m3c = m3[:, keep]                                                # (1536, 384)
    t3 = jnp.repeat(params["deconv3_b"], OUT_H * OUT_W)[None, :]

    return {
        "w_in": w_in.astype(bf16),
        "m1": m1s.astype(bf16), "t1": t1.astype(f32),
        "m2": m2s.astype(bf16), "t2": t2.astype(f32),
        "m3": m3c.astype(bf16), "t3": t3.astype(f32),
    }


# ---------------------------------------------------------------------------
# Pure-JAX reference (module op sequence, eval-mode BatchNorm), for self-check
# ---------------------------------------------------------------------------
def reference_forward(params, z, labels):
    emb = params["emb_w"][labels]                                    # (B, 10)
    x = jnp.concatenate([z, emb], axis=1) @ params["fc_w"].T + params["fc_b"]
    x = x.reshape(-1, C0, H0, W0)

    def bn(v, prefix):
        g, b = params[prefix + "_gamma"], params[prefix + "_beta"]
        m, var = params[prefix + "_mean"], params[prefix + "_var"]
        inv = lax.rsqrt(var + BN_EPS)
        return ((v - m[None, :, None, None]) * (g * inv)[None, :, None, None]
                + b[None, :, None, None])

    x = _conv_transpose_nchw(x, params["deconv1_w"], 2, 1) \
        + params["deconv1_b"][None, :, None, None]
    x = jax.nn.relu(bn(x, "bn1"))
    x = _conv_transpose_nchw(x, params["deconv2_w"], 2, 1) \
        + params["deconv2_b"][None, :, None, None]
    x = jax.nn.relu(bn(x, "bn2"))
    x = _conv_transpose_nchw(x, params["deconv3_w"], 1, 0) \
        + params["deconv3_b"][None, :, None, None]
    x = jnp.tanh(x)
    return x[:, :, :OUT_H, :OUT_W]


# ---------------------------------------------------------------------------
# Deterministic synthetic parameters (shapes follow the module's __init__)
# ---------------------------------------------------------------------------
def init_params(key):
    ks = jax.random.split(key, 20)

    def rnd(k, shape, scale=0.1):
        return jax.random.normal(k, shape, dtype=jnp.float32) * scale

    return {
        "emb_w":     rnd(ks[0], (LABEL_DIM, LABEL_DIM)),
        "fc_w":      rnd(ks[1], (FC_OUT, LATENT_DIM + LABEL_DIM), 0.05),
        "fc_b":      rnd(ks[2], (FC_OUT,), 0.01),
        # ConvTranspose2d weights in the PyTorch (Cin, Cout, kH, kW) layout.
        "deconv1_w": rnd(ks[3], (32, 16, 3, 3)),
        "deconv1_b": rnd(ks[4], (16,), 0.01),
        "bn1_gamma": 1.0 + rnd(ks[5], (16,), 0.05),
        "bn1_beta":  rnd(ks[6], (16,), 0.05),
        "bn1_mean":  rnd(ks[7], (16,), 0.05),
        "bn1_var":   1.0 + jnp.abs(rnd(ks[8], (16,), 0.05)),
        "deconv2_w": rnd(ks[9], (16, 8, 3, 3)),
        "deconv2_b": rnd(ks[10], (8,), 0.01),
        "bn2_gamma": 1.0 + rnd(ks[11], (8,), 0.05),
        "bn2_beta":  rnd(ks[12], (8,), 0.05),
        "bn2_mean":  rnd(ks[13], (8,), 0.05),
        "bn2_var":   1.0 + jnp.abs(rnd(ks[14], (8,), 0.05)),
        "deconv3_w": rnd(ks[15], (8, 4, 3, 3)),
        "deconv3_b": rnd(ks[16], (4,), 0.01),
    }


if __name__ == "__main__":
    key = jax.random.PRNGKey(0)
    kz, kl, kp, kz2, kl2 = jax.random.split(key, 5)

    params = init_params(kp)
    prepared = prepare_params(params)      # one-time weight folding (not per-forward)
    fwd = jax.jit(generator_forward)

    # small batch (single grid step, padded 2 -> 8 rows)
    B = 2
    z = jax.random.normal(kz, (B, LATENT_DIM), dtype=jnp.float32)
    labels = jax.random.randint(kl, (B,), 0, LABEL_DIM, dtype=jnp.int32)
    out = jax.block_until_ready(fwd(prepared, z, labels))
    assert out.shape == (B, OUT_C, OUT_H, OUT_W), out.shape
    assert bool(jnp.all(jnp.isfinite(out)))
    assert bool(jnp.all(jnp.abs(out) <= 1.0))          # tanh range
    ref = reference_forward(params, z, labels)
    max_err = float(jnp.max(jnp.abs(out - ref)))       # bf16-operand GEMMs vs f32 ref
    assert max_err < 0.1, f"kernel vs reference mismatch: {max_err}"

    # slightly larger batch to exercise batch tiling + padding (2 grid steps of 8)
    B2 = 9
    z2 = jax.random.normal(kz2, (B2, LATENT_DIM), dtype=jnp.float32)
    labels2 = jax.random.randint(kl2, (B2,), 0, LABEL_DIM, dtype=jnp.int32)
    out2 = jax.block_until_ready(fwd(prepared, z2, labels2))
    assert out2.shape == (B2, OUT_C, OUT_H, OUT_W), out2.shape
    ref2 = reference_forward(params, z2, labels2)
    max_err2 = float(jnp.max(jnp.abs(out2 - ref2)))
    assert max_err2 < 0.1, f"kernel vs reference mismatch (tiled): {max_err2}"

    print("KERNEL_OK")
</pallas_src>

<mosaic_0001>
module attributes {stable_mosaic.version = 11 : i64} {
  func.func @_generator_kernel(%arg0: i32, %arg1: memref<8x128xf32, #tpu.memory_space<vmem>>, %arg2: memref<128x384xbf16, #tpu.memory_space<vmem>>, %arg3: memref<384x768xbf16, #tpu.memory_space<vmem>>, %arg4: memref<1x768xf32, #tpu.memory_space<vmem>>, %arg5: memref<768x1536xbf16, #tpu.memory_space<vmem>>, %arg6: memref<1x1536xf32, #tpu.memory_space<vmem>>, %arg7: memref<1536x384xbf16, #tpu.memory_space<vmem>>, %arg8: memref<1x384xf32, #tpu.memory_space<vmem>>, %arg9: memref<8x384xf32, #tpu.memory_space<vmem>>) attributes {dimension_semantics = [#tpu.dimension_semantics<parallel>], iteration_bounds = array<i64: 1>, scalar_prefetch = 0 : i64, scratch_operands = 0 : i64, tpu.core_type = #tpu.core_type<tc>, window_params = [{transform_indices = @transform_0, window_bounds = array<i64: 8, 128>}, {pipeline_mode = #tpu.pipeline_mode<synchronous>, transform_indices = @transform_1, window_bounds = array<i64: 128, 384>}, {pipeline_mode = #tpu.pipeline_mode<synchronous>, transform_indices = @transform_2, window_bounds = array<i64: 384, 768>}, {pipeline_mode = #tpu.pipeline_mode<synchronous>, transform_indices = @transform_3, window_bounds = array<i64: 1, 768>}, {pipeline_mode = #tpu.pipeline_mode<synchronous>, transform_indices = @transform_4, window_bounds = array<i64: 768, 1536>}, {pipeline_mode = #tpu.pipeline_mode<synchronous>, transform_indices = @transform_5, window_bounds = array<i64: 1, 1536>}, {pipeline_mode = #tpu.pipeline_mode<synchronous>, transform_indices = @transform_6, window_bounds = array<i64: 1536, 384>}, {pipeline_mode = #tpu.pipeline_mode<synchronous>, transform_indices = @transform_7, window_bounds = array<i64: 1, 384>}, {transform_indices = @transform_8, window_bounds = array<i64: 8, 384>}]} {
    %c0 = arith.constant 0 : index
    %c0_0 = arith.constant 0 : index
    %0 = vector.load %arg1[%c0, %c0_0] : memref<8x128xf32, #tpu.memory_space<vmem>>, vector<8x128xf32>
    %1 = arith.truncf %0 : vector<8x128xf32> to vector<8x128xbf16>
    %c0_1 = arith.constant 0 : index
    %c0_2 = arith.constant 0 : index
    %2 = vector.load %arg2[%c0_1, %c0_2] : memref<128x384xbf16, #tpu.memory_space<vmem>>, vector<128x384xbf16>
    %cst = arith.constant dense<0.000000e+00> : vector<8x384xf32>
    %3 = tpu.matmul %1, %2, %cst {dimension_numbers = #tpu.dot_dimension_numbers<[1], [0], [0], [1], [0, 0, 1, 1], [], []>} : vector<8x128xbf16>, vector<128x384xbf16>, vector<8x384xf32> -> vector<8x384xf32>
    %4 = arith.truncf %3 : vector<8x384xf32> to vector<8x384xbf16>
    %c0_3 = arith.constant 0 : index
    %c0_4 = arith.constant 0 : index
    %5 = vector.load %arg3[%c0_3, %c0_4] : memref<384x768xbf16, #tpu.memory_space<vmem>>, vector<384x768xbf16>
    %cst_5 = arith.constant dense<0.000000e+00> : vector<8x768xf32>
    %6 = tpu.matmul %4, %5, %cst_5 {dimension_numbers = #tpu.dot_dimension_numbers<[1], [0], [0], [1], [0, 0, 1, 1], [], []>} : vector<8x384xbf16>, vector<384x768xbf16>, vector<8x768xf32> -> vector<8x768xf32>
    %c0_6 = arith.constant 0 : index
    %c0_7 = arith.constant 0 : index
    %7 = vector.load %arg4[%c0_6, %c0_7] : memref<1x768xf32, #tpu.memory_space<vmem>>, vector<1x768xf32>
    %8 = vector.broadcast %7 : vector<1x768xf32> to vector<8x768xf32>
    %9 = arith.addf %6, %8 : vector<8x768xf32>
    %cst_8 = arith.constant 0.000000e+00 : f32
    %10 = vector.broadcast %cst_8 : f32 to vector<8x768xf32>
    %11 = arith.maximumf %9, %10 : vector<8x768xf32>
    %12 = arith.truncf %11 : vector<8x768xf32> to vector<8x768xbf16>
    %c0_9 = arith.constant 0 : index
    %c0_10 = arith.constant 0 : index
    %13 = vector.load %arg5[%c0_9, %c0_10] : memref<768x1536xbf16, #tpu.memory_space<vmem>>, vector<768x1536xbf16>
    %cst_11 = arith.constant dense<0.000000e+00> : vector<8x1536xf32>
    %14 = tpu.matmul %12, %13, %cst_11 {dimension_numbers = #tpu.dot_dimension_numbers<[1], [0], [0], [1], [0, 0, 1, 1], [], []>} : vector<8x768xbf16>, vector<768x1536xbf16>, vector<8x1536xf32> -> vector<8x1536xf32>
    %c0_12 = arith.constant 0 : index
    %c0_13 = arith.constant 0 : index
    %15 = vector.load %arg6[%c0_12, %c0_13] : memref<1x1536xf32, #tpu.memory_space<vmem>>, vector<1x1536xf32>
    %16 = vector.broadcast %15 : vector<1x1536xf32> to vector<8x1536xf32>
    %17 = arith.addf %14, %16 : vector<8x1536xf32>
    %cst_14 = arith.constant 0.000000e+00 : f32
    %18 = vector.broadcast %cst_14 : f32 to vector<8x1536xf32>
    %19 = arith.maximumf %17, %18 : vector<8x1536xf32>
    %20 = arith.truncf %19 : vector<8x1536xf32> to vector<8x1536xbf16>
    %c0_15 = arith.constant 0 : index
    %c0_16 = arith.constant 0 : index
    %21 = vector.load %arg7[%c0_15, %c0_16] : memref<1536x384xbf16, #tpu.memory_space<vmem>>, vector<1536x384xbf16>
    %cst_17 = arith.constant dense<0.000000e+00> : vector<8x384xf32>
    %22 = tpu.matmul %20, %21, %cst_17 {dimension_numbers = #tpu.dot_dimension_numbers<[1], [0], [0], [1], [0, 0, 1, 1], [], []>} : vector<8x1536xbf16>, vector<1536x384xbf16>, vector<8x384xf32> -> vector<8x384xf32>
    %c0_18 = arith.constant 0 : index
    %c0_19 = arith.constant 0 : index
    %23 = vector.load %arg8[%c0_18, %c0_19] : memref<1x384xf32, #tpu.memory_space<vmem>>, vector<1x384xf32>
    %24 = vector.broadcast %23 : vector<1x384xf32> to vector<8x384xf32>
    %25 = arith.addf %22, %24 : vector<8x384xf32>
    %26 = math.tanh %25 : vector<8x384xf32>
    %c0_20 = arith.constant 0 : index
    %c0_21 = arith.constant 0 : index
    %27 = vector.load %arg9[%c0_20, %c0_21] : memref<8x384xf32, #tpu.memory_space<vmem>>, vector<8x384xf32>
    tpu.vector_store %arg9[%c0_20, %c0_21], %26 {strides = array<i32>} : memref<8x384xf32, #tpu.memory_space<vmem>>, vector<8x384xf32>,
    return
  }
  func.func @transform_0(%arg0: i32) -> (i32, i32) {
    %c0_i32 = arith.constant 0 : i32
    %c0_i32_0 = arith.constant 0 : i32
    return %arg0, %c0_i32 : i32, i32
  }
  func.func @transform_1(%arg0: i32) -> (i32, i32) {
    %c0_i32 = arith.constant 0 : i32
    %c0_i32_0 = arith.constant 0 : i32
    %c0_i32_1 = arith.constant 0 : i32
    return %c0_i32, %c0_i32_0 : i32, i32
  }
  func.func @transform_2(%arg0: i32) -> (i32, i32) {
    %c0_i32 = arith.constant 0 : i32
    %c0_i32_0 = arith.constant 0 : i32
    %c0_i32_1 = arith.constant 0 : i32
    return %c0_i32, %c0_i32_0 : i32, i32
  }
  func.func @transform_3(%arg0: i32) -> (i32, i32) {
    %c0_i32 = arith.constant 0 : i32
    %c0_i32_0 = arith.constant 0 : i32
    %c0_i32_1 = arith.constant 0 : i32
    return %c0_i32, %c0_i32_0 : i32, i32
  }
  func.func @transform_4(%arg0: i32) -> (i32, i32) {
    %c0_i32 = arith.constant 0 : i32
    %c0_i32_0 = arith.constant 0 : i32
    %c0_i32_1 = arith.constant 0 : i32
    return %c0_i32, %c0_i32_0 : i32, i32
  }
  func.func @transform_5(%arg0: i32) -> (i32, i32) {
    %c0_i32 = arith.constant 0 : i32
    %c0_i32_0 = arith.constant 0 : i32
    %c0_i32_1 = arith.constant 0 : i32
    return %c0_i32, %c0_i32_0 : i32, i32
  }
  func.func @transform_6(%arg0: i32) -> (i32, i32) {
    %c0_i32 = arith.constant 0 : i32
    %c0_i32_0 = arith.constant 0 : i32
    %c0_i32_1 = arith.constant 0 : i32
    return %c0_i32, %c0_i32_0 : i32, i32
  }
  func.func @transform_7(%arg0: i32) -> (i32, i32) {
    %c0_i32 = arith.constant 0 : i32
    %c0_i32_0 = arith.constant 0 : i32
    %c0_i32_1 = arith.constant 0 : i32
    return %c0_i32, %c0_i32_0 : i32, i32
  }
  func.func @transform_8(%arg0: i32) -> (i32, i32) {
    %c0_i32 = arith.constant 0 : i32
    %c0_i32_0 = arith.constant 0 : i32
    return %arg0, %c0_i32 : i32, i32
  }
}

</mosaic_0001>

<bundles_post_ra>
// kernel: generator_forward.1
= control target key start
LH: loop header
LB: loop body
LE: loop exit
PB: predicated region body
PF: predicated region fallthrough
CT: control target
= control target key end

     0   :  { %13 = vsyncpa [#allocation3], 0  ;;  %s11680_s0 = inlined_call_operand.hbm [shape: f32[8,128], index: 0, kind: input, shape index: {}]   ;;  %s11681_s1 = inlined_call_operand.hbm [shape: bf16[128,384], index: 1, kind: input, shape index: {}]   ;;  %s11682_s2 = inlined_call_operand.hbm [shape: bf16[384,768], index: 2, kind: input, shape index: {}]   ;;  %s11683_s3 = inlined_call_operand.hbm [shape: f32[1,768], index: 3, kind: input, shape index: {}]   ;;  %s11684_s4 = inlined_call_operand.hbm [shape: bf16[768,1536], index: 4, kind: input, shape index: {}]   ;;  %s11685_s5 = inlined_call_operand.hbm [shape: f32[1,1536], index: 5, kind: input, shape index: {}]   ;;  %s11686_s6 = inlined_call_operand.hbm [shape: bf16[1536,384], index: 6, kind: input, shape index: {}]   ;;  %s11687_s7 = inlined_call_operand.hbm [shape: f32[1,384], index: 7, kind: input, shape index: {}]   ;;  %s11688_s8 = inlined_call_operand.hbm [shape: f32[8,384], index: 8, kind: output, shape index: {}]  }
   0x1   :  { %14 = vsyncpa [#allocation6], 0 }
   0x2   :  { %15 = vsyncpa [#allocation9], 0 }
   0x3   :  { %16 = vsyncpa [#allocation12], 0 }
   0x4   :  { %17 = vsyncpa [#allocation15], 0 }
   0x5   :  { %18 = vsyncpa [#allocation4], 0  ;;  %s11285_s27 = smov [#allocation5]   ;;  %s11075_s9 = scalar_lea.hbm %s11681_s1, 3072 }
   0x6   :  { %s34_s28 = sshll.u32 %s11285_s27, 4  ;;  %p11076_p0 = scmp.ne.s32.totalorder %s11681_s1, %s11075_s9  ;;  %s35_s28 = int_to_ptr.vmem [resolvable:$true] %s34_s28 }
   0x7   :  { %p11079_p1 = scmp.lt.u32.totalorder %s11075_s9, %s11681_s1 }
   0x9   :  { %p11081_p2 = pnand %p11079_p1, %p11076_p0 }
   0xb   :  { %11084 = shalt.err (!%p11081_p2)
}
   0xc   :  { %s11085_s14 = scalar_lea.vmem %s35_s28, 3072  ;;  %p11090_p4 = scmp.lt.s32.totalorder %s35_s28, %s35_s28 }
   0xd   :  { %p11086_p3 = scmp.ne.s32.totalorder %s35_s28, %s11085_s14  ;;  %p11091_p5 = scmp.lt.s32.totalorder %s11085_s14, %s11085_s14 }
   0xf   :  { %p11092_p6 = por %p11091_p5, %p11090_p4 }
  0x11   :  { %p11093_p7 = pnand %p11092_p6, %p11086_p3 }
  0x13   :  { %11096 = shalt.err (!%p11093_p7)
}
  0x14   :  { %s11286_s15 = smov 192   ;;  %s11287_s16 = smov 12  }
  0x15   :  { %40 = dma.hbm_to_vmem [thread:$0]  %s11681_s1, 3072, %s35_s28, [#allocation6], %s11286_s15, %s11286_s15, %s11287_s16  }
  0x16   :  { %s11288_s19 = smov [#allocation8]   ;;  %s11289_s21 = smov [#allocation11]  }
  0x17   :  { %s59_s20 = sshll.u32 %s11288_s19, 4  ;;  %s81_s22 = sshll.u32 %s11289_s21, 4  ;;  %s60_s20 = int_to_ptr.vmem [resolvable:$true] %s59_s20  ;;  %s82_s22 = int_to_ptr.vmem [resolvable:$true] %s81_s22 }
  0x18   :  { %s11097_s25 = scalar_lea.hbm %s11683_s3, 96 }
  0x19   :  { %p11098_p8 = scmp.ne.s32.totalorder %s11683_s3, %s11097_s25  ;;  %p11101_p9 = scmp.lt.u32.totalorder %s11097_s25, %s11683_s3 }
  0x1b   :  { %p11103_p10 = pnand %p11101_p9, %p11098_p8 }
  0x1d   :  { %11106 = shalt.err (!%p11103_p10)
}
  0x1e   :  { %s11107_s1 = scalar_lea.vmem %s60_s20, 96  ;;  %p11112_p12 = scmp.lt.s32.totalorder %s60_s20, %s60_s20 }
  0x1f   :  { %p11108_p11 = scmp.ne.s32.totalorder %s60_s20, %s11107_s1  ;;  %p11113_p13 = scmp.lt.s32.totalorder %s11107_s1, %s11107_s1 }
  0x21   :  { %p11114_p0 = por %p11113_p13, %p11112_p12 }
  0x23   :  { %p11115_p1 = pnand %p11114_p0, %p11108_p11 }
  0x25   :  { %11118 = shalt.err (!%p11115_p1)
}
  0x26   :  { %62 = dma.hbm_to_vmem [thread:$0]  %s11683_s3, 96, %s60_s20, [#allocation9]  }
  0x27   :  { %s11119_s12 = scalar_lea.hbm %s11685_s5, 192 }
  0x28   :  { %p11120_p2 = scmp.ne.s32.totalorder %s11685_s5, %s11119_s12  ;;  %p11123_p3 = scmp.lt.u32.totalorder %s11119_s12, %s11685_s5 }
  0x2a   :  { %p11125_p4 = pnand %p11123_p3, %p11120_p2 }
  0x2c   :  { %11128 = shalt.err (!%p11125_p4)
}
  0x2d   :  { %s11129_s19 = scalar_lea.vmem %s82_s22, 192  ;;  %p11134_p6 = scmp.lt.s32.totalorder %s82_s22, %s82_s22 }
  0x2e   :  { %p11130_p5 = scmp.ne.s32.totalorder %s82_s22, %s11129_s19  ;;  %p11135_p7 = scmp.lt.s32.totalorder %s11129_s19, %s11129_s19 }
  0x30   :  { %p11136_p8 = por %p11135_p7, %p11134_p6 }
  0x32   :  { %p11137_p9 = pnand %p11136_p8, %p11130_p5 }
  0x34   :  { %11140 = shalt.err (!%p11137_p9)
}
  0x35   :  { %84 = dma.hbm_to_vmem [thread:$0]  %s11685_s5, 192, %s82_s22, [#allocation12]  }
  0x36   :  { %s11290_s21 = smov [#allocation2]   ;;  %s11291_s24 = smov [#allocation7]  }
  0x37   :  { %s25_s23 = sshll.u32 %s11290_s21, 4  ;;  %s46_s25 = sshll.u32 %s11291_s24, 4  ;;  %s26_s23 = int_to_ptr.vmem [resolvable:$true] %s25_s23  ;;  %s47_s25 = int_to_ptr.vmem [resolvable:$true] %s46_s25 }
  0x38   :  { %s11141_s29 = scalar_lea.hbm %s11680_s0, 128 }
  0x39   :  { %p11142_p10 = scmp.ne.s32.totalorder %s11680_s0, %s11141_s29  ;;  %p11145_p11 = scmp.lt.u32.totalorder %s11141_s29, %s11680_s0 }
  0x3b   :  { %p11147_p12 = pnand %p11145_p11, %p11142_p10 }
  0x3d   :  { %11150 = shalt.err (!%p11147_p12)
}
  0x3e   :  { %s11151_s5 = scalar_lea.vmem %s26_s23, 128  ;;  %p11156_p0 = scmp.lt.s32.totalorder %s26_s23, %s26_s23 }
  0x3f   :  { %p11152_p13 = scmp.ne.s32.totalorder %s26_s23, %s11151_s5  ;;  %p11157_p1 = scmp.lt.s32.totalorder %s11151_s5, %s11151_s5 }
  0x41   :  { %p11158_p2 = por %p11157_p1, %p11156_p0 }
  0x43   :  { %p11159_p3 = pnand %p11158_p2, %p11152_p13 }
  0x45   :  { %11162 = shalt.err (!%p11159_p3)
}
  0x46   :  { %28 = dma.hbm_to_vmem [thread:$0]  %s11680_s0, 128, %s26_s23, [#allocation3]  }
  0x47   :  { %s11163_s13 = scalar_lea.hbm %s11682_s2, 18432 }
  0x48   :  { %p11164_p4 = scmp.ne.s32.totalorder %s11682_s2, %s11163_s13  ;;  %p11167_p5 = scmp.lt.u32.totalorder %s11163_s13, %s11682_s2 }
  0x4a   :  { %p11169_p6 = pnand %p11167_p5, %p11164_p4 }
  0x4c   :  { %11172 = shalt.err (!%p11169_p6)
}
  0x4d   :  { %s11173_s3 = scalar_lea.vmem %s47_s25, 18432  ;;  %p11178_p8 = scmp.lt.s32.totalorder %s47_s25, %s47_s25 }
  0x4e   :  { %p11174_p7 = scmp.ne.s32.totalorder %s47_s25, %s11173_s3  ;;  %p11179_p9 = scmp.lt.s32.totalorder %s11173_s3, %s11173_s3 }
  0x50   :  { %p11180_p10 = por %p11179_p9, %p11178_p8 }
  0x52   :  { %p11181_p11 = pnand %p11180_p10, %p11174_p7 }
  0x54   :  { %11184 = shalt.err (!%p11181_p11)
}
  0x55   :  { %s11292_s0 = smov 384   ;;  %s11293_s20 = smov 24  }
  0x56   :  { %52 = dma.hbm_to_vmem [thread:$0]  %s11682_s2, 18432, %s47_s25, [#allocation6], %s11292_s0, %s11292_s0, %s11293_s20  }
  0x57   :  { %s11294_s24 = smov [#allocation10]   ;;  %s11185_s30 = scalar_lea.hbm %s11684_s4, 73728 }
  0x58   :  { %s68_s26 = sshll.u32 %s11294_s24, 4  ;;  %p11186_p12 = scmp.ne.s32.totalorder %s11684_s4, %s11185_s30  ;;  %s69_s26 = int_to_ptr.vmem [resolvable:$true] %s68_s26 }
  0x59   :  { %p11189_p13 = scmp.lt.u32.totalorder %s11185_s30, %s11684_s4 }
  0x5b   :  { %p11191_p0 = pnand %p11189_p13, %p11186_p12 }
  0x5d   :  { %11194 = shalt.err (!%p11191_p0)
}
  0x5e   :  { %s11195_s22 = scalar_lea.vmem %s69_s26, 73728  ;;  %p11200_p2 = scmp.lt.s32.totalorder %s69_s26, %s69_s26 }
  0x5f   :  { %p11196_p1 = scmp.ne.s32.totalorder %s69_s26, %s11195_s22  ;;  %p11201_p3 = scmp.lt.s32.totalorder %s11195_s22, %s11195_s22 }
  0x61   :  { %p11202_p4 = por %p11201_p3, %p11200_p2 }
  0x63   :  { %p11203_p5 = pnand %p11202_p4, %p11196_p1 }
  0x65   :  { %11206 = shalt.err (!%p11203_p5)
}
  0x66   :  { %s11295_s2 = smov 768   ;;  %s11296_s25 = smov 48  }
  0x67   :  { %74 = dma.hbm_to_vmem [thread:$0]  %s11684_s4, 73728, %s69_s26, [#allocation9], %s11295_s2, %s11295_s2, %s11296_s25  }
  0x68   :  { %s11297_s12 = smov [#allocation13]   ;;  %s11298_s14 = smov [#allocation14]  }
  0x69   :  { %s90_s13 = sshll.u32 %s11297_s12, 4  ;;  %s103_s17 = sshll.u32 %s11298_s14, 4  ;;  %s91_s13 = int_to_ptr.vmem [resolvable:$true] %s90_s13  ;;  %s104_s17 = int_to_ptr.vmem [resolvable:$true] %s103_s17 }
  0x6a   :  { %s11207_s3 = scalar_lea.hbm %s11686_s6, 36864 }
  0x6b   :  { %p11208_p6 = scmp.ne.s32.totalorder %s11686_s6, %s11207_s3  ;;  %p11211_p7 = scmp.lt.u32.totalorder %s11207_s3, %s11686_s6 }
  0x6d   :  { %p11213_p8 = pnand %p11211_p7, %p11208_p6 }
  0x6f   :  { %11216 = shalt.err (!%p11213_p8)
}
  0x70   :  { %s11217_s4 = scalar_lea.vmem %s91_s13, 36864  ;;  %p11222_p10 = scmp.lt.s32.totalorder %s91_s13, %s91_s13 }
  0x71   :  { %p11218_p9 = scmp.ne.s32.totalorder %s91_s13, %s11217_s4  ;;  %p11223_p11 = scmp.lt.s32.totalorder %s11217_s4, %s11217_s4 }
  0x73   :  { %p11224_p12 = por %p11223_p11, %p11222_p10 }
  0x75   :  { %p11225_p13 = pnand %p11224_p12, %p11218_p9 }
  0x77   :  { %11228 = shalt.err (!%p11225_p13)
}
  0x78   :  { %96 = dma.hbm_to_vmem [thread:$0]  %s11686_s6, 36864, %s91_s13, [#allocation12], %s11286_s15, %s11286_s15, %s11287_s16  }
  0x79   :  { %s11229_s30 = scalar_lea.hbm %s11687_s7, 48 }
  0x7a   :  { %p11230_p0 = scmp.ne.s32.totalorder %s11687_s7, %s11229_s30  ;;  %p11233_p1 = scmp.lt.u32.totalorder %s11229_s30, %s11687_s7 }
  0x7c   :  { %p11235_p2 = pnand %p11233_p1, %p11230_p0 }
  0x7e   :  { %11238 = shalt.err (!%p11235_p2)
}
  0x7f   :  { %s11239_s22 = scalar_lea.vmem %s104_s17, 48  ;;  %s11243_s2 = scalar_lea.vmem %s104_s17, 64 }
  0x80   :  { %p11240_p3 = scmp.ne.s32.totalorder %s104_s17, %s11239_s22  ;;  %p11244_p4 = scmp.lt.s32.totalorder %s104_s17, %s104_s17 }
  0x81   :  { %p11245_p5 = scmp.lt.s32.totalorder %s11243_s2, %s11239_s22 }
  0x83   :  { %p11246_p6 = por %p11245_p5, %p11244_p4 }
  0x85   :  { %p11247_p7 = pnand %p11246_p6, %p11240_p3 }
  0x87   :  { %11250 = shalt.err (!%p11247_p7)
}
  0x88   :  { %106 = dma.hbm_to_vmem [thread:$0]  %s11687_s7, 48, %s104_s17, [#allocation15]  }
  0x89   :  { %11273 = dma.done.wait [#allocation3], 128  }
  0x8a   :  { %11274 = vsyncadd [#allocation3], 4294967168 }
  0x8b   :  { %11275 = dma.done.wait [#allocation6], 21504  }
  0x8c   :  { %11276 = vsyncadd [#allocation6], 4294945792 }
  0x8d   :  { %11277 = dma.done.wait [#allocation9], 73824  }
  0x8e   :  { %11278 = vsyncadd [#allocation9], 4294893472 }
  0x8f   :  { %11279 = dma.done.wait [#allocation12], 37056  }
  0x90   :  { %11280 = vsyncadd [#allocation12], 4294930240 }
  0x91   :  { %11281 = dma.done.wait [#allocation15], 48  }
  0x92   :  { %11282 = vsyncadd [#allocation15], 4294967248  ;;  %v11299_v0 = vmov 0   ;;  %v9573_v1 = vld [vmem:[#allocation5 + $0x4] ss:$12 sps:$4 sm:$0xff]   ;;  %v132_v22 = vld [vmem:[#allocation2] sm:$0xff] }
  0x93   :  { %326 = vmatprep.mubr.bf16.mxu0 %v11299_v0  ;;  %v9575_v2 = vld [vmem:[#allocation5] ss:$12 sps:$4 sm:$0xff]   ;;  %294 = vmatprep.subr.bf16.mxu0 %v9573_v1  ;;  %v9576_v3 = vld [vmem:[#allocation5 + $0x1c] ss:$12 sps:$4 sm:$0xff]   ;;  %v9578_v4 = vld [vmem:[#allocation5 + $0x18] ss:$12 sps:$4 sm:$0xff]   ;;  %v11451_v25 = vpack.c.bf16 %v132_v22, %v132_v22 }
  0x94   :  { %295 = vmatpush1.bf16.msra.mxu0 %v9575_v2  ;;  %v9579_v5 = vld [vmem:[#allocation5 + $0x34] ss:$12 sps:$4 sm:$0xff]   ;;  %v9581_v6 = vld [vmem:[#allocation5 + $0x30] ss:$12 sps:$4 sm:$0xff]   ;;  %v9582_v7 = vld [vmem:[#allocation5 + $0x4c] ss:$12 sps:$4 sm:$0xff]  }
  0x95   :  { %296 = vmatprep.subr.bf16.mxu0 %v9576_v3  ;;  %v9584_v8 = vld [vmem:[#allocation5 + $0x48] ss:$12 sps:$4 sm:$0xff]   ;;  %v9585_v9 = vld [vmem:[#allocation5 + $0x64] ss:$12 sps:$4 sm:$0xff]   ;;  %v9587_v10 = vld [vmem:[#allocation5 + $0x60] ss:$12 sps:$4 sm:$0xff]  }
  0x96   :  { %v9588_v11 = vld [vmem:[#allocation5 + $0x7c] ss:$12 sps:$4 sm:$0xff]   ;;  %v9590_v12 = vld [vmem:[#allocation5 + $0x78] ss:$12 sps:$4 sm:$0xff]   ;;  %v9591_v13 = vld [vmem:[#allocation5 + $0x94] ss:$12 sps:$4 sm:$0xff]  }
  0x97   :  { %v9608_v14 = vld [vmem:[#allocation7 + $0xc] ss:$24 sps:$4 sm:$0xff]   ;;  %v9610_v15 = vld [vmem:[#allocation7 + $0x8] ss:$24 sps:$4 sm:$0xff]   ;;  %v9593_v16 = vld [vmem:[#allocation5 + $0x90] ss:$12 sps:$4 sm:$0xff]  }
  0x98   :  { %297 = vmatpush1.bf16.msra.mxu0 %v9578_v4  ;;  %v9594_v17 = vld [vmem:[#allocation5 + $0xac] ss:$12 sps:$4 sm:$0xff]   ;;  %1356 = vmatprep.subr.bf16.mxu1 %v9608_v14  ;;  %v9614_v18 = vld [vmem:[#allocation7 + $0x3c] ss:$24 sps:$4 sm:$0xff]   ;;  %v9622_v23 = vld [vmem:[#allocation7 + $0x68] ss:$24 sps:$4 sm:$0xff]  }
  0x99   :  { %298 = vmatprep.subr.bf16.mxu0 %v9579_v5  ;;  %1357 = vmatpush1.bf16.msra.mxu1 %v9610_v15  ;;  %v9616_v19 = vld [vmem:[#allocation7 + $0x38] ss:$24 sps:$4 sm:$0xff]   ;;  %v9596_v20 = vld [vmem:[#allocation5 + $0xa8] ss:$12 sps:$4 sm:$0xff]   ;;  %v9620_v21 = vld [vmem:[#allocation7 + $0x6c] ss:$24 sps:$4 sm:$0xff]  }
  0x9a   :  { %1358 = vmatprep.subr.bf16.mxu1 %v9614_v18  ;;  %v9626_v24 = vld [vmem:[#allocation7 + $0x9c] ss:$24 sps:$4 sm:$0xff]   ;;  %v11300_v27 = vmov 0.0   ;;  %v9628_v28 = vld [vmem:[#allocation7 + $0x98] ss:$24 sps:$4 sm:$0xff]   ;;  %vm11301_vm0 = vmmov 0  }
  0x9b   :  { %v9597_v26 = vld [vmem:[#allocation5 + $0x8] ss:$12 sps:$4 sm:$0xff]   ;;  %v9632_v29 = vld [vmem:[#allocation7 + $0xcc] ss:$24 sps:$4 sm:$0xff]   ;;  %v9640_v34 = vld [vmem:[#allocation7 + $0xf8] ss:$24 sps:$4 sm:$0xff]  }
  0x9c   :  { %299 = vmatpush1.bf16.msra.mxu0 %v9581_v6  ;;  %v9598_v30 = vld [vmem:[#allocation5 + $0x20] ss:$12 sps:$4 sm:$0xff]   ;;  %v9638_v32 = vld [vmem:[#allocation7 + $0xfc] ss:$24 sps:$4 sm:$0xff]   ;;  %v9599_v33 = vld [vmem:[#allocation5 + $0x38] ss:$12 sps:$4 sm:$0xff]  }
  0x9d   :  { %300 = vmatprep.subr.bf16.mxu0 %v9582_v7  ;;  %1359 = vmatpush1.bf16.msra.mxu1 %v9616_v19  ;;  %v9634_v31 = vld [vmem:[#allocation7 + $0xc8] ss:$24 sps:$4 sm:$0xff]   ;;  %v9644_v35 = vld [vmem:[#allocation7 + $0x12c] ss:$24 sps:$4 sm:$0xff]   ;;  %v9600_v36 = vld [vmem:[#allocation5 + $0x50] ss:$12 sps:$4 sm:$0xff]  }
  0x9e   :  { %1360 = vmatprep.subr.bf16.mxu1 %v9620_v21  ;;  %v9646_v37 = vld [vmem:[#allocation7 + $0x128] ss:$24 sps:$4 sm:$0xff]   ;;  %v9650_v38 = vld [vmem:[#allocation7 + $0x15c] ss:$24 sps:$4 sm:$0xff]   ;;  %v9652_v40 = vld [vmem:[#allocation7 + $0x158] ss:$24 sps:$4 sm:$0xff]  }
  0x9f   :  { %v9601_v39 = vld [vmem:[#allocation5 + $0x68] ss:$12 sps:$4 sm:$0xff]   ;;  %v9656_v41 = vld [vmem:[#allocation7 + $0x18c] ss:$24 sps:$4 sm:$0xff]   ;;  %v9664_v46 = vld [vmem:[#allocation7 + $0x1b8] ss:$24 sps:$4 sm:$0xff]  }
  0xa0   :  { %301 = vmatpush1.bf16.msra.mxu0 %v9584_v8  ;;  %v9602_v42 = vld [vmem:[#allocation5 + $0x80] ss:$12 sps:$4 sm:$0xff]   ;;  %v9662_v44 = vld [vmem:[#allocation7 + $0x1bc] ss:$24 sps:$4 sm:$0xff]   ;;  %v9603_v45 = vld [vmem:[#allocation5 + $0x98] ss:$12 sps:$4 sm:$0xff]  }
  0xa1   :  { %302 = vmatprep.subr.bf16.mxu0 %v9585_v9  ;;  %1361 = vmatpush1.bf16.msra.mxu1 %v9622_v23  ;;  %v9658_v43 = vld [vmem:[#allocation7 + $0x188] ss:$24 sps:$4 sm:$0xff]   ;;  %v9604_v47 = vld [vmem:[#allocation5 + $0xb0] ss:$12 sps:$4 sm:$0xff]   ;;  %v9668_v48 = vld [vmem:[#allocation7 + $0x1ec] ss:$24 sps:$4 sm:$0xff]  }
  0xa2   :  { %1362 = vmatprep.subr.bf16.mxu1 %v9626_v24  ;;  %v9607_v49 = vld [vmem:[#allocation7 + $0x4] ss:$24 sps:$4 sm:$0xff]   ;;  %v9670_v50 = vld [vmem:[#allocation7 + $0x1e8] ss:$24 sps:$4 sm:$0xff]   ;;  %v9613_v53 = vld [vmem:[#allocation7 + $0x34] ss:$24 sps:$4 sm:$0xff]  }
  0xa3   :  { %v9674_v51 = vld [vmem:[#allocation7 + $0x21c] ss:$24 sps:$4 sm:$0xff]   ;;  %v9605_v52 = vld [vmem:[#allocation7] ss:$24 sps:$4 sm:$0xff]   ;;  %v9680_v55 = vld [vmem:[#allocation7 + $0x24c] ss:$24 sps:$4 sm:$0xff]  }
  0xa4   :  { %303 = vmatpush1.bf16.msra.mxu0 %v9587_v10  ;;  %v9676_v54 = vld [vmem:[#allocation7 + $0x218] ss:$24 sps:$4 sm:$0xff]   ;;  %v9619_v57 = vld [vmem:[#allocation7 + $0x64] ss:$24 sps:$4 sm:$0xff]   ;;  %v9682_v58 = vld [vmem:[#allocation7 + $0x248] ss:$24 sps:$4 sm:$0xff]  }
  0xa5   :  { %304 = vmatprep.subr.bf16.mxu0 %v9588_v11  ;;  %1363 = vmatpush1.bf16.msra.mxu1 %v9628_v28  ;;  %v9611_v56 = vld [vmem:[#allocation7 + $0x30] ss:$24 sps:$4 sm:$0xff]   ;;  %v9686_v59 = vld [vmem:[#allocation7 + $0x27c] ss:$24 sps:$4 sm:$0xff]   ;;  %v9617_v60 = vld [vmem:[#allocation7 + $0x60] ss:$24 sps:$4 sm:$0xff]  }
  0xa6   :  { %1364 = vmatprep.subr.bf16.mxu1 %v9632_v29  ;;  %v9625_v61 = vld [vmem:[#allocation7 + $0x94] ss:$24 sps:$4 sm:$0xff]   ;;  %v9688_v62 = vld [vmem:[#allocation7 + $0x278] ss:$24 sps:$4 sm:$0xff]   ;;  %v9631_v2 = vld [vmem:[#allocation7 + $0xc4] ss:$24 sps:$4 sm:$0xff]  }
  0xa7   :  { %v9692_v63 = vld [vmem:[#allocation7 + $0x2ac] ss:$24 sps:$4 sm:$0xff]   ;;  %v9623_v1 = vld [vmem:[#allocation7 + $0x90] ss:$24 sps:$4 sm:$0xff]   ;;  %v9629_v4 = vld [vmem:[#allocation7 + $0xc0] ss:$24 sps:$4 sm:$0xff]  }
  0xa8   :  { %305 = vmatpush1.bf16.msra.mxu0 %v9590_v12  ;;  %v9694_v3 = vld [vmem:[#allocation7 + $0x2a8] ss:$24 sps:$4 sm:$0xff]   ;;  %v9637_v5 = vld [vmem:[#allocation7 + $0xf4] ss:$24 sps:$4 sm:$0xff]   ;;  %v9643_v7 = vld [vmem:[#allocation7 + $0x124] ss:$24 sps:$4 sm:$0xff]  }
  0xa9   :  { %306 = vmatprep.subr.bf16.mxu0 %v9591_v13  ;;  %1365 = vmatpush1.bf16.msra.mxu1 %v9634_v31  ;;  %v9635_v6 = vld [vmem:[#allocation7 + $0xf0] ss:$24 sps:$4 sm:$0xff]   ;;  %v9641_v8 = vld [vmem:[#allocation7 + $0x120] ss:$24 sps:$4 sm:$0xff]   ;;  %v9649_v9 = vld [vmem:[#allocation7 + $0x154] ss:$24 sps:$4 sm:$0xff]  }
  0xaa   :  { %1366 = vmatprep.subr.bf16.mxu1 %v9638_v32  ;;  %v9647_v10 = vld [vmem:[#allocation7 + $0x150] ss:$24 sps:$4 sm:$0xff]   ;;  %v9655_v11 = vld [vmem:[#allocation7 + $0x184] ss:$24 sps:$4 sm:$0xff]   ;;  %v9653_v12 = vld [vmem:[#allocation7 + $0x180] ss:$24 sps:$4 sm:$0xff]  }
  0xab   :  { %v9661_v13 = vld [vmem:[#allocation7 + $0x1b4] ss:$24 sps:$4 sm:$0xff]   ;;  %v9659_v14 = vld [vmem:[#allocation7 + $0x1b0] ss:$24 sps:$4 sm:$0xff]   ;;  %v9667_v15 = vld [vmem:[#allocation7 + $0x1e4] ss:$24 sps:$4 sm:$0xff]  }
  0xac   :  { %307 = vmatpush1.bf16.msra.mxu0 %v9593_v16  ;;  %v9665_v16 = vld [vmem:[#allocation7 + $0x1e0] ss:$24 sps:$4 sm:$0xff]   ;;  %v9671_v18 = vld [vmem:[#allocation7 + $0x210] ss:$24 sps:$4 sm:$0xff]   ;;  %v9679_v19 = vld [vmem:[#allocation7 + $0x244] ss:$24 sps:$4 sm:$0xff]  }
  0xad   :  { %308 = vmatprep.subr.bf16.mxu0 %v9594_v17  ;;  %1367 = vmatpush1.bf16.msra.mxu1 %v9640_v34  ;;  %v9673_v17 = vld [vmem:[#allocation7 + $0x214] ss:$24 sps:$4 sm:$0xff]   ;;  %v9683_v22 = vld [vmem:[#allocation7 + $0x270] ss:$24 sps:$4 sm:$0xff]   ;;  %v9691_v24 = vld [vmem:[#allocation7 + $0x2a4] ss:$24 sps:$4 sm:$0xff]  }
  0xae   :  { %1368 = vmatprep.subr.bf16.mxu1 %v9644_v35  ;;  %v9685_v21 = vld [vmem:[#allocation7 + $0x274] ss:$24 sps:$4 sm:$0xff]   ;;  %v9695_v29 = vld [vmem:[#allocation7 + $0x2d0] ss:$24 sps:$4 sm:$0xff]   ;;  %v9701_v32 = vld [vmem:[#allocation7 + $0x300] ss:$24 sps:$4 sm:$0xff]  }
  0xaf   :  { %v9698_v23 = vld [vmem:[#allocation7 + $0x2dc] ss:$24 sps:$4 sm:$0xff]   ;;  %s11302_s7 = smov [#allocation16]  }
  0xb0   :  { %309 = vmatpush1.bf16.msra.mxu0 %v9596_v20  ;;  %v9677_v20 = vld [vmem:[#allocation7 + $0x240] ss:$24 sps:$4 sm:$0xff]   ;;  %v9697_v28 = vld [vmem:[#allocation7 + $0x2d4] ss:$24 sps:$4 sm:$0xff]   ;;  %s8249_s16 = sshll.u32 %s11302_s7, 4  ;;  %s8250_s16 = int_to_ptr.vmem [resolvable:$true] %s8249_s16 }
  0xb1   :  { %9435 = vmatprep.subr.bf16.mxu0 %v11300_v27  ;;  %1369 = vmatpush1.bf16.msra.mxu1 %v9646_v37  ;;  %v9709_v35 = vld [vmem:[#allocation7 + $0x334] ss:$24 sps:$4 sm:$0xff]   ;;  %s11251_s25 = scalar_lea.vmem %s8250_s16, 384  ;;  %p11256_p9 = scmp.lt.s32.totalorder %s8250_s16, %s8250_s16 }
  0xb2   :  { %1370 = vmatprep.subr.bf16.mxu1 %v9650_v38  ;;  %p11252_p8 = scmp.ne.s32.totalorder %s8250_s16, %s11251_s25  ;;  %p11257_p10 = scmp.lt.s32.totalorder %s11251_s25, %s11251_s25 }
  0xb3   :  { %327 = vmatmul.mubr.bf16.vlgmr.msra.gmra.mrb[0].mxu0 %v11451_v25 }
  0xb4   :  { %9436 = vmatpush3.bf16.msra.mxu0 %v9597_v26  ;;  %9451 = vmatprep.mubr.msk.bf16.mxu0 %vm11301_vm0, %v11300_v27  ;;  %v9689_v26 = vld [vmem:[#allocation7 + $0x2a0] ss:$24 sps:$4 sm:$0xff]   ;;  %p11258_p11 = por %p11257_p10, %p11256_p9 }
  0xb5   :  { %9437 = vmatprep.subr.bf16.mxu0 %v11300_v27  ;;  %1371 = vmatpush1.bf16.msra.mxu1 %v9652_v40 }
  0xb6   :  { %1372 = vmatprep.subr.bf16.mxu1 %v9656_v41  ;;  %v9707_v41 = vld [vmem:[#allocation7 + $0x330] ss:$24 sps:$4 sm:$0xff]   ;;  %p11259_p12 = pnand %p11258_p11, %p11252_p8 }
  0xb8   :  { %9438 = vmatpush3.bf16.msra.mxu0 %v9598_v30  ;;  %v9703_v30 = vld [vmem:[#allocation7 + $0x304] ss:$24 sps:$4 sm:$0xff]  }
  0xb9   :  { %9439 = vmatprep.subr.bf16.mxu0 %v11300_v27  ;;  %1373 = vmatpush1.bf16.msra.mxu1 %v9658_v43  ;;  %v9715_v43 = vld [vmem:[#allocation7 + $0x364] ss:$24 sps:$4 sm:$0xff]  }
  0xba   :  { %1374 = vmatprep.subr.bf16.mxu1 %v9662_v44  ;;  %v9718_v44 = vld [vmem:[#allocation7 + $0x36c] ss:$24 sps:$4 sm:$0xff]  }
  0xbc   :  { %9440 = vmatpush3.bf16.msra.mxu0 %v9599_v33  ;;  %v9704_v33 = vld [vmem:[#allocation7 + $0x308] ss:$24 sps:$4 sm:$0xff]  }
  0xbd   :  { %9441 = vmatprep.subr.bf16.mxu0 %v11300_v27  ;;  %1375 = vmatpush1.bf16.msra.mxu1 %v9664_v46  ;;  %v9716_v46 = vld [vmem:[#allocation7 + $0x368] ss:$24 sps:$4 sm:$0xff]  }
  0xbe   :  { %1376 = vmatprep.subr.bf16.mxu1 %v9668_v48  ;;  %v9724_v48 = vld [vmem:[#allocation7 + $0x39c] ss:$24 sps:$4 sm:$0xff]  }
  0xc0   :  { %9442 = vmatpush3.bf16.msra.mxu0 %v9600_v36  ;;  %v9712_v36 = vld [vmem:[#allocation7 + $0x33c] ss:$24 sps:$4 sm:$0xff]  }
  0xc1   :  { %9443 = vmatprep.subr.bf16.mxu0 %v11300_v27  ;;  %1377 = vmatpush1.bf16.msra.mxu1 %v9670_v50  ;;  %v9722_v50 = vld [vmem:[#allocation7 + $0x398] ss:$24 sps:$4 sm:$0xff]  }
  0xc2   :  { %1378 = vmatprep.subr.bf16.mxu1 %v9674_v51  ;;  %v9727_v51 = vld [vmem:[#allocation7 + $0x3c4] ss:$24 sps:$4 sm:$0xff]  }
  0xc4   :  { %9444 = vmatpush3.bf16.msra.mxu0 %v9601_v39 }
  0xc5   :  { %9445 = vmatprep.subr.bf16.mxu0 %v11300_v27  ;;  %1379 = vmatpush1.bf16.msra.mxu1 %v9676_v54  ;;  %v9728_v54 = vld [vmem:[#allocation7 + $0x3c8] ss:$24 sps:$4 sm:$0xff]  }
  0xc6   :  { %1380 = vmatprep.subr.bf16.mxu1 %v9680_v55  ;;  %v9733_v55 = vld [vmem:[#allocation7 + $0x3f4] ss:$24 sps:$4 sm:$0xff]  }
  0xc8   :  { %9446 = vmatpush3.bf16.msra.mxu0 %v9602_v42  ;;  %v9710_v42 = vld [vmem:[#allocation7 + $0x338] ss:$24 sps:$4 sm:$0xff]  }
  0xc9   :  { %9447 = vmatprep.subr.bf16.mxu0 %v11300_v27  ;;  %1381 = vmatpush1.bf16.msra.mxu1 %v9682_v58  ;;  %v9734_v58 = vld [vmem:[#allocation7 + $0x3f8] ss:$24 sps:$4 sm:$0xff]  }
  0xca   :  { %1382 = vmatprep.subr.bf16.mxu1 %v9686_v59  ;;  %v9739_v59 = vld [vmem:[#allocation7 + $0x424] ss:$24 sps:$4 sm:$0xff]  }
  0xcc   :  { %9448 = vmatpush3.bf16.msra.mxu0 %v9603_v45  ;;  %v9713_v45 = vld [vmem:[#allocation7 + $0x360] ss:$24 sps:$4 sm:$0xff]  }
  0xcd   :  { %9449 = vmatprep.subr.bf16.mxu0 %v11300_v27  ;;  %1383 = vmatpush1.bf16.msra.mxu1 %v9688_v62  ;;  %v9706_v27 = vld [vmem:[#allocation7 + $0x30c] ss:$24 sps:$4 sm:$0xff]   ;;  %v9740_v62 = vld [vmem:[#allocation7 + $0x428] ss:$24 sps:$4 sm:$0xff]  }
  0xce   :  { %1384 = vmatprep.subr.bf16.mxu1 %v9692_v63  ;;  %v9745_v63 = vld [vmem:[#allocation7 + $0x454] ss:$24 sps:$4 sm:$0xff]  }
  0xd0   :  { %9450 = vmatpush3.bf16.msra.mxu0 %v9604_v47  ;;  %v9721_v47 = vld [vmem:[#allocation7 + $0x394] ss:$24 sps:$4 sm:$0xff]  }
  0xd1   :  { %1274 = vmatprep.subr.bf16.mxu0 %v9607_v49  ;;  %1385 = vmatpush1.bf16.msra.mxu1 %v9694_v3  ;;  %v9719_v49 = vld [vmem:[#allocation7 + $0x390] ss:$24 sps:$4 sm:$0xff]  }
  0xd2   :  { %1386 = vmatprep.subr.bf16.mxu1 %v9698_v23  ;;  %v9746_v3 = vld [vmem:[#allocation7 + $0x458] ss:$24 sps:$4 sm:$0xff]  }
  0xd3   :  { %9452 = vmatmul.mubr.bf16.vlgmr.msra.gmra.mrb[4].mxu0 %v11451_v25  ;;  %v9700_v25 = vld [vmem:[#allocation7 + $0x2d8] ss:$24 sps:$4 sm:$0xff]  }
  0xd4   :  { %1275 = vmatpush1.bf16.msra.mxu0 %v9605_v52  ;;  %v9730_v52 = vld [vmem:[#allocation7 + $0x3cc] ss:$24 sps:$4 sm:$0xff]   ;;  %v9758_v23 = vld [vmem:[#allocation7 + $0xa0] ss:$24 sps:$4 sm:$0xff]  }
  0xd5   :  { %1276 = vmatprep.subr.bf16.mxu0 %v9613_v53  ;;  %1387 = vmatpush1.bf16.msra.mxu1 %v9700_v25  ;;  %v9725_v53 = vld [vmem:[#allocation7 + $0x3c0] ss:$24 sps:$4 sm:$0xff]  }
  0xd6   :  { %1397 = vmatprep.subr.bf16.mxu1 %v9706_v27  ;;  %v9839_v25 = vld [vmem:[#allocation10 + $0x120] ss:$48 sps:$4 sm:$0xff]  }
  0xd7   :  { %v9761_v27 = vld [vmem:[#allocation7 + $0xd0] ss:$24 sps:$4 sm:$0xff]  }
  0xd8   :  { %1277 = vmatpush1.bf16.msra.mxu0 %v9611_v56  ;;  %v9736_v56 = vld [vmem:[#allocation7 + $0x3fc] ss:$24 sps:$4 sm:$0xff]  }
  0xd9   :  { %1278 = vmatprep.subr.bf16.mxu0 %v9619_v57  ;;  %v9731_v57 = vld [vmem:[#allocation7 + $0x3f0] ss:$24 sps:$4 sm:$0xff]  }
  0xdc   :  { %1279 = vmatpush1.bf16.msra.mxu0 %v9617_v60  ;;  %v9742_v60 = vld [vmem:[#allocation7 + $0x42c] ss:$24 sps:$4 sm:$0xff]  }
  0xdd   :  { %1280 = vmatprep.subr.bf16.mxu0 %v9625_v61  ;;  %v9737_v61 = vld [vmem:[#allocation7 + $0x420] ss:$24 sps:$4 sm:$0xff]  }
  0xe0   :  { %1281 = vmatpush1.bf16.msra.mxu0 %v9623_v1  ;;  %v9748_v1 = vld [vmem:[#allocation7 + $0x45c] ss:$24 sps:$4 sm:$0xff]  }
  0xe1   :  { %1282 = vmatprep.subr.bf16.mxu0 %v9631_v2  ;;  %v9743_v2 = vld [vmem:[#allocation7 + $0x450] ss:$24 sps:$4 sm:$0xff]  }
  0xe4   :  { %1283 = vmatpush1.bf16.msra.mxu0 %v9629_v4  ;;  %v9751_v4 = vld [vmem:[#allocation7 + $0x14] ss:$24 sps:$4 sm:$0xff]  }
  0xe5   :  { %1284 = vmatprep.subr.bf16.mxu0 %v9637_v5  ;;  %v9823_v5 = vld [vmem:[#allocation10 + $0x4] ss:$48 sps:$4 sm:$0xff]  }
  0xe8   :  { %1285 = vmatpush1.bf16.msra.mxu0 %v9635_v6 }
  0xe9   :  { %1286 = vmatprep.subr.bf16.mxu0 %v9643_v7 }
  0xec   :  { %1287 = vmatpush1.bf16.msra.mxu0 %v9641_v8 }
  0xed   :  { %1288 = vmatprep.subr.bf16.mxu0 %v9649_v9 }
  0xf0   :  { %1289 = vmatpush1.bf16.msra.mxu0 %v9647_v10  ;;  %v9749_v10 = vld [vmem:[#allocation7 + $0x10] ss:$24 sps:$4 sm:$0xff]  }
  0xf1   :  { %1290 = vmatprep.subr.bf16.mxu0 %v9655_v11  ;;  %v9754_v11 = vld [vmem:[#allocation7 + $0x44] ss:$24 sps:$4 sm:$0xff]  }
  0xf4   :  { %1291 = vmatpush1.bf16.msra.mxu0 %v9653_v12 }
  0xf5   :  { %1292 = vmatprep.subr.bf16.mxu0 %v9661_v13  ;;  %v9821_v13 = vld [vmem:[#allocation10] ss:$48 sps:$4 sm:$0xff]  }
  0xf8   :  { %1293 = vmatpush1.bf16.msra.mxu0 %v9659_v14  ;;  %v9829_v14 = vld [vmem:[#allocation10 + $0x64] ss:$48 sps:$4 sm:$0xff]  }
  0xf9   :  { %1294 = vmatprep.subr.bf16.mxu0 %v9667_v15  ;;  %v9752_v15 = vld [vmem:[#allocation7 + $0x40] ss:$24 sps:$4 sm:$0xff]  }
  0xfc   :  { %1295 = vmatpush1.bf16.msra.mxu0 %v9665_v16  ;;  %v9757_v16 = vld [vmem:[#allocation7 + $0x74] ss:$24 sps:$4 sm:$0xff]  }
  0xfd   :  { %1296 = vmatprep.subr.bf16.mxu0 %v9673_v17  ;;  %v9827_v17 = vld [vmem:[#allocation10 + $0x60] ss:$48 sps:$4 sm:$0xff]  }
 0x100   :  { %1297 = vmatpush1.bf16.msra.mxu0 %v9671_v18  ;;  %v9835_v18 = vld [vmem:[#allocation10 + $0xc4] ss:$48 sps:$4 sm:$0xff]  }
 0x101   :  { %1298 = vmatprep.subr.bf16.mxu0 %v9679_v19  ;;  %v9755_v19 = vld [vmem:[#allocation7 + $0x70] ss:$24 sps:$4 sm:$0xff]  }
 0x104   :  { %1299 = vmatpush1.bf16.msra.mxu0 %v9677_v20  ;;  %v9760_v20 = vld [vmem:[#allocation7 + $0xa4] ss:$24 sps:$4 sm:$0xff]  }
 0x105   :  { %1300 = vmatprep.subr.bf16.mxu0 %v9685_v21  ;;  %v9833_v21 = vld [vmem:[#allocation10 + $0xc0] ss:$48 sps:$4 sm:$0xff]  }
 0x108   :  { %1301 = vmatpush1.bf16.msra.mxu0 %v9683_v22  ;;  %v9841_v22 = vld [vmem:[#allocation10 + $0x124] ss:$48 sps:$4 sm:$0xff]  }
 0x109   :  { %1302 = vmatprep.subr.bf16.mxu0 %v9691_v24  ;;  %v9763_v24 = vld [vmem:[#allocation7 + $0xd4] ss:$24 sps:$4 sm:$0xff]  }
 0x10c   :  { %1303 = vmatpush1.bf16.msra.mxu0 %v9689_v26  ;;  %v9847_v26 = vld [vmem:[#allocation10 + $0x184] ss:$48 sps:$4 sm:$0xff]  }
 0x10d   :  { %1304 = vmatprep.subr.bf16.mxu0 %v9697_v28  ;;  %v9766_v28 = vld [vmem:[#allocation7 + $0x104] ss:$24 sps:$4 sm:$0xff]  }
 0x110   :  { %1305 = vmatpush1.bf16.msra.mxu0 %v9695_v29  ;;  %v9845_v29 = vld [vmem:[#allocation10 + $0x180] ss:$48 sps:$4 sm:$0xff]  }
 0x111   :  { %1315 = vmatprep.subr.bf16.mxu0 %v9703_v30  ;;  %v9853_v30 = vld [vmem:[#allocation10 + $0x1e4] ss:$48 sps:$4 sm:$0xff]  }
 0x186   :  { %v328_v31 = vpop.f32.mrb[0].mxu0 }
 0x187   :  { %v330_v34 = vpop.f32.mrb[1].mxu0  ;;  %v11457_v39 = vpack.c.bf16 %v328_v31, %v328_v31  ;;  %v9764_v31 = vld [vmem:[#allocation7 + $0x100] ss:$24 sps:$4 sm:$0xff]  }
 0x188   :  { %v11455_v37 = vpack.c.bf16 %v330_v34, %v330_v34  ;;  %v332_v38 = vpop.f32.mrb[2].mxu0  ;;  %v9859_v34 = vld [vmem:[#allocation10 + $0x244] ss:$48 sps:$4 sm:$0xff]  }
 0x189   :  { %v333_v40 = vpop.f32.mrb[3].mxu0  ;;  %v9865_v38 = vld [vmem:[#allocation10 + $0x2a4] ss:$48 sps:$4 sm:$0xff]  }
 0x18a   :  { %1306 = vmatprep.mubr.bf16.mxu0 %v11455_v37  ;;  %1388 = vmatprep.mubr.bf16.mxu1 %v11455_v37  ;;  %v9770_v40 = vld [vmem:[#allocation7 + $0x160] ss:$24 sps:$4 sm:$0xff]  }
 0x18b   :  { %1307 = vmatmul.mubr.bf16.vlgmr.msra.gmra.mrb[8].mxu0 %v11457_v39  ;;  %1389 = vmatmul.mubr.bf16.vlgmr.msra.gmra.mrb[0].mxu1 %v11457_v39 }
 0x18c   :  { %1316 = vmatpush1.bf16.msra.mxu0 %v9701_v32  ;;  %1398 = vmatpush1.bf16.msra.mxu1 %v9704_v33  ;;  %v9769_v32 = vld [vmem:[#allocation7 + $0x134] ss:$24 sps:$4 sm:$0xff]  }
 0x18d   :  { %1317 = vmatprep.subr.bf16.mxu0 %v9709_v35  ;;  %1399 = vmatprep.subr.bf16.mxu1 %v9712_v36  ;;  %v9851_v33 = vld [vmem:[#allocation10 + $0x1e0] ss:$48 sps:$4 sm:$0xff]  }
 0x18e   :  { %1347 = vmatprep.mubr.bf16.mxu0 %v11299_v0  ;;  %1429 = vmatprep.mubr.bf16.mxu1 %v11299_v0  ;;  %v9767_v35 = vld [vmem:[#allocation7 + $0x130] ss:$24 sps:$4 sm:$0xff]   ;;  %v9772_v36 = vld [vmem:[#allocation7 + $0x164] ss:$24 sps:$4 sm:$0xff]  }
 0x190   :  { %1318 = vmatpush1.bf16.msra.mxu0 %v9707_v41  ;;  %1400 = vmatpush1.bf16.msra.mxu1 %v9710_v42  ;;  %v9775_v41 = vld [vmem:[#allocation7 + $0x194] ss:$24 sps:$4 sm:$0xff]  }
 0x191   :  { %1319 = vmatprep.subr.bf16.mxu0 %v9715_v43  ;;  %1401 = vmatprep.subr.bf16.mxu1 %v9718_v44  ;;  %v9863_v42 = vld [vmem:[#allocation10 + $0x2a0] ss:$48 sps:$4 sm:$0xff]   ;;  %v9871_v43 = vld [vmem:[#allocation10 + $0x304] ss:$48 sps:$4 sm:$0xff]  }
 0x192   :  { %v9773_v44 = vld [vmem:[#allocation7 + $0x190] ss:$24 sps:$4 sm:$0xff]  }
 0x194   :  { %1320 = vmatpush1.bf16.msra.mxu0 %v9713_v45  ;;  %1402 = vmatpush1.bf16.msra.mxu1 %v9716_v46  ;;  %v9778_v45 = vld [vmem:[#allocation7 + $0x1c4] ss:$24 sps:$4 sm:$0xff]  }
 0x195   :  { %1321 = vmatprep.subr.bf16.mxu0 %v9721_v47  ;;  %1403 = vmatprep.subr.bf16.mxu1 %v9724_v48  ;;  %v9869_v46 = vld [vmem:[#allocation10 + $0x300] ss:$48 sps:$4 sm:$0xff]   ;;  %v9877_v47 = vld [vmem:[#allocation10 + $0x364] ss:$48 sps:$4 sm:$0xff]  }
 0x196   :  { %v9776_v48 = vld [vmem:[#allocation7 + $0x1c0] ss:$24 sps:$4 sm:$0xff]  }
 0x198   :  { %1322 = vmatpush1.bf16.msra.mxu0 %v9719_v49  ;;  %1404 = vmatpush1.bf16.msra.mxu1 %v9722_v50  ;;  %v9781_v49 = vld [vmem:[#allocation7 + $0x1f4] ss:$24 sps:$4 sm:$0xff]  }
 0x199   :  { %1323 = vmatprep.subr.bf16.mxu0 %v9727_v51  ;;  %1405 = vmatprep.subr.bf16.mxu1 %v9730_v52  ;;  %v9875_v50 = vld [vmem:[#allocation10 + $0x360] ss:$48 sps:$4 sm:$0xff]   ;;  %v9883_v51 = vld [vmem:[#allocation10 + $0x3c4] ss:$48 sps:$4 sm:$0xff]  }
 0x19a   :  { %v9779_v52 = vld [vmem:[#allocation7 + $0x1f0] ss:$24 sps:$4 sm:$0xff]  }
 0x19c   :  { %1324 = vmatpush1.bf16.msra.mxu0 %v9725_v53  ;;  %1406 = vmatpush1.bf16.msra.mxu1 %v9728_v54  ;;  %v9784_v53 = vld [vmem:[#allocation7 + $0x224] ss:$24 sps:$4 sm:$0xff]  }
 0x19d   :  { %1325 = vmatprep.subr.bf16.mxu0 %v9733_v55  ;;  %1407 = vmatprep.subr.bf16.mxu1 %v9736_v56  ;;  %v9881_v54 = vld [vmem:[#allocation10 + $0x3c0] ss:$48 sps:$4 sm:$0xff]   ;;  %v9889_v55 = vld [vmem:[#allocation10 + $0x424] ss:$48 sps:$4 sm:$0xff]  }
 0x19e   :  { %v9782_v56 = vld [vmem:[#allocation7 + $0x220] ss:$24 sps:$4 sm:$0xff]  }
 0x1a0   :  { %1326 = vmatpush1.bf16.msra.mxu0 %v9731_v57  ;;  %1408 = vmatpush1.bf16.msra.mxu1 %v9734_v58  ;;  %v9787_v57 = vld [vmem:[#allocation7 + $0x254] ss:$24 sps:$4 sm:$0xff]  }
 0x1a1   :  { %1327 = vmatprep.subr.bf16.mxu0 %v9739_v59  ;;  %1409 = vmatprep.subr.bf16.mxu1 %v9742_v60  ;;  %v9887_v58 = vld [vmem:[#allocation10 + $0x420] ss:$48 sps:$4 sm:$0xff]   ;;  %v9895_v59 = vld [vmem:[#allocation10 + $0x484] ss:$48 sps:$4 sm:$0xff]  }
 0x1a2   :  { %v9785_v60 = vld [vmem:[#allocation7 + $0x250] ss:$24 sps:$4 sm:$0xff]  }
 0x1a4   :  { %1328 = vmatpush1.bf16.msra.mxu0 %v9737_v61  ;;  %1410 = vmatpush1.bf16.msra.mxu1 %v9740_v62  ;;  %v9790_v61 = vld [vmem:[#allocation7 + $0x284] ss:$24 sps:$4 sm:$0xff]  }
 0x1a5   :  { %1329 = vmatprep.subr.bf16.mxu0 %v9745_v63  ;;  %1411 = vmatprep.subr.bf16.mxu1 %v9748_v1  ;;  %v9893_v62 = vld [vmem:[#allocation10 + $0x480] ss:$48 sps:$4 sm:$0xff]   ;;  %v9901_v63 = vld [vmem:[#allocation10 + $0x4e4] ss:$48 sps:$4 sm:$0xff]  }
 0x1a6   :  { %v369_v6 = vpop.f32.mrb[4].mxu0  ;;  %v9788_v1 = vld [vmem:[#allocation7 + $0x280] ss:$24 sps:$4 sm:$0xff]  }
 0x1a7   :  { %v11465_v7 = vpack.c.bf16 %v369_v6, %v369_v6  ;;  %v9453_v8 = vpop.f32.mrb[5].mxu0  ;;  %v9794_v6 = vld [vmem:[#allocation7 + $0x2e0] ss:$24 sps:$4 sm:$0xff]  }
 0x1a8   :  { %1330 = vmatpush1.bf16.msra.mxu0 %v9743_v2  ;;  %1412 = vmatpush1.bf16.msra.mxu1 %v9746_v3  ;;  %v372_v9 = vpop.f32.mrb[6].mxu0  ;;  %v9793_v2 = vld [vmem:[#allocation7 + $0x2b4] ss:$24 sps:$4 sm:$0xff]  }
 0x1a9   :  { %v9454_v12 = vpop.f32.mrb[7].mxu0  ;;  %1438 = vmatprep.subr.bf16.mxu0 %v9751_v4  ;;  %5052 = vmatprep.subr.bf16.mxu1 %v9823_v5  ;;  %v9899_v3 = vld [vmem:[#allocation10 + $0x4e0] ss:$48 sps:$4 sm:$0xff]  }
 0x1aa   :  { %v9791_v4 = vld [vmem:[#allocation7 + $0x2b0] ss:$24 sps:$4 sm:$0xff]   ;;  %v9796_v5 = vld [vmem:[#allocation7 + $0x2e4] ss:$24 sps:$4 sm:$0xff]   ;;  %v9799_v8 = vld [vmem:[#allocation7 + $0x314] ss:$24 sps:$4 sm:$0xff]  }
 0x1ab   :  { %1348 = vmatmul.mubr.bf16.vlgmr.msra.gmra.mrb[8].mxu0 %v11465_v7  ;;  %1430 = vmatmul.mubr.bf16.vlgmr.msra.gmra.mrb[0].mxu1 %v11465_v7  ;;  %v9797_v9 = vld [vmem:[#allocation7 + $0x310] ss:$24 sps:$4 sm:$0xff]   ;;  %v9805_v12 = vld [vmem:[#allocation7 + $0x374] ss:$24 sps:$4 sm:$0xff]  }
 0x1ac   :  { %1439 = vmatpush1.bf16.msra.mxu0 %v9749_v10  ;;  %1470 = vmatprep.mubr.bf16.mxu0 %v11455_v37  ;;  %v9857_v37 = vld [vmem:[#allocation10 + $0x240] ss:$48 sps:$4 sm:$0xff]  }
 0x1ad   :  { %1440 = vmatprep.subr.bf16.mxu0 %v9754_v11  ;;  %5053 = vmatpush1.bf16.msra.mxu1 %v9821_v13  ;;  %v9802_v10 = vld [vmem:[#allocation7 + $0x344] ss:$24 sps:$4 sm:$0xff]   ;;  %v9800_v11 = vld [vmem:[#allocation7 + $0x340] ss:$24 sps:$4 sm:$0xff]   ;;  %v9803_v13 = vld [vmem:[#allocation7 + $0x370] ss:$24 sps:$4 sm:$0xff]  }
 0x1ae   :  { %5054 = vmatprep.subr.bf16.mxu1 %v9829_v14  ;;  %v9808_v14 = vld [vmem:[#allocation7 + $0x3a4] ss:$24 sps:$4 sm:$0xff]  }
 0x1b0   :  { %1441 = vmatpush1.bf16.msra.mxu0 %v9752_v15  ;;  %v9806_v15 = vld [vmem:[#allocation7 + $0x3a0] ss:$24 sps:$4 sm:$0xff]  }
 0x1b1   :  { %1442 = vmatprep.subr.bf16.mxu0 %v9757_v16  ;;  %5055 = vmatpush1.bf16.msra.mxu1 %v9827_v17  ;;  %v9811_v16 = vld [vmem:[#allocation7 + $0x3d4] ss:$24 sps:$4 sm:$0xff]   ;;  %v9809_v17 = vld [vmem:[#allocation7 + $0x3d0] ss:$24 sps:$4 sm:$0xff]  }
 0x1b2   :  { %5056 = vmatprep.subr.bf16.mxu1 %v9835_v18  ;;  %v9814_v18 = vld [vmem:[#allocation7 + $0x404] ss:$24 sps:$4 sm:$0xff]  }
 0x1b4   :  { %1443 = vmatpush1.bf16.msra.mxu0 %v9755_v19  ;;  %v9812_v19 = vld [vmem:[#allocation7 + $0x400] ss:$24 sps:$4 sm:$0xff]  }
 0x1b5   :  { %1444 = vmatprep.subr.bf16.mxu0 %v9760_v20  ;;  %5057 = vmatpush1.bf16.msra.mxu1 %v9833_v21  ;;  %v9817_v20 = vld [vmem:[#allocation7 + $0x434] ss:$24 sps:$4 sm:$0xff]  }
 0x1b6   :  { %5058 = vmatprep.subr.bf16.mxu1 %v9841_v22  ;;  %v9905_v21 = vld [vmem:[#allocation10 + $0x540] ss:$48 sps:$4 sm:$0xff]   ;;  %v9913_v22 = vld [vmem:[#allocation10 + $0x5a4] ss:$48 sps:$4 sm:$0xff]  }
 0x1b8   :  { %1445 = vmatpush1.bf16.msra.mxu0 %v9758_v23  ;;  %v9820_v23 = vld [vmem:[#allocation7 + $0x464] ss:$24 sps:$4 sm:$0xff]  }
 0x1b9   :  { %1446 = vmatprep.subr.bf16.mxu0 %v9763_v24  ;;  %5059 = vmatpush1.bf16.msra.mxu1 %v9839_v25  ;;  %v9911_v24 = vld [vmem:[#allocation10 + $0x5a0] ss:$48 sps:$4 sm:$0xff]  }
 0x1ba   :  { %5060 = vmatprep.subr.bf16.mxu1 %v9847_v26  ;;  %v9818_v25 = vld [vmem:[#allocation7 + $0x460] ss:$24 sps:$4 sm:$0xff]  }
 0x1bb   :  { %v9919_v26 = vld [vmem:[#allocation10 + $0x604] ss:$48 sps:$4 sm:$0xff]  }
 0x1bc   :  { %1447 = vmatpush1.bf16.msra.mxu0 %v9761_v27  ;;  %v9826_v27 = vld [vmem:[#allocation10 + $0xc] ss:$48 sps:$4 sm:$0xff]  }
 0x1bd   :  { %1448 = vmatprep.subr.bf16.mxu0 %v9766_v28  ;;  %5061 = vmatpush1.bf16.msra.mxu1 %v9845_v29  ;;  %v9824_v28 = vld [vmem:[#allocation10 + $0x8] ss:$48 sps:$4 sm:$0xff]   ;;  %v9832_v29 = vld [vmem:[#allocation10 + $0x6c] ss:$48 sps:$4 sm:$0xff]  }
 0x1be   :  { %5062 = vmatprep.subr.bf16.mxu1 %v9853_v30  ;;  %v9830_v30 = vld [vmem:[#allocation10 + $0x68] ss:$48 sps:$4 sm:$0xff]  }
 0x1c0   :  { %1449 = vmatpush1.bf16.msra.mxu0 %v9764_v31  ;;  %v9838_v31 = vld [vmem:[#allocation10 + $0xcc] ss:$48 sps:$4 sm:$0xff]  }
 0x1c1   :  { %1450 = vmatprep.subr.bf16.mxu0 %v9769_v32  ;;  %5063 = vmatpush1.bf16.msra.mxu1 %v9851_v33  ;;  %v9836_v32 = vld [vmem:[#allocation10 + $0xc8] ss:$48 sps:$4 sm:$0xff]   ;;  %v9844_v33 = vld [vmem:[#allocation10 + $0x12c] ss:$48 sps:$4 sm:$0xff]  }
 0x1c2   :  { %5064 = vmatprep.subr.bf16.mxu1 %v9859_v34  ;;  %v9842_v34 = vld [vmem:[#allocation10 + $0x128] ss:$48 sps:$4 sm:$0xff]  }
 0x1c4   :  { %1451 = vmatpush1.bf16.msra.mxu0 %v9767_v35  ;;  %v9850_v35 = vld [vmem:[#allocation10 + $0x18c] ss:$48 sps:$4 sm:$0xff]  }
 0x1c5   :  { %1452 = vmatprep.subr.bf16.mxu0 %v9772_v36  ;;  %5065 = vmatpush1.bf16.msra.mxu1 %v9857_v37  ;;  %v9848_v36 = vld [vmem:[#allocation10 + $0x188] ss:$48 sps:$4 sm:$0xff]   ;;  %v9856_v37 = vld [vmem:[#allocation10 + $0x1ec] ss:$48 sps:$4 sm:$0xff]  }
 0x1c6   :  { %5066 = vmatprep.subr.bf16.mxu1 %v9865_v38  ;;  %v9854_v38 = vld [vmem:[#allocation10 + $0x1e8] ss:$48 sps:$4 sm:$0xff]  }
 0x1c8   :  { %1453 = vmatpush1.bf16.msra.mxu0 %v9770_v40  ;;  %v9860_v40 = vld [vmem:[#allocation10 + $0x248] ss:$48 sps:$4 sm:$0xff]  }
 0x1c9   :  { %1454 = vmatprep.subr.bf16.mxu0 %v9775_v41  ;;  %5067 = vmatpush1.bf16.msra.mxu1 %v9863_v42  ;;  %v9868_v41 = vld [vmem:[#allocation10 + $0x2ac] ss:$48 sps:$4 sm:$0xff]   ;;  %v9866_v42 = vld [vmem:[#allocation10 + $0x2a8] ss:$48 sps:$4 sm:$0xff]  }
 0x1ca   :  { %5068 = vmatprep.subr.bf16.mxu1 %v9871_v43  ;;  %v9874_v43 = vld [vmem:[#allocation10 + $0x30c] ss:$48 sps:$4 sm:$0xff]  }
 0x1cc   :  { %1455 = vmatpush1.bf16.msra.mxu0 %v9773_v44  ;;  %v9872_v44 = vld [vmem:[#allocation10 + $0x308] ss:$48 sps:$4 sm:$0xff]  }
 0x1cd   :  { %1456 = vmatprep.subr.bf16.mxu0 %v9778_v45  ;;  %5069 = vmatpush1.bf16.msra.mxu1 %v9869_v46  ;;  %v9880_v45 = vld [vmem:[#allocation10 + $0x36c] ss:$48 sps:$4 sm:$0xff]   ;;  %v9878_v46 = vld [vmem:[#allocation10 + $0x368] ss:$48 sps:$4 sm:$0xff]  }
 0x1ce   :  { %5070 = vmatprep.subr.bf16.mxu1 %v9877_v47  ;;  %v9886_v47 = vld [vmem:[#allocation10 + $0x3cc] ss:$48 sps:$4 sm:$0xff]  }
 0x1d0   :  { %1457 = vmatpush1.bf16.msra.mxu0 %v9776_v48  ;;  %v9884_v48 = vld [vmem:[#allocation10 + $0x3c8] ss:$48 sps:$4 sm:$0xff]  }
 0x1d1   :  { %1458 = vmatprep.subr.bf16.mxu0 %v9781_v49  ;;  %5071 = vmatpush1.bf16.msra.mxu1 %v9875_v50  ;;  %v9892_v49 = vld [vmem:[#allocation10 + $0x42c] ss:$48 sps:$4 sm:$0xff]   ;;  %v9890_v50 = vld [vmem:[#allocation10 + $0x428] ss:$48 sps:$4 sm:$0xff]  }
 0x1d2   :  { %5072 = vmatprep.subr.bf16.mxu1 %v9883_v51  ;;  %v9898_v51 = vld [vmem:[#allocation10 + $0x48c] ss:$48 sps:$4 sm:$0xff]  }
 0x1d4   :  { %1459 = vmatpush1.bf16.msra.mxu0 %v9779_v52  ;;  %v9896_v52 = vld [vmem:[#allocation10 + $0x488] ss:$48 sps:$4 sm:$0xff]  }
 0x1d5   :  { %1460 = vmatprep.subr.bf16.mxu0 %v9784_v53  ;;  %5073 = vmatpush1.bf16.msra.mxu1 %v9881_v54  ;;  %v9904_v53 = vld [vmem:[#allocation10 + $0x4ec] ss:$48 sps:$4 sm:$0xff]   ;;  %v9902_v54 = vld [vmem:[#allocation10 + $0x4e8] ss:$48 sps:$4 sm:$0xff]  }
 0x1d6   :  { %5074 = vmatprep.subr.bf16.mxu1 %v9889_v55  ;;  %v9910_v55 = vld [vmem:[#allocation10 + $0x54c] ss:$48 sps:$4 sm:$0xff]  }
 0x1d8   :  { %1461 = vmatpush1.bf16.msra.mxu0 %v9782_v56  ;;  %v9908_v56 = vld [vmem:[#allocation10 + $0x548] ss:$48 sps:$4 sm:$0xff]  }
 0x1d9   :  { %1462 = vmatprep.subr.bf16.mxu0 %v9787_v57  ;;  %5075 = vmatpush1.bf16.msra.mxu1 %v9887_v58  ;;  %v9916_v57 = vld [vmem:[#allocation10 + $0x5ac] ss:$48 sps:$4 sm:$0xff]   ;;  %v9914_v58 = vld [vmem:[#allocation10 + $0x5a8] ss:$48 sps:$4 sm:$0xff]  }
 0x1da   :  { %5076 = vmatprep.subr.bf16.mxu1 %v9895_v59  ;;  %v9922_v59 = vld [vmem:[#allocation10 + $0x60c] ss:$48 sps:$4 sm:$0xff]  }
 0x1dc   :  { %1463 = vmatpush1.bf16.msra.mxu0 %v9785_v60  ;;  %v524_v60 = vlaneseq }
 0x1dd   :  { %1464 = vmatprep.subr.bf16.mxu0 %v9790_v61  ;;  %5077 = vmatpush1.bf16.msra.mxu1 %v9893_v62 }
 0x1de   :  { %5078 = vmatprep.subr.bf16.mxu1 %v9901_v63  ;;  %v11473_v61 = vshrl.u32 %v524_v60, 7  ;;  %v11478_v63 = vld [vmem:[#allocation8] sm:$0x3f]  ;;  %v9979_v60 = vld [vmem:[#allocation10 + $0x9c4] ss:$48 sps:$4 sm:$0xff]  }
 0x1e0   :  { %1465 = vmatpush1.bf16.msra.mxu0 %v9788_v1  ;;  %v11476_v62 = vsub.s32 0, %v11473_v61  ;;  %v11481_v1 = vsub.s32 1, %v11473_v61 }
 0x1e1   :  { %1466 = vmatprep.subr.bf16.mxu0 %v9793_v2  ;;  %5079 = vmatpush1.bf16.msra.mxu1 %v9899_v3  ;;  %v11484_v2 = vsub.s32 3, %v11473_v61 }
 0x1e2   :  { %v527_v3 = vrot.slane %v11478_v63, %v11476_v62 }
 0x1e4   :  { %1467 = vmatpush1.bf16.msra.mxu0 %v9791_v4  ;;  %v531_v4 = vrot.slane %v11478_v63, %v11481_v1 }
 0x1e5   :  { %1468 = vmatprep.subr.bf16.mxu0 %v9796_v5  ;;  %v539_v5 = vrot.slane %v11478_v63, %v11484_v2 }
 0x1e8   :  { %1469 = vmatpush1.bf16.msra.mxu0 %v9794_v6 }
 0x1e9   :  { %1479 = vmatprep.subr.bf16.mxu0 %v9799_v8 }
 0x1eb   :  { %1471 = vmatmul.mubr.bf16.vlgmr.msra.gmra.mrb[12].mxu0 %v11457_v39  ;;  %v9907_v39 = vld [vmem:[#allocation10 + $0x544] ss:$48 sps:$4 sm:$0xff]  }
 0x1ec   :  { %1480 = vmatpush1.bf16.msra.mxu0 %v9797_v9  ;;  %1511 = vmatprep.mubr.bf16.mxu0 %v11299_v0  ;;  %v9815_v0 = vld [vmem:[#allocation7 + $0x430] ss:$24 sps:$4 sm:$0xff]  }
 0x1ed   :  { %1481 = vmatprep.subr.bf16.mxu0 %v9802_v10  ;;  %5080 = vmatprep.subr.bf16.mxu1 %v9907_v39  ;;  %v9917_v39 = vld [vmem:[#allocation10 + $0x600] ss:$48 sps:$4 sm:$0xff]  }
 0x1ee   :  { %5081 = vmatpush1.bf16.msra.mxu1 %v9905_v21 }
 0x1ef   :  { %5082 = vmatprep.subr.bf16.mxu1 %v9913_v22 }
 0x1f0   :  { %1482 = vmatpush1.bf16.msra.mxu0 %v9800_v11 }
 0x1f1   :  { %1483 = vmatprep.subr.bf16.mxu0 %v9805_v12 }
 0x1f2   :  { %5083 = vmatpush1.bf16.msra.mxu1 %v9911_v24  ;;  %v9928_v24 = vld [vmem:[#allocation10 + $0x66c] ss:$48 sps:$4 sm:$0xff]  }
 0x1f3   :  { %5093 = vmatprep.subr.bf16.mxu1 %v9919_v26  ;;  %v9923_v26 = vld [vmem:[#allocation10 + $0x660] ss:$48 sps:$4 sm:$0xff]  }
 0x1f4   :  { %1484 = vmatpush1.bf16.msra.mxu0 %v9803_v13 }
 0x1f5   :  { %1485 = vmatprep.subr.bf16.mxu0 %v9808_v14 }
 0x1f8   :  { %1486 = vmatpush1.bf16.msra.mxu0 %v9806_v15 }
 0x1f9   :  { %1487 = vmatprep.subr.bf16.mxu0 %v9811_v16 }
 0x1fc   :  { %1488 = vmatpush1.bf16.msra.mxu0 %v9809_v17 }
 0x1fd   :  { %1489 = vmatprep.subr.bf16.mxu0 %v9814_v18 }
 0x200   :  { %1490 = vmatpush1.bf16.msra.mxu0 %v9812_v19 }
 0x201   :  { %1491 = vmatprep.subr.bf16.mxu0 %v9817_v20  ;;  %v9920_v20 = vld [vmem:[#allocation10 + $0x608] ss:$48 sps:$4 sm:$0xff]  }
 0x204   :  { %1492 = vmatpush1.bf16.msra.mxu0 %v9815_v0 }
 0x205   :  { %1493 = vmatprep.subr.bf16.mxu0 %v9820_v23  ;;  %v9925_v23 = vld [vmem:[#allocation10 + $0x664] ss:$48 sps:$4 sm:$0xff]  }
 0x208   :  { %1494 = vmatpush1.bf16.msra.mxu0 %v9818_v25 }
 0x209   :  { %5175 = vmatprep.subr.bf16.mxu0 %v9826_v27  ;;  %v9926_v27 = vld [vmem:[#allocation10 + $0x668] ss:$48 sps:$4 sm:$0xff]  }
 0x20b   :  { %1512 = vmatmul.mubr.bf16.vlgmr.msra.gmra.mrb[12].mxu0 %v11465_v7  ;;  %v9862_v7 = vld [vmem:[#allocation10 + $0x24c] ss:$48 sps:$4 sm:$0xff]  }
 0x20c   :  { %5176 = vmatpush1.bf16.msra.mxu0 %v9824_v28  ;;  %v9931_v28 = vld [vmem:[#allocation10 + $0x6c4] ss:$48 sps:$4 sm:$0xff]  }
 0x20d   :  { %5177 = vmatprep.subr.bf16.mxu0 %v9832_v29  ;;  %v9934_v29 = vld [vmem:[#allocation10 + $0x6cc] ss:$48 sps:$4 sm:$0xff]  }
 0x210   :  { %5178 = vmatpush1.bf16.msra.mxu0 %v9830_v30  ;;  %v9929_v30 = vld [vmem:[#allocation10 + $0x6c0] ss:$48 sps:$4 sm:$0xff]  }
 0x211   :  { %5179 = vmatprep.subr.bf16.mxu0 %v9838_v31  ;;  %v9932_v31 = vld [vmem:[#allocation10 + $0x6c8] ss:$48 sps:$4 sm:$0xff]  }
 0x214   :  { %5180 = vmatpush1.bf16.msra.mxu0 %v9836_v32  ;;  %v9937_v32 = vld [vmem:[#allocation10 + $0x724] ss:$48 sps:$4 sm:$0xff]  }
 0x215   :  { %5181 = vmatprep.subr.bf16.mxu0 %v9844_v33  ;;  %v9940_v33 = vld [vmem:[#allocation10 + $0x72c] ss:$48 sps:$4 sm:$0xff]  }
 0x218   :  { %5182 = vmatpush1.bf16.msra.mxu0 %v9842_v34  ;;  %v9935_v34 = vld [vmem:[#allocation10 + $0x720] ss:$48 sps:$4 sm:$0xff]  }
 0x219   :  { %5183 = vmatprep.subr.bf16.mxu0 %v9850_v35  ;;  %v9938_v35 = vld [vmem:[#allocation10 + $0x728] ss:$48 sps:$4 sm:$0xff]  }
 0x21c   :  { %5184 = vmatpush1.bf16.msra.mxu0 %v9848_v36  ;;  %v9943_v36 = vld [vmem:[#allocation10 + $0x784] ss:$48 sps:$4 sm:$0xff]  }
 0x21d   :  { %5185 = vmatprep.subr.bf16.mxu0 %v9856_v37  ;;  %v9946_v37 = vld [vmem:[#allocation10 + $0x78c] ss:$48 sps:$4 sm:$0xff]  }
 0x220   :  { %5186 = vmatpush1.bf16.msra.mxu0 %v9854_v38  ;;  %v9941_v38 = vld [vmem:[#allocation10 + $0x780] ss:$48 sps:$4 sm:$0xff]  }
 0x221   :  { %5187 = vmatprep.subr.bf16.mxu0 %v9862_v7  ;;  %v9944_v7 = vld [vmem:[#allocation10 + $0x788] ss:$48 sps:$4 sm:$0xff]  }
 0x224   :  { %5188 = vmatpush1.bf16.msra.mxu0 %v9860_v40  ;;  %v9949_v40 = vld [vmem:[#allocation10 + $0x7e4] ss:$48 sps:$4 sm:$0xff]  }
 0x225   :  { %5189 = vmatprep.subr.bf16.mxu0 %v9868_v41  ;;  %v9952_v41 = vld [vmem:[#allocation10 + $0x7ec] ss:$48 sps:$4 sm:$0xff]  }
 0x228   :  { %5190 = vmatpush1.bf16.msra.mxu0 %v9866_v42  ;;  %v9947_v42 = vld [vmem:[#allocation10 + $0x7e0] ss:$48 sps:$4 sm:$0xff]  }
 0x229   :  { %5191 = vmatprep.subr.bf16.mxu0 %v9874_v43  ;;  %v9950_v43 = vld [vmem:[#allocation10 + $0x7e8] ss:$48 sps:$4 sm:$0xff]  }
 0x22c   :  { %5192 = vmatpush1.bf16.msra.mxu0 %v9872_v44  ;;  %v9955_v44 = vld [vmem:[#allocation10 + $0x844] ss:$48 sps:$4 sm:$0xff]  }
 0x22d   :  { %5193 = vmatprep.subr.bf16.mxu0 %v9880_v45  ;;  %v9958_v45 = vld [vmem:[#allocation10 + $0x84c] ss:$48 sps:$4 sm:$0xff]  }
 0x230   :  { %5194 = vmatpush1.bf16.msra.mxu0 %v9878_v46  ;;  %v9953_v46 = vld [vmem:[#allocation10 + $0x840] ss:$48 sps:$4 sm:$0xff]  }
 0x231   :  { %5195 = vmatprep.subr.bf16.mxu0 %v9886_v47  ;;  %v9956_v47 = vld [vmem:[#allocation10 + $0x848] ss:$48 sps:$4 sm:$0xff]  }
 0x234   :  { %5196 = vmatpush1.bf16.msra.mxu0 %v9884_v48  ;;  %v9961_v48 = vld [vmem:[#allocation10 + $0x8a4] ss:$48 sps:$4 sm:$0xff]  }
 0x235   :  { %5197 = vmatprep.subr.bf16.mxu0 %v9892_v49  ;;  %v9964_v49 = vld [vmem:[#allocation10 + $0x8ac] ss:$48 sps:$4 sm:$0xff]  }
 0x238   :  { %5198 = vmatpush1.bf16.msra.mxu0 %v9890_v50  ;;  %v9959_v50 = vld [vmem:[#allocation10 + $0x8a0] ss:$48 sps:$4 sm:$0xff]  }
 0x239   :  { %5199 = vmatprep.subr.bf16.mxu0 %v9898_v51  ;;  %v9962_v51 = vld [vmem:[#allocation10 + $0x8a8] ss:$48 sps:$4 sm:$0xff]  }
 0x23c   :  { %5200 = vmatpush1.bf16.msra.mxu0 %v9896_v52  ;;  %v9967_v52 = vld [vmem:[#allocation10 + $0x904] ss:$48 sps:$4 sm:$0xff]  }
 0x23d   :  { %5201 = vmatprep.subr.bf16.mxu0 %v9904_v53  ;;  %v9970_v53 = vld [vmem:[#allocation10 + $0x90c] ss:$48 sps:$4 sm:$0xff]  }
 0x240   :  { %5202 = vmatpush1.bf16.msra.mxu0 %v9902_v54  ;;  %v9965_v54 = vld [vmem:[#allocation10 + $0x900] ss:$48 sps:$4 sm:$0xff]  }
 0x241   :  { %5203 = vmatprep.subr.bf16.mxu0 %v9910_v55  ;;  %v9968_v55 = vld [vmem:[#allocation10 + $0x908] ss:$48 sps:$4 sm:$0xff]  }
 0x244   :  { %5204 = vmatpush1.bf16.msra.mxu0 %v9908_v56  ;;  %v9973_v56 = vld [vmem:[#allocation10 + $0x964] ss:$48 sps:$4 sm:$0xff]  }
 0x245   :  { %5205 = vmatprep.subr.bf16.mxu0 %v9916_v57  ;;  %v9976_v57 = vld [vmem:[#allocation10 + $0x96c] ss:$48 sps:$4 sm:$0xff]  }
 0x248   :  { %5206 = vmatpush1.bf16.msra.mxu0 %v9914_v58  ;;  %v9971_v58 = vld [vmem:[#allocation10 + $0x960] ss:$48 sps:$4 sm:$0xff]  }
 0x249   :  { %5216 = vmatprep.subr.bf16.mxu0 %v9922_v59  ;;  %v9974_v59 = vld [vmem:[#allocation10 + $0x968] ss:$48 sps:$4 sm:$0xff]  }
 0x27e   :  { %v1349_v6 = vpop.f32.mrb[8].mxu0  ;;  %v11492_v8 = vpop.f32.mrb[0].mxu1 }
 0x27f   :  { %v9455_v9 = vadd.f32 %v1349_v6, %v527_v3  ;;  %v1351_v10 = vpop.f32.mrb[9].mxu0  ;;  %v1433_v11 = vpop.f32.mrb[1].mxu1  ;;  %v9982_v3 = vld [vmem:[#allocation10 + $0x9cc] ss:$48 sps:$4 sm:$0xff]   ;;  %v9985_v6 = vld [vmem:[#allocation10 + $0xa24] ss:$48 sps:$4 sm:$0xff]  }
 0x280   :  { %v9456_v12 = vadd.f32 %v1351_v10, %v531_v4  ;;  %v9458_v13 = vadd.f32 %v1433_v11, %v539_v5  ;;  %v1353_v14 = vpop.f32.mrb[10].mxu0  ;;  %v1435_v15 = vpop.f32.mrb[2].mxu1  ;;  %v9977_v4 = vld [vmem:[#allocation10 + $0x9c0] ss:$48 sps:$4 sm:$0xff]   ;;  %v9980_v5 = vld [vmem:[#allocation10 + $0x9c8] ss:$48 sps:$4 sm:$0xff]  }
 0x281   :  { %v1520_v16 = vmax.f32 %v9455_v9, 0.0  ;;  %v1354_v17 = vpop.f32.mrb[11].mxu0  ;;  %v1436_v18 = vpop.f32.mrb[3].mxu1  ;;  %v9988_v9 = vld [vmem:[#allocation10 + $0xa2c] ss:$48 sps:$4 sm:$0xff]  }
 0x282   :  { %v1521_v19 = vmax.f32 %v9456_v12, 0.0  ;;  %v1523_v21 = vmax.f32 %v9458_v13, 0.0  ;;  %v9983_v10 = vld [vmem:[#allocation10 + $0xa20] ss:$48 sps:$4 sm:$0xff]   ;;  %v9986_v11 = vld [vmem:[#allocation10 + $0xa28] ss:$48 sps:$4 sm:$0xff]  }
 0x283   :  { %v11496_v22 = vpack.c.bf16 %v1520_v16, %v1520_v16  ;;  %v9991_v12 = vld [vmem:[#allocation10 + $0xa84] ss:$48 sps:$4 sm:$0xff]   ;;  %v9994_v13 = vld [vmem:[#allocation10 + $0xa8c] ss:$48 sps:$4 sm:$0xff]   ;;  %v9989_v14 = vld [vmem:[#allocation10 + $0xa80] ss:$48 sps:$4 sm:$0xff]  }
 0x284   :  { %v11494_v0 = vpack.c.bf16 %v1521_v19, %v1521_v19  ;;  %v11500_v25 = vpack.c.bf16 %v1523_v21, %v1523_v21  ;;  %v9992_v15 = vld [vmem:[#allocation10 + $0xa88] ss:$48 sps:$4 sm:$0xff]   ;;  %v11507_v16 = vsub.s32 2, %v11473_v61  ;;  %v9997_v17 = vld [vmem:[#allocation10 + $0xae4] ss:$48 sps:$4 sm:$0xff]  }
 0x285   :  { %v10000_v18 = vld [vmem:[#allocation10 + $0xaec] ss:$48 sps:$4 sm:$0xff]   ;;  %v9995_v19 = vld [vmem:[#allocation10 + $0xae0] ss:$48 sps:$4 sm:$0xff]   ;;  %v10003_v21 = vld [vmem:[#allocation10 + $0xb44] ss:$48 sps:$4 sm:$0xff]  }
 0x286   :  { %5084 = vmatprep.mubr.bf16.mxu1 %v11494_v0  ;;  %5207 = vmatprep.mubr.bf16.mxu0 %v11494_v0 }
 0x287   :  { %5085 = vmatmul.mubr.bf16.vlgmr.msra.gmra.mrb[4].mxu1 %v11496_v22  ;;  %5208 = vmatmul.mubr.bf16.vlgmr.msra.gmra.mrb[16].mxu0 %v11496_v22 }
 0x288   :  { %5094 = vmatpush1.bf16.msra.mxu1 %v9917_v39  ;;  %5217 = vmatpush1.bf16.msra.mxu0 %v9920_v20  ;;  %v9998_v39 = vld [vmem:[#allocation10 + $0xae8] ss:$48 sps:$4 sm:$0xff]   ;;  %v535_v20 = vrot.slane %v11478_v63, %v11507_v16 }
 0x289   :  { %5125 = vmatprep.mubr.bf16.mxu1 %v11500_v25  ;;  %5248 = vmatprep.mubr.bf16.mxu0 %v11500_v25 }
 0x28a   :  { %5095 = vmatprep.subr.bf16.mxu1 %v9925_v23  ;;  %5218 = vmatprep.subr.bf16.mxu0 %v9928_v24  ;;  %v10006_v23 = vld [vmem:[#allocation10 + $0xb4c] ss:$48 sps:$4 sm:$0xff]   ;;  %v10001_v24 = vld [vmem:[#allocation10 + $0xb40] ss:$48 sps:$4 sm:$0xff]  }
 0x28c   :  { %5096 = vmatpush1.bf16.msra.mxu1 %v9923_v26  ;;  %5219 = vmatpush1.bf16.msra.mxu0 %v9926_v27  ;;  %v10004_v26 = vld [vmem:[#allocation10 + $0xb48] ss:$48 sps:$4 sm:$0xff]   ;;  %v9457_v27 = vadd.f32 %v11492_v8, %v535_v20  ;;  %v10021_v8 = vld [vmem:[#allocation10 + $0xc64] ss:$48 sps:$4 sm:$0xff]   ;;  %v10061_v20 = vld [vmem:[#allocation10 + $0xf00] ss:$48 sps:$4 sm:$0xff]  }
 0x28d   :  { %5097 = vmatprep.subr.bf16.mxu1 %v9931_v28  ;;  %5220 = vmatprep.subr.bf16.mxu0 %v9934_v29  ;;  %v10009_v28 = vld [vmem:[#allocation10 + $0xba4] ss:$48 sps:$4 sm:$0xff]   ;;  %v10012_v29 = vld [vmem:[#allocation10 + $0xbac] ss:$48 sps:$4 sm:$0xff]  }
 0x290   :  { %5098 = vmatpush1.bf16.msra.mxu1 %v9929_v30  ;;  %5221 = vmatpush1.bf16.msra.mxu0 %v9932_v31  ;;  %v10007_v30 = vld [vmem:[#allocation10 + $0xba0] ss:$48 sps:$4 sm:$0xff]   ;;  %v10010_v31 = vld [vmem:[#allocation10 + $0xba8] ss:$48 sps:$4 sm:$0xff]  }
 0x291   :  { %5099 = vmatprep.subr.bf16.mxu1 %v9937_v32  ;;  %5222 = vmatprep.subr.bf16.mxu0 %v9940_v33  ;;  %v1522_v32 = vmax.f32 %v9457_v27, 0.0  ;;  %v10015_v33 = vld [vmem:[#allocation10 + $0xc04] ss:$48 sps:$4 sm:$0xff]   ;;  %v10070_v27 = vld [vmem:[#allocation10 + $0xf68] ss:$48 sps:$4 sm:$0xff]  }
 0x294   :  { %5100 = vmatpush1.bf16.msra.mxu1 %v9935_v34  ;;  %5223 = vmatpush1.bf16.msra.mxu0 %v9938_v35  ;;  %v10018_v34 = vld [vmem:[#allocation10 + $0xc0c] ss:$48 sps:$4 sm:$0xff]   ;;  %v10013_v35 = vld [vmem:[#allocation10 + $0xc00] ss:$48 sps:$4 sm:$0xff]  }
 0x295   :  { %5101 = vmatprep.subr.bf16.mxu1 %v9943_v36  ;;  %5224 = vmatprep.subr.bf16.mxu0 %v9946_v37  ;;  %v10016_v36 = vld [vmem:[#allocation10 + $0xc08] ss:$48 sps:$4 sm:$0xff]   ;;  %v11512_v37 = vpack.c.bf16 %v1522_v32, %v1522_v32  ;;  %v10081_v32 = vld [vmem:[#allocation10 + $0x1024] ss:$48 sps:$4 sm:$0xff]  }
 0x298   :  { %5102 = vmatpush1.bf16.msra.mxu1 %v9941_v38  ;;  %5225 = vmatpush1.bf16.msra.mxu0 %v9944_v7  ;;  %v10024_v38 = vld [vmem:[#allocation10 + $0xc6c] ss:$48 sps:$4 sm:$0xff]   ;;  %v10019_v7 = vld [vmem:[#allocation10 + $0xc60] ss:$48 sps:$4 sm:$0xff]  }
 0x299   :  { %5103 = vmatprep.subr.bf16.mxu1 %v9949_v40  ;;  %5226 = vmatprep.subr.bf16.mxu0 %v9952_v41  ;;  %v10022_v40 = vld [vmem:[#allocation10 + $0xc68] ss:$48 sps:$4 sm:$0xff]   ;;  %v10027_v41 = vld [vmem:[#allocation10 + $0xcc4] ss:$48 sps:$4 sm:$0xff]  }
 0x29c   :  { %5104 = vmatpush1.bf16.msra.mxu1 %v9947_v42  ;;  %5227 = vmatpush1.bf16.msra.mxu0 %v9950_v43  ;;  %v10030_v42 = vld [vmem:[#allocation10 + $0xccc] ss:$48 sps:$4 sm:$0xff]   ;;  %v10025_v43 = vld [vmem:[#allocation10 + $0xcc0] ss:$48 sps:$4 sm:$0xff]  }
 0x29d   :  { %5105 = vmatprep.subr.bf16.mxu1 %v9955_v44  ;;  %5228 = vmatprep.subr.bf16.mxu0 %v9958_v45  ;;  %v10028_v44 = vld [vmem:[#allocation10 + $0xcc8] ss:$48 sps:$4 sm:$0xff]   ;;  %v10033_v45 = vld [vmem:[#allocation10 + $0xd24] ss:$48 sps:$4 sm:$0xff]  }
 0x2a0   :  { %5106 = vmatpush1.bf16.msra.mxu1 %v9953_v46  ;;  %5229 = vmatpush1.bf16.msra.mxu0 %v9956_v47  ;;  %v10036_v46 = vld [vmem:[#allocation10 + $0xd2c] ss:$48 sps:$4 sm:$0xff]   ;;  %v10031_v47 = vld [vmem:[#allocation10 + $0xd20] ss:$48 sps:$4 sm:$0xff]  }
 0x2a1   :  { %5107 = vmatprep.subr.bf16.mxu1 %v9961_v48  ;;  %5230 = vmatprep.subr.bf16.mxu0 %v9964_v49  ;;  %v10034_v48 = vld [vmem:[#allocation10 + $0xd28] ss:$48 sps:$4 sm:$0xff]   ;;  %v10039_v49 = vld [vmem:[#allocation10 + $0xd84] ss:$48 sps:$4 sm:$0xff]  }
 0x2a4   :  { %5108 = vmatpush1.bf16.msra.mxu1 %v9959_v50  ;;  %5231 = vmatpush1.bf16.msra.mxu0 %v9962_v51  ;;  %v10042_v50 = vld [vmem:[#allocation10 + $0xd8c] ss:$48 sps:$4 sm:$0xff]   ;;  %v10037_v51 = vld [vmem:[#allocation10 + $0xd80] ss:$48 sps:$4 sm:$0xff]  }
 0x2a5   :  { %5109 = vmatprep.subr.bf16.mxu1 %v9967_v52  ;;  %5232 = vmatprep.subr.bf16.mxu0 %v9970_v53  ;;  %v10040_v52 = vld [vmem:[#allocation10 + $0xd88] ss:$48 sps:$4 sm:$0xff]   ;;  %v10045_v53 = vld [vmem:[#allocation10 + $0xde4] ss:$48 sps:$4 sm:$0xff]  }
 0x2a8   :  { %5110 = vmatpush1.bf16.msra.mxu1 %v9965_v54  ;;  %5233 = vmatpush1.bf16.msra.mxu0 %v9968_v55  ;;  %v10048_v54 = vld [vmem:[#allocation10 + $0xdec] ss:$48 sps:$4 sm:$0xff]   ;;  %v10043_v55 = vld [vmem:[#allocation10 + $0xde0] ss:$48 sps:$4 sm:$0xff]  }
 0x2a9   :  { %5111 = vmatprep.subr.bf16.mxu1 %v9973_v56  ;;  %5234 = vmatprep.subr.bf16.mxu0 %v9976_v57  ;;  %v10046_v56 = vld [vmem:[#allocation10 + $0xde8] ss:$48 sps:$4 sm:$0xff]   ;;  %v546_v57 = vsub.s32 5, %v11473_v61 }
 0x2ac   :  { %5112 = vmatpush1.bf16.msra.mxu1 %v9971_v58  ;;  %5235 = vmatpush1.bf16.msra.mxu0 %v9974_v59  ;;  %v10051_v58 = vld [vmem:[#allocation10 + $0xe44] ss:$48 sps:$4 sm:$0xff]   ;;  %v10054_v59 = vld [vmem:[#allocation10 + $0xe4c] ss:$48 sps:$4 sm:$0xff]  }
 0x2ad   :  { %5113 = vmatprep.subr.bf16.mxu1 %v9979_v60  ;;  %5236 = vmatprep.subr.bf16.mxu0 %v9982_v3  ;;  %v10049_v60 = vld [vmem:[#allocation10 + $0xe40] ss:$48 sps:$4 sm:$0xff]   ;;  %v10052_v3 = vld [vmem:[#allocation10 + $0xe48] ss:$48 sps:$4 sm:$0xff]  }
 0x2b0   :  { %5114 = vmatpush1.bf16.msra.mxu1 %v9977_v4  ;;  %5237 = vmatpush1.bf16.msra.mxu0 %v9980_v5  ;;  %v547_v4 = vrot.slane %v11478_v63, %v546_v57  ;;  %v10057_v5 = vld [vmem:[#allocation10 + $0xea4] ss:$48 sps:$4 sm:$0xff]  }
 0x2b1   :  { %5115 = vmatprep.subr.bf16.mxu1 %v9985_v6  ;;  %5238 = vmatprep.subr.bf16.mxu0 %v9988_v9  ;;  %v10060_v6 = vld [vmem:[#allocation10 + $0xeac] ss:$48 sps:$4 sm:$0xff]  }
 0x2b4   :  { %5116 = vmatpush1.bf16.msra.mxu1 %v9983_v10  ;;  %5239 = vmatpush1.bf16.msra.mxu0 %v9986_v11 }
 0x2b5   :  { %5117 = vmatprep.subr.bf16.mxu1 %v9991_v12  ;;  %5240 = vmatprep.subr.bf16.mxu0 %v9994_v13  ;;  %v10055_v13 = vld [vmem:[#allocation10 + $0xea0] ss:$48 sps:$4 sm:$0xff]  }
 0x2b8   :  { %5118 = vmatpush1.bf16.msra.mxu1 %v9989_v14  ;;  %5241 = vmatpush1.bf16.msra.mxu0 %v9992_v15  ;;  %v10058_v14 = vld [vmem:[#allocation10 + $0xea8] ss:$48 sps:$4 sm:$0xff]  }
 0x2b9   :  { %5119 = vmatprep.subr.bf16.mxu1 %v9997_v17  ;;  %5242 = vmatprep.subr.bf16.mxu0 %v10000_v18  ;;  %v10063_v17 = vld [vmem:[#allocation10 + $0xf04] ss:$48 sps:$4 sm:$0xff]   ;;  %v10066_v18 = vld [vmem:[#allocation10 + $0xf0c] ss:$48 sps:$4 sm:$0xff]  }
 0x2bc   :  { %5120 = vmatpush1.bf16.msra.mxu1 %v9995_v19  ;;  %5243 = vmatpush1.bf16.msra.mxu0 %v9998_v39 }
 0x2bd   :  { %5121 = vmatprep.subr.bf16.mxu1 %v10003_v21  ;;  %5244 = vmatprep.subr.bf16.mxu0 %v10006_v23  ;;  %v10064_v21 = vld [vmem:[#allocation10 + $0xf08] ss:$48 sps:$4 sm:$0xff]   ;;  %v10069_v23 = vld [vmem:[#allocation10 + $0xf64] ss:$48 sps:$4 sm:$0xff]  }
 0x2c0   :  { %5122 = vmatpush1.bf16.msra.mxu1 %v10001_v24  ;;  %5245 = vmatpush1.bf16.msra.mxu0 %v10004_v26  ;;  %v10072_v24 = vld [vmem:[#allocation10 + $0xf6c] ss:$48 sps:$4 sm:$0xff]   ;;  %v10067_v26 = vld [vmem:[#allocation10 + $0xf60] ss:$48 sps:$4 sm:$0xff]  }
 0x2c1   :  { %5123 = vmatprep.subr.bf16.mxu1 %v10009_v28  ;;  %5246 = vmatprep.subr.bf16.mxu0 %v10012_v29  ;;  %v10075_v28 = vld [vmem:[#allocation10 + $0xfc4] ss:$48 sps:$4 sm:$0xff]   ;;  %v10078_v29 = vld [vmem:[#allocation10 + $0xfcc] ss:$48 sps:$4 sm:$0xff]  }
 0x2c4   :  { %5124 = vmatpush1.bf16.msra.mxu1 %v10007_v30  ;;  %5247 = vmatpush1.bf16.msra.mxu0 %v10010_v31  ;;  %v10073_v30 = vld [vmem:[#allocation10 + $0xfc0] ss:$48 sps:$4 sm:$0xff]   ;;  %v10076_v31 = vld [vmem:[#allocation10 + $0xfc8] ss:$48 sps:$4 sm:$0xff]  }
 0x2c5   :  { %5134 = vmatprep.subr.bf16.mxu1 %v10015_v33  ;;  %5257 = vmatprep.subr.bf16.mxu0 %v10018_v34  ;;  %v10084_v33 = vld [vmem:[#allocation10 + $0x102c] ss:$48 sps:$4 sm:$0xff]   ;;  %v10079_v34 = vld [vmem:[#allocation10 + $0x1020] ss:$48 sps:$4 sm:$0xff]  }
 0x2c7   :  { %5126 = vmatmul.mubr.bf16.vlgmr.msra.gmra.mrb[4].mxu1 %v11512_v37  ;;  %5249 = vmatmul.mubr.bf16.vlgmr.msra.gmra.mrb[16].mxu0 %v11512_v37 }
 0x2c8   :  { %5135 = vmatpush1.bf16.msra.mxu1 %v10013_v35  ;;  %5258 = vmatpush1.bf16.msra.mxu0 %v10016_v36  ;;  %v10082_v35 = vld [vmem:[#allocation10 + $0x1028] ss:$48 sps:$4 sm:$0xff]   ;;  %v10087_v36 = vld [vmem:[#allocation10 + $0x1084] ss:$48 sps:$4 sm:$0xff]  }
 0x2c9   :  { %5136 = vmatprep.subr.bf16.mxu1 %v10021_v8  ;;  %5259 = vmatprep.subr.bf16.mxu0 %v10024_v38  ;;  %v10090_v8 = vld [vmem:[#allocation10 + $0x108c] ss:$48 sps:$4 sm:$0xff]   ;;  %v10085_v38 = vld [vmem:[#allocation10 + $0x1080] ss:$48 sps:$4 sm:$0xff]  }
 0x2cc   :  { %5137 = vmatpush1.bf16.msra.mxu1 %v10019_v7  ;;  %5260 = vmatpush1.bf16.msra.mxu0 %v10022_v40  ;;  %v10088_v7 = vld [vmem:[#allocation10 + $0x1088] ss:$48 sps:$4 sm:$0xff]   ;;  %v542_v40 = vsub.s32 4, %v11473_v61 }
 0x2cd   :  { %5138 = vmatprep.subr.bf16.mxu1 %v10027_v41  ;;  %5261 = vmatprep.subr.bf16.mxu0 %v10030_v42  ;;  %v10093_v41 = vld [vmem:[#allocation10 + $0x10e4] ss:$48 sps:$4 sm:$0xff]   ;;  %v10096_v42 = vld [vmem:[#allocation10 + $0x10ec] ss:$48 sps:$4 sm:$0xff]  }
 0x2d0   :  { %5139 = vmatpush1.bf16.msra.mxu1 %v10025_v43  ;;  %5262 = vmatpush1.bf16.msra.mxu0 %v10028_v44  ;;  %v10091_v43 = vld [vmem:[#allocation10 + $0x10e0] ss:$48 sps:$4 sm:$0xff]   ;;  %v10094_v44 = vld [vmem:[#allocation10 + $0x10e8] ss:$48 sps:$4 sm:$0xff]  }
 0x2d1   :  { %5140 = vmatprep.subr.bf16.mxu1 %v10033_v45  ;;  %5263 = vmatprep.subr.bf16.mxu0 %v10036_v46  ;;  %v543_v45 = vrot.slane %v11478_v63, %v542_v40  ;;  %v10099_v46 = vld [vmem:[#allocation10 + $0x1144] ss:$48 sps:$4 sm:$0xff]  }
 0x2d2   :  { %v10111_v63 = vld [vmem:[#allocation10 + $0x14] ss:$48 sps:$4 sm:$0xff]  }
 0x2d4   :  { %5141 = vmatpush1.bf16.msra.mxu1 %v10031_v47  ;;  %5264 = vmatpush1.bf16.msra.mxu0 %v10034_v48  ;;  %v10102_v47 = vld [vmem:[#allocation10 + $0x114c] ss:$48 sps:$4 sm:$0xff]   ;;  %v10097_v48 = vld [vmem:[#allocation10 + $0x1140] ss:$48 sps:$4 sm:$0xff]  }
 0x2d5   :  { %5142 = vmatprep.subr.bf16.mxu1 %v10039_v49  ;;  %5265 = vmatprep.subr.bf16.mxu0 %v10042_v50  ;;  %v10100_v49 = vld [vmem:[#allocation10 + $0x1148] ss:$48 sps:$4 sm:$0xff]  }
 0x2d8   :  { %5143 = vmatpush1.bf16.msra.mxu1 %v10037_v51  ;;  %5266 = vmatpush1.bf16.msra.mxu0 %v10040_v52  ;;  %v10105_v51 = vld [vmem:[#allocation10 + $0x11a4] ss:$48 sps:$4 sm:$0xff]   ;;  %v10108_v52 = vld [vmem:[#allocation10 + $0x11ac] ss:$48 sps:$4 sm:$0xff]  }
 0x2d9   :  { %5144 = vmatprep.subr.bf16.mxu1 %v10045_v53  ;;  %5267 = vmatprep.subr.bf16.mxu0 %v10048_v54  ;;  %v10103_v53 = vld [vmem:[#allocation10 + $0x11a0] ss:$48 sps:$4 sm:$0xff]   ;;  %v10106_v54 = vld [vmem:[#allocation10 + $0x11a8] ss:$48 sps:$4 sm:$0xff]  }
 0x2dc   :  { %5145 = vmatpush1.bf16.msra.mxu1 %v10043_v55  ;;  %5268 = vmatpush1.bf16.msra.mxu0 %v10046_v56  ;;  %v10114_v56 = vld [vmem:[#allocation10 + $0x1c] ss:$48 sps:$4 sm:$0xff]  }
 0x2dd   :  { %5146 = vmatprep.subr.bf16.mxu1 %v10051_v58  ;;  %5269 = vmatprep.subr.bf16.mxu0 %v10054_v59  ;;  %v10109_v58 = vld [vmem:[#allocation10 + $0x10] ss:$48 sps:$4 sm:$0xff]  }
 0x2de   :  { %v11520_v9 = vpop.f32.mrb[12].mxu0 }
 0x2df   :  { %v1515_v10 = vpop.f32.mrb[13].mxu0  ;;  %v9459_v50 = vadd.f32 %v11520_v9, %v543_v45  ;;  %v10123_v9 = vld [vmem:[#allocation10 + $0xd4] ss:$48 sps:$4 sm:$0xff]  }
 0x2e0   :  { %v9460_v11 = vadd.f32 %v1515_v10, %v547_v4  ;;  %5147 = vmatpush1.bf16.msra.mxu1 %v10049_v60  ;;  %5270 = vmatpush1.bf16.msra.mxu0 %v10052_v3  ;;  %v1517_v12 = vpop.f32.mrb[14].mxu0  ;;  %v10112_v60 = vld [vmem:[#allocation10 + $0x18] ss:$48 sps:$4 sm:$0xff]   ;;  %v10117_v3 = vld [vmem:[#allocation10 + $0x74] ss:$48 sps:$4 sm:$0xff]  }
 0x2e1   :  { %v1518_v15 = vpop.f32.mrb[15].mxu0  ;;  %5148 = vmatprep.subr.bf16.mxu1 %v10057_v5  ;;  %5271 = vmatprep.subr.bf16.mxu0 %v10060_v6  ;;  %v1524_v55 = vmax.f32 %v9459_v50, 0.0  ;;  %v10120_v4 = vld [vmem:[#allocation10 + $0x7c] ss:$48 sps:$4 sm:$0xff]   ;;  %v10115_v5 = vld [vmem:[#allocation10 + $0x70] ss:$48 sps:$4 sm:$0xff]  }
 0x2e2   :  { %v1525_v19 = vmax.f32 %v9460_v11, 0.0  ;;  %v10118_v6 = vld [vmem:[#allocation10 + $0x78] ss:$48 sps:$4 sm:$0xff]   ;;  %v10126_v10 = vld [vmem:[#allocation10 + $0xdc] ss:$48 sps:$4 sm:$0xff]  }
 0x2e3   :  { %v11531_v59 = vpack.c.bf16 %v1524_v55, %v1524_v55  ;;  %v10121_v11 = vld [vmem:[#allocation10 + $0xd0] ss:$48 sps:$4 sm:$0xff]   ;;  %v10124_v12 = vld [vmem:[#allocation10 + $0xd8] ss:$48 sps:$4 sm:$0xff]   ;;  %v10171_v45 = vld [vmem:[#allocation10 + $0x3d4] ss:$48 sps:$4 sm:$0xff]  }
 0x2e4   :  { %v11522_v39 = vpack.c.bf16 %v1525_v19, %v1525_v19  ;;  %5149 = vmatpush1.bf16.msra.mxu1 %v10055_v13  ;;  %5272 = vmatpush1.bf16.msra.mxu0 %v10058_v14  ;;  %v10129_v13 = vld [vmem:[#allocation10 + $0x134] ss:$48 sps:$4 sm:$0xff]   ;;  %v10132_v14 = vld [vmem:[#allocation10 + $0x13c] ss:$48 sps:$4 sm:$0xff]   ;;  %v10127_v15 = vld [vmem:[#allocation10 + $0x130] ss:$48 sps:$4 sm:$0xff]  }
 0x2e5   :  { %5150 = vmatprep.subr.bf16.mxu1 %v10063_v17  ;;  %5273 = vmatprep.subr.bf16.mxu0 %v10066_v18  ;;  %v10130_v17 = vld [vmem:[#allocation10 + $0x138] ss:$48 sps:$4 sm:$0xff]   ;;  %v10135_v18 = vld [vmem:[#allocation10 + $0x194] ss:$48 sps:$4 sm:$0xff]   ;;  %v10138_v19 = vld [vmem:[#allocation10 + $0x19c] ss:$48 sps:$4 sm:$0xff]  }
 0x2e6   :  { %5166 = vmatprep.mubr.bf16.mxu1 %v11522_v39  ;;  %5289 = vmatprep.mubr.bf16.mxu0 %v11522_v39  ;;  %v10180_v50 = vld [vmem:[#allocation10 + $0x43c] ss:$48 sps:$4 sm:$0xff]   ;;  %v10181_v55 = vld [vmem:[#allocation10 + $0x490] ss:$48 sps:$4 sm:$0xff]  }
 0x2e8   :  { %5151 = vmatpush1.bf16.msra.mxu1 %v10061_v20  ;;  %5274 = vmatpush1.bf16.msra.mxu0 %v10064_v21  ;;  %v10133_v20 = vld [vmem:[#allocation10 + $0x190] ss:$48 sps:$4 sm:$0xff]   ;;  %v10136_v21 = vld [vmem:[#allocation10 + $0x198] ss:$48 sps:$4 sm:$0xff]  }
 0x2e9   :  { %5152 = vmatprep.subr.bf16.mxu1 %v10069_v23  ;;  %5275 = vmatprep.subr.bf16.mxu0 %v10072_v24  ;;  %v10141_v23 = vld [vmem:[#allocation10 + $0x1f4] ss:$48 sps:$4 sm:$0xff]   ;;  %v10144_v24 = vld [vmem:[#allocation10 + $0x1fc] ss:$48 sps:$4 sm:$0xff]  }
 0x2ec   :  { %5153 = vmatpush1.bf16.msra.mxu1 %v10067_v26  ;;  %5276 = vmatpush1.bf16.msra.mxu0 %v10070_v27  ;;  %v10139_v26 = vld [vmem:[#allocation10 + $0x1f0] ss:$48 sps:$4 sm:$0xff]   ;;  %v10142_v27 = vld [vmem:[#allocation10 + $0x1f8] ss:$48 sps:$4 sm:$0xff]  }
 0x2ed   :  { %5154 = vmatprep.subr.bf16.mxu1 %v10075_v28  ;;  %5277 = vmatprep.subr.bf16.mxu0 %v10078_v29  ;;  %v10147_v28 = vld [vmem:[#allocation10 + $0x254] ss:$48 sps:$4 sm:$0xff]   ;;  %v10150_v29 = vld [vmem:[#allocation10 + $0x25c] ss:$48 sps:$4 sm:$0xff]  }
 0x2f0   :  { %5155 = vmatpush1.bf16.msra.mxu1 %v10073_v30  ;;  %5278 = vmatpush1.bf16.msra.mxu0 %v10076_v31  ;;  %v10145_v30 = vld [vmem:[#allocation10 + $0x250] ss:$48 sps:$4 sm:$0xff]   ;;  %v10148_v31 = vld [vmem:[#allocation10 + $0x258] ss:$48 sps:$4 sm:$0xff]  }
 0x2f1   :  { %5156 = vmatprep.subr.bf16.mxu1 %v10081_v32  ;;  %5279 = vmatprep.subr.bf16.mxu0 %v10084_v33  ;;  %v10153_v32 = vld [vmem:[#allocation10 + $0x2b4] ss:$48 sps:$4 sm:$0xff]   ;;  %v10156_v33 = vld [vmem:[#allocation10 + $0x2bc] ss:$48 sps:$4 sm:$0xff]  }
 0x2f4   :  { %5157 = vmatpush1.bf16.msra.mxu1 %v10079_v34  ;;  %5280 = vmatpush1.bf16.msra.mxu0 %v10082_v35  ;;  %v10151_v34 = vld [vmem:[#allocation10 + $0x2b0] ss:$48 sps:$4 sm:$0xff]   ;;  %v10154_v35 = vld [vmem:[#allocation10 + $0x2b8] ss:$48 sps:$4 sm:$0xff]  }
 0x2f5   :  { %5158 = vmatprep.subr.bf16.mxu1 %v10087_v36  ;;  %5281 = vmatprep.subr.bf16.mxu0 %v10090_v8  ;;  %v10159_v36 = vld [vmem:[#allocation10 + $0x314] ss:$48 sps:$4 sm:$0xff]   ;;  %v10162_v8 = vld [vmem:[#allocation10 + $0x31c] ss:$48 sps:$4 sm:$0xff]  }
 0x2f8   :  { %5159 = vmatpush1.bf16.msra.mxu1 %v10085_v38  ;;  %5282 = vmatpush1.bf16.msra.mxu0 %v10088_v7  ;;  %v10157_v38 = vld [vmem:[#allocation10 + $0x310] ss:$48 sps:$4 sm:$0xff]   ;;  %v10160_v7 = vld [vmem:[#allocation10 + $0x318] ss:$48 sps:$4 sm:$0xff]  }
 0x2f9   :  { %5160 = vmatprep.subr.bf16.mxu1 %v10093_v41  ;;  %5283 = vmatprep.subr.bf16.mxu0 %v10096_v42  ;;  %v10165_v41 = vld [vmem:[#allocation10 + $0x374] ss:$48 sps:$4 sm:$0xff]   ;;  %v10168_v42 = vld [vmem:[#allocation10 + $0x37c] ss:$48 sps:$4 sm:$0xff]  }
 0x2fc   :  { %5161 = vmatpush1.bf16.msra.mxu1 %v10091_v43  ;;  %5284 = vmatpush1.bf16.msra.mxu0 %v10094_v44  ;;  %v10163_v43 = vld [vmem:[#allocation10 + $0x370] ss:$48 sps:$4 sm:$0xff]   ;;  %v10166_v44 = vld [vmem:[#allocation10 + $0x378] ss:$48 sps:$4 sm:$0xff]  }
 0x2fd   :  { %5162 = vmatprep.subr.bf16.mxu1 %v10099_v46  ;;  %5285 = vmatprep.subr.bf16.mxu0 %v10102_v47  ;;  %v10174_v46 = vld [vmem:[#allocation10 + $0x3dc] ss:$48 sps:$4 sm:$0xff]   ;;  %v10169_v47 = vld [vmem:[#allocation10 + $0x3d0] ss:$48 sps:$4 sm:$0xff]  }
 0x300   :  { %5163 = vmatpush1.bf16.msra.mxu1 %v10097_v48  ;;  %5286 = vmatpush1.bf16.msra.mxu0 %v10100_v49  ;;  %v10172_v48 = vld [vmem:[#allocation10 + $0x3d8] ss:$48 sps:$4 sm:$0xff]   ;;  %v10177_v49 = vld [vmem:[#allocation10 + $0x434] ss:$48 sps:$4 sm:$0xff]  }
 0x301   :  { %5164 = vmatprep.subr.bf16.mxu1 %v10105_v51  ;;  %5287 = vmatprep.subr.bf16.mxu0 %v10108_v52  ;;  %v10175_v51 = vld [vmem:[#allocation10 + $0x430] ss:$48 sps:$4 sm:$0xff]   ;;  %v10178_v52 = vld [vmem:[#allocation10 + $0x438] ss:$48 sps:$4 sm:$0xff]  }
 0x304   :  { %5165 = vmatpush1.bf16.msra.mxu1 %v10103_v53  ;;  %5288 = vmatpush1.bf16.msra.mxu0 %v10106_v54  ;;  %v10183_v53 = vld [vmem:[#allocation10 + $0x494] ss:$48 sps:$4 sm:$0xff]   ;;  %v10186_v54 = vld [vmem:[#allocation10 + $0x49c] ss:$48 sps:$4 sm:$0xff]  }
 0x305   :  { %5298 = vmatprep.subr.bf16.mxu1 %v10111_v63  ;;  %5421 = vmatprep.subr.bf16.mxu0 %v10114_v56  ;;  %v10184_v63 = vld [vmem:[#allocation10 + $0x498] ss:$48 sps:$4 sm:$0xff]   ;;  %v10189_v56 = vld [vmem:[#allocation10 + $0x4f4] ss:$48 sps:$4 sm:$0xff]  }
 0x307   :  { %5167 = vmatmul.mubr.bf16.vlgmr.msra.gmra.mrb[4].mxu1 %v11531_v59  ;;  %5290 = vmatmul.mubr.bf16.vlgmr.msra.gmra.mrb[16].mxu0 %v11531_v59 }
 0x308   :  { %5299 = vmatpush1.bf16.msra.mxu1 %v10109_v58  ;;  %5330 = vmatprep.mubr.bf16.mxu1 %v11494_v0  ;;  %v10192_v58 = vld [vmem:[#allocation10 + $0x4fc] ss:$48 sps:$4 sm:$0xff]  }
 0x309   :  { %5422 = vmatpush1.bf16.msra.mxu0 %v10112_v60  ;;  %5453 = vmatprep.mubr.bf16.mxu0 %v11494_v0  ;;  %v10187_v60 = vld [vmem:[#allocation10 + $0x4f0] ss:$48 sps:$4 sm:$0xff]  }
 0x30a   :  { %5300 = vmatprep.subr.bf16.mxu1 %v10117_v3  ;;  %5423 = vmatprep.subr.bf16.mxu0 %v10120_v4  ;;  %v10190_v3 = vld [vmem:[#allocation10 + $0x4f8] ss:$48 sps:$4 sm:$0xff]   ;;  %v10195_v4 = vld [vmem:[#allocation10 + $0x554] ss:$48 sps:$4 sm:$0xff]  }
 0x30c   :  { %5301 = vmatpush1.bf16.msra.mxu1 %v10115_v5  ;;  %v10198_v5 = vld [vmem:[#allocation10 + $0x55c] ss:$48 sps:$4 sm:$0xff]  }
 0x30d   :  { %5424 = vmatpush1.bf16.msra.mxu0 %v10118_v6  ;;  %5302 = vmatprep.subr.bf16.mxu1 %v10123_v9  ;;  %v10193_v6 = vld [vmem:[#allocation10 + $0x550] ss:$48 sps:$4 sm:$0xff]   ;;  %v10196_v9 = vld [vmem:[#allocation10 + $0x558] ss:$48 sps:$4 sm:$0xff]  }
 0x30e   :  { %5425 = vmatprep.subr.bf16.mxu0 %v10126_v10  ;;  %v10201_v10 = vld [vmem:[#allocation10 + $0x5b4] ss:$48 sps:$4 sm:$0xff]  }
 0x310   :  { %5303 = vmatpush1.bf16.msra.mxu1 %v10121_v11  ;;  %v10204_v11 = vld [vmem:[#allocation10 + $0x5bc] ss:$48 sps:$4 sm:$0xff]  }
 0x311   :  { %5426 = vmatpush1.bf16.msra.mxu0 %v10124_v12  ;;  %5304 = vmatprep.subr.bf16.mxu1 %v10129_v13  ;;  %v10199_v12 = vld [vmem:[#allocation10 + $0x5b0] ss:$48 sps:$4 sm:$0xff]   ;;  %v10202_v13 = vld [vmem:[#allocation10 + $0x5b8] ss:$48 sps:$4 sm:$0xff]  }
 0x312   :  { %5427 = vmatprep.subr.bf16.mxu0 %v10132_v14  ;;  %v10207_v14 = vld [vmem:[#allocation10 + $0x614] ss:$48 sps:$4 sm:$0xff]  }
 0x314   :  { %5305 = vmatpush1.bf16.msra.mxu1 %v10127_v15  ;;  %v10210_v15 = vld [vmem:[#allocation10 + $0x61c] ss:$48 sps:$4 sm:$0xff]  }
 0x315   :  { %5428 = vmatpush1.bf16.msra.mxu0 %v10130_v17  ;;  %5306 = vmatprep.subr.bf16.mxu1 %v10135_v18  ;;  %v10205_v17 = vld [vmem:[#allocation10 + $0x610] ss:$48 sps:$4 sm:$0xff]   ;;  %v10208_v18 = vld [vmem:[#allocation10 + $0x618] ss:$48 sps:$4 sm:$0xff]  }
 0x316   :  { %5429 = vmatprep.subr.bf16.mxu0 %v10138_v19  ;;  %v10213_v19 = vld [vmem:[#allocation10 + $0x674] ss:$48 sps:$4 sm:$0xff]  }
 0x318   :  { %5307 = vmatpush1.bf16.msra.mxu1 %v10133_v20  ;;  %v10216_v20 = vld [vmem:[#allocation10 + $0x67c] ss:$48 sps:$4 sm:$0xff]  }
 0x319   :  { %5430 = vmatpush1.bf16.msra.mxu0 %v10136_v21  ;;  %5308 = vmatprep.subr.bf16.mxu1 %v10141_v23  ;;  %v10211_v21 = vld [vmem:[#allocation10 + $0x670] ss:$48 sps:$4 sm:$0xff]   ;;  %v10214_v23 = vld [vmem:[#allocation10 + $0x678] ss:$48 sps:$4 sm:$0xff]  }
 0x31a   :  { %5431 = vmatprep.subr.bf16.mxu0 %v10144_v24  ;;  %v10219_v24 = vld [vmem:[#allocation10 + $0x6d4] ss:$48 sps:$4 sm:$0xff]  }
 0x31c   :  { %5309 = vmatpush1.bf16.msra.mxu1 %v10139_v26  ;;  %v10222_v26 = vld [vmem:[#allocation10 + $0x6dc] ss:$48 sps:$4 sm:$0xff]  }
 0x31d   :  { %5432 = vmatpush1.bf16.msra.mxu0 %v10142_v27  ;;  %5310 = vmatprep.subr.bf16.mxu1 %v10147_v28  ;;  %v10217_v27 = vld [vmem:[#allocation10 + $0x6d0] ss:$48 sps:$4 sm:$0xff]   ;;  %v10220_v28 = vld [vmem:[#allocation10 + $0x6d8] ss:$48 sps:$4 sm:$0xff]  }
 0x31e   :  { %5433 = vmatprep.subr.bf16.mxu0 %v10150_v29  ;;  %v10225_v29 = vld [vmem:[#allocation10 + $0x734] ss:$48 sps:$4 sm:$0xff]  }
 0x320   :  { %5311 = vmatpush1.bf16.msra.mxu1 %v10145_v30  ;;  %v10228_v30 = vld [vmem:[#allocation10 + $0x73c] ss:$48 sps:$4 sm:$0xff]  }
 0x321   :  { %5434 = vmatpush1.bf16.msra.mxu0 %v10148_v31  ;;  %5312 = vmatprep.subr.bf16.mxu1 %v10153_v32  ;;  %v10223_v31 = vld [vmem:[#allocation10 + $0x730] ss:$48 sps:$4 sm:$0xff]   ;;  %v10226_v32 = vld [vmem:[#allocation10 + $0x738] ss:$48 sps:$4 sm:$0xff]  }
 0x322   :  { %5435 = vmatprep.subr.bf16.mxu0 %v10156_v33  ;;  %v10231_v33 = vld [vmem:[#allocation10 + $0x794] ss:$48 sps:$4 sm:$0xff]  }
 0x324   :  { %5313 = vmatpush1.bf16.msra.mxu1 %v10151_v34  ;;  %v10234_v34 = vld [vmem:[#allocation10 + $0x79c] ss:$48 sps:$4 sm:$0xff]  }
 0x325   :  { %5436 = vmatpush1.bf16.msra.mxu0 %v10154_v35  ;;  %5314 = vmatprep.subr.bf16.mxu1 %v10159_v36  ;;  %v10229_v35 = vld [vmem:[#allocation10 + $0x790] ss:$48 sps:$4 sm:$0xff]   ;;  %v10232_v36 = vld [vmem:[#allocation10 + $0x798] ss:$48 sps:$4 sm:$0xff]  }
 0x326   :  { %5437 = vmatprep.subr.bf16.mxu0 %v10162_v8  ;;  %v10237_v8 = vld [vmem:[#allocation10 + $0x7f4] ss:$48 sps:$4 sm:$0xff]  }
 0x328   :  { %5315 = vmatpush1.bf16.msra.mxu1 %v10157_v38  ;;  %v10240_v38 = vld [vmem:[#allocation10 + $0x7fc] ss:$48 sps:$4 sm:$0xff]  }
 0x329   :  { %5438 = vmatpush1.bf16.msra.mxu0 %v10160_v7  ;;  %5316 = vmatprep.subr.bf16.mxu1 %v10165_v41  ;;  %v10235_v7 = vld [vmem:[#allocation10 + $0x7f0] ss:$48 sps:$4 sm:$0xff]   ;;  %v10238_v41 = vld [vmem:[#allocation10 + $0x7f8] ss:$48 sps:$4 sm:$0xff]  }
 0x32a   :  { %5439 = vmatprep.subr.bf16.mxu0 %v10168_v42  ;;  %v10243_v42 = vld [vmem:[#allocation10 + $0x854] ss:$48 sps:$4 sm:$0xff]  }
 0x32c   :  { %5317 = vmatpush1.bf16.msra.mxu1 %v10163_v43  ;;  %v10246_v43 = vld [vmem:[#allocation10 + $0x85c] ss:$48 sps:$4 sm:$0xff]  }
 0x32d   :  { %5440 = vmatpush1.bf16.msra.mxu0 %v10166_v44  ;;  %5318 = vmatprep.subr.bf16.mxu1 %v10171_v45  ;;  %v10241_v44 = vld [vmem:[#allocation10 + $0x850] ss:$48 sps:$4 sm:$0xff]   ;;  %v10244_v45 = vld [vmem:[#allocation10 + $0x858] ss:$48 sps:$4 sm:$0xff]  }
 0x32e   :  { %5441 = vmatprep.subr.bf16.mxu0 %v10174_v46  ;;  %v10249_v46 = vld [vmem:[#allocation10 + $0x8b4] ss:$48 sps:$4 sm:$0xff]  }
 0x330   :  { %5319 = vmatpush1.bf16.msra.mxu1 %v10169_v47  ;;  %v10252_v47 = vld [vmem:[#allocation10 + $0x8bc] ss:$48 sps:$4 sm:$0xff]  }
 0x331   :  { %5442 = vmatpush1.bf16.msra.mxu0 %v10172_v48  ;;  %5320 = vmatprep.subr.bf16.mxu1 %v10177_v49  ;;  %v10247_v48 = vld [vmem:[#allocation10 + $0x8b0] ss:$48 sps:$4 sm:$0xff]   ;;  %v10250_v49 = vld [vmem:[#allocation10 + $0x8b8] ss:$48 sps:$4 sm:$0xff]  }
 0x332   :  { %5443 = vmatprep.subr.bf16.mxu0 %v10180_v50  ;;  %v10255_v50 = vld [vmem:[#allocation10 + $0x914] ss:$48 sps:$4 sm:$0xff]  }
 0x334   :  { %5321 = vmatpush1.bf16.msra.mxu1 %v10175_v51  ;;  %v10258_v51 = vld [vmem:[#allocation10 + $0x91c] ss:$48 sps:$4 sm:$0xff]  }
 0x335   :  { %5444 = vmatpush1.bf16.msra.mxu0 %v10178_v52  ;;  %5322 = vmatprep.subr.bf16.mxu1 %v10183_v53  ;;  %v10253_v52 = vld [vmem:[#allocation10 + $0x910] ss:$48 sps:$4 sm:$0xff]   ;;  %v10256_v53 = vld [vmem:[#allocation10 + $0x918] ss:$48 sps:$4 sm:$0xff]  }
 0x336   :  { %5445 = vmatprep.subr.bf16.mxu0 %v10186_v54  ;;  %v10261_v54 = vld [vmem:[#allocation10 + $0x974] ss:$48 sps:$4 sm:$0xff]  }
 0x338   :  { %5323 = vmatpush1.bf16.msra.mxu1 %v10181_v55  ;;  %v10264_v55 = vld [vmem:[#allocation10 + $0x97c] ss:$48 sps:$4 sm:$0xff]  }
 0x339   :  { %5446 = vmatpush1.bf16.msra.mxu0 %v10184_v63  ;;  %5324 = vmatprep.subr.bf16.mxu1 %v10189_v56  ;;  %v10259_v63 = vld [vmem:[#allocation10 + $0x970] ss:$48 sps:$4 sm:$0xff]   ;;  %v10262_v56 = vld [vmem:[#allocation10 + $0x978] ss:$48 sps:$4 sm:$0xff]  }
 0x33a   :  { %5447 = vmatprep.subr.bf16.mxu0 %v10192_v58  ;;  %v10267_v58 = vld [vmem:[#allocation10 + $0x9d4] ss:$48 sps:$4 sm:$0xff]  }
 0x33c   :  { %5325 = vmatpush1.bf16.msra.mxu1 %v10187_v60  ;;  %v10270_v60 = vld [vmem:[#allocation10 + $0x9dc] ss:$48 sps:$4 sm:$0xff]  }
 0x33d   :  { %5448 = vmatpush1.bf16.msra.mxu0 %v10190_v3  ;;  %5326 = vmatprep.subr.bf16.mxu1 %v10195_v4  ;;  %v10265_v3 = vld [vmem:[#allocation10 + $0x9d0] ss:$48 sps:$4 sm:$0xff]   ;;  %v10268_v4 = vld [vmem:[#allocation10 + $0x9d8] ss:$48 sps:$4 sm:$0xff]  }
 0x33e   :  { %5449 = vmatprep.subr.bf16.mxu0 %v10198_v5  ;;  %v10273_v5 = vld [vmem:[#allocation10 + $0xa34] ss:$48 sps:$4 sm:$0xff]  }
 0x340   :  { %5327 = vmatpush1.bf16.msra.mxu1 %v10193_v6  ;;  %v10276_v6 = vld [vmem:[#allocation10 + $0xa3c] ss:$48 sps:$4 sm:$0xff]  }
 0x341   :  { %5450 = vmatpush1.bf16.msra.mxu0 %v10196_v9  ;;  %5328 = vmatprep.subr.bf16.mxu1 %v10201_v10  ;;  %v10271_v9 = vld [vmem:[#allocation10 + $0xa30] ss:$48 sps:$4 sm:$0xff]   ;;  %v10274_v10 = vld [vmem:[#allocation10 + $0xa38] ss:$48 sps:$4 sm:$0xff]  }
 0x342   :  { %5451 = vmatprep.subr.bf16.mxu0 %v10204_v11  ;;  %v10279_v11 = vld [vmem:[#allocation10 + $0xa94] ss:$48 sps:$4 sm:$0xff]  }
 0x344   :  { %5329 = vmatpush1.bf16.msra.mxu1 %v10199_v12  ;;  %v10282_v12 = vld [vmem:[#allocation10 + $0xa9c] ss:$48 sps:$4 sm:$0xff]  }
 0x345   :  { %5452 = vmatpush1.bf16.msra.mxu0 %v10202_v13  ;;  %5339 = vmatprep.subr.bf16.mxu1 %v10207_v14  ;;  %v10277_v13 = vld [vmem:[#allocation10 + $0xa90] ss:$48 sps:$4 sm:$0xff]   ;;  %v10280_v14 = vld [vmem:[#allocation10 + $0xa98] ss:$48 sps:$4 sm:$0xff]  }
 0x346   :  { %5462 = vmatprep.subr.bf16.mxu0 %v10210_v15  ;;  %v10285_v15 = vld [vmem:[#allocation10 + $0xaf4] ss:$48 sps:$4 sm:$0xff]  }
 0x347   :  { %5331 = vmatmul.mubr.bf16.vlgmr.msra.gmra.mrb[8].mxu1 %v11496_v22 }
 0x348   :  { %5454 = vmatmul.mubr.bf16.vlgmr.msra.gmra.mrb[20].mxu0 %v11496_v22  ;;  %5340 = vmatpush1.bf16.msra.mxu1 %v10205_v17  ;;  %v10288_v17 = vld [vmem:[#allocation10 + $0xafc] ss:$48 sps:$4 sm:$0xff]  }
 0x349   :  { %5371 = vmatprep.mubr.bf16.mxu1 %v11500_v25  ;;  %5463 = vmatpush1.bf16.msra.mxu0 %v10208_v18  ;;  %v10283_v18 = vld [vmem:[#allocation10 + $0xaf0] ss:$48 sps:$4 sm:$0xff]  }
 0x34a   :  { %5494 = vmatprep.mubr.bf16.mxu0 %v11500_v25  ;;  %5341 = vmatprep.subr.bf16.mxu1 %v10213_v19  ;;  %v10286_v19 = vld [vmem:[#allocation10 + $0xaf8] ss:$48 sps:$4 sm:$0xff]  }
 0x34b   :  { %5464 = vmatprep.subr.bf16.mxu0 %v10216_v20  ;;  %v10291_v20 = vld [vmem:[#allocation10 + $0xb54] ss:$48 sps:$4 sm:$0xff]  }
 0x34c   :  { %5342 = vmatpush1.bf16.msra.mxu1 %v10211_v21  ;;  %v10294_v21 = vld [vmem:[#allocation10 + $0xb5c] ss:$48 sps:$4 sm:$0xff]  }
 0x34d   :  { %5465 = vmatpush1.bf16.msra.mxu0 %v10214_v23  ;;  %5343 = vmatprep.subr.bf16.mxu1 %v10219_v24  ;;  %v10289_v23 = vld [vmem:[#allocation10 + $0xb50] ss:$48 sps:$4 sm:$0xff]   ;;  %v10292_v24 = vld [vmem:[#allocation10 + $0xb58] ss:$48 sps:$4 sm:$0xff]  }
 0x34e   :  { %5466 = vmatprep.subr.bf16.mxu0 %v10222_v26  ;;  %v10297_v26 = vld [vmem:[#allocation10 + $0xbb4] ss:$48 sps:$4 sm:$0xff]  }
 0x350   :  { %5344 = vmatpush1.bf16.msra.mxu1 %v10217_v27  ;;  %v10300_v27 = vld [vmem:[#allocation10 + $0xbbc] ss:$48 sps:$4 sm:$0xff]  }
 0x351   :  { %5467 = vmatpush1.bf16.msra.mxu0 %v10220_v28  ;;  %5345 = vmatprep.subr.bf16.mxu1 %v10225_v29  ;;  %v10295_v28 = vld [vmem:[#allocation10 + $0xbb0] ss:$48 sps:$4 sm:$0xff]   ;;  %v10298_v29 = vld [vmem:[#allocation10 + $0xbb8] ss:$48 sps:$4 sm:$0xff]  }
 0x352   :  { %5468 = vmatprep.subr.bf16.mxu0 %v10228_v30  ;;  %v10303_v30 = vld [vmem:[#allocation10 + $0xc14] ss:$48 sps:$4 sm:$0xff]  }
 0x354   :  { %5346 = vmatpush1.bf16.msra.mxu1 %v10223_v31  ;;  %v10306_v31 = vld [vmem:[#allocation10 + $0xc1c] ss:$48 sps:$4 sm:$0xff]  }
 0x355   :  { %5469 = vmatpush1.bf16.msra.mxu0 %v10226_v32  ;;  %5347 = vmatprep.subr.bf16.mxu1 %v10231_v33  ;;  %v10301_v32 = vld [vmem:[#allocation10 + $0xc10] ss:$48 sps:$4 sm:$0xff]   ;;  %v10304_v33 = vld [vmem:[#allocation10 + $0xc18] ss:$48 sps:$4 sm:$0xff]  }
 0x356   :  { %5470 = vmatprep.subr.bf16.mxu0 %v10234_v34  ;;  %v10309_v34 = vld [vmem:[#allocation10 + $0xc74] ss:$48 sps:$4 sm:$0xff]  }
 0x358   :  { %5348 = vmatpush1.bf16.msra.mxu1 %v10229_v35  ;;  %v10312_v35 = vld [vmem:[#allocation10 + $0xc7c] ss:$48 sps:$4 sm:$0xff]  }
 0x359   :  { %5471 = vmatpush1.bf16.msra.mxu0 %v10232_v36  ;;  %5349 = vmatprep.subr.bf16.mxu1 %v10237_v8  ;;  %v10307_v36 = vld [vmem:[#allocation10 + $0xc70] ss:$48 sps:$4 sm:$0xff]   ;;  %v10310_v8 = vld [vmem:[#allocation10 + $0xc78] ss:$48 sps:$4 sm:$0xff]  }
 0x35a   :  { %5472 = vmatprep.subr.bf16.mxu0 %v10240_v38  ;;  %v10315_v38 = vld [vmem:[#allocation10 + $0xcd4] ss:$48 sps:$4 sm:$0xff]  }
 0x35c   :  { %5350 = vmatpush1.bf16.msra.mxu1 %v10235_v7  ;;  %v10318_v7 = vld [vmem:[#allocation10 + $0xcdc] ss:$48 sps:$4 sm:$0xff]  }
 0x35d   :  { %5473 = vmatpush1.bf16.msra.mxu0 %v10238_v41  ;;  %5351 = vmatprep.subr.bf16.mxu1 %v10243_v42  ;;  %v10313_v41 = vld [vmem:[#allocation10 + $0xcd0] ss:$48 sps:$4 sm:$0xff]   ;;  %v10316_v42 = vld [vmem:[#allocation10 + $0xcd8] ss:$48 sps:$4 sm:$0xff]  }
 0x35e   :  { %5474 = vmatprep.subr.bf16.mxu0 %v10246_v43  ;;  %v10321_v43 = vld [vmem:[#allocation10 + $0xd34] ss:$48 sps:$4 sm:$0xff]  }
 0x360   :  { %5352 = vmatpush1.bf16.msra.mxu1 %v10241_v44  ;;  %v10324_v44 = vld [vmem:[#allocation10 + $0xd3c] ss:$48 sps:$4 sm:$0xff]  }
 0x361   :  { %5475 = vmatpush1.bf16.msra.mxu0 %v10244_v45  ;;  %5353 = vmatprep.subr.bf16.mxu1 %v10249_v46  ;;  %v10319_v45 = vld [vmem:[#allocation10 + $0xd30] ss:$48 sps:$4 sm:$0xff]   ;;  %v10322_v46 = vld [vmem:[#allocation10 + $0xd38] ss:$48 sps:$4 sm:$0xff]  }
 0x362   :  { %5476 = vmatprep.subr.bf16.mxu0 %v10252_v47  ;;  %v10327_v47 = vld [vmem:[#allocation10 + $0xd94] ss:$48 sps:$4 sm:$0xff]  }
 0x364   :  { %5354 = vmatpush1.bf16.msra.mxu1 %v10247_v48  ;;  %v10330_v48 = vld [vmem:[#allocation10 + $0xd9c] ss:$48 sps:$4 sm:$0xff]  }
 0x365   :  { %5477 = vmatpush1.bf16.msra.mxu0 %v10250_v49  ;;  %5355 = vmatprep.subr.bf16.mxu1 %v10255_v50  ;;  %v10325_v49 = vld [vmem:[#allocation10 + $0xd90] ss:$48 sps:$4 sm:$0xff]   ;;  %v10328_v50 = vld [vmem:[#allocation10 + $0xd98] ss:$48 sps:$4 sm:$0xff]  }
 0x366   :  { %5478 = vmatprep.subr.bf16.mxu0 %v10258_v51  ;;  %v10333_v51 = vld [vmem:[#allocation10 + $0xdf4] ss:$48 sps:$4 sm:$0xff]  }
 0x368   :  { %5356 = vmatpush1.bf16.msra.mxu1 %v10253_v52  ;;  %v10336_v52 = vld [vmem:[#allocation10 + $0xdfc] ss:$48 sps:$4 sm:$0xff]  }
 0x369   :  { %5479 = vmatpush1.bf16.msra.mxu0 %v10256_v53  ;;  %5357 = vmatprep.subr.bf16.mxu1 %v10261_v54  ;;  %v10331_v53 = vld [vmem:[#allocation10 + $0xdf0] ss:$48 sps:$4 sm:$0xff]   ;;  %v10334_v54 = vld [vmem:[#allocation10 + $0xdf8] ss:$48 sps:$4 sm:$0xff]  }
 0x36a   :  { %5480 = vmatprep.subr.bf16.mxu0 %v10264_v55  ;;  %v10339_v55 = vld [vmem:[#allocation10 + $0xe54] ss:$48 sps:$4 sm:$0xff]  }
 0x36c   :  { %5358 = vmatpush1.bf16.msra.mxu1 %v10259_v63  ;;  %v10342_v63 = vld [vmem:[#allocation10 + $0xe5c] ss:$48 sps:$4 sm:$0xff]  }
 0x36d   :  { %5481 = vmatpush1.bf16.msra.mxu0 %v10262_v56  ;;  %5359 = vmatprep.subr.bf16.mxu1 %v10267_v58  ;;  %v10337_v56 = vld [vmem:[#allocation10 + $0xe50] ss:$48 sps:$4 sm:$0xff]   ;;  %v10340_v58 = vld [vmem:[#allocation10 + $0xe58] ss:$48 sps:$4 sm:$0xff]  }
 0x36e   :  { %5482 = vmatprep.subr.bf16.mxu0 %v10270_v60  ;;  %v10345_v60 = vld [vmem:[#allocation10 + $0xeb4] ss:$48 sps:$4 sm:$0xff]  }
 0x370   :  { %5360 = vmatpush1.bf16.msra.mxu1 %v10265_v3  ;;  %v10348_v3 = vld [vmem:[#allocation10 + $0xebc] ss:$48 sps:$4 sm:$0xff]  }
 0x371   :  { %5483 = vmatpush1.bf16.msra.mxu0 %v10268_v4  ;;  %5361 = vmatprep.subr.bf16.mxu1 %v10273_v5  ;;  %v10343_v4 = vld [vmem:[#allocation10 + $0xeb0] ss:$48 sps:$4 sm:$0xff]   ;;  %v10346_v5 = vld [vmem:[#allocation10 + $0xeb8] ss:$48 sps:$4 sm:$0xff]  }
 0x372   :  { %5484 = vmatprep.subr.bf16.mxu0 %v10276_v6  ;;  %v10351_v6 = vld [vmem:[#allocation10 + $0xf14] ss:$48 sps:$4 sm:$0xff]  }
 0x374   :  { %5362 = vmatpush1.bf16.msra.mxu1 %v10271_v9  ;;  %v10354_v9 = vld [vmem:[#allocation10 + $0xf1c] ss:$48 sps:$4 sm:$0xff]  }
 0x375   :  { %5485 = vmatpush1.bf16.msra.mxu0 %v10274_v10  ;;  %5363 = vmatprep.subr.bf16.mxu1 %v10279_v11  ;;  %v10349_v10 = vld [vmem:[#allocation10 + $0xf10] ss:$48 sps:$4 sm:$0xff]   ;;  %v10352_v11 = vld [vmem:[#allocation10 + $0xf18] ss:$48 sps:$4 sm:$0xff]  }
 0x376   :  { %5486 = vmatprep.subr.bf16.mxu0 %v10282_v12  ;;  %v10357_v12 = vld [vmem:[#allocation10 + $0xf74] ss:$48 sps:$4 sm:$0xff]  }
 0x378   :  { %5364 = vmatpush1.bf16.msra.mxu1 %v10277_v13  ;;  %v10360_v13 = vld [vmem:[#allocation10 + $0xf7c] ss:$48 sps:$4 sm:$0xff]  }
 0x379   :  { %5487 = vmatpush1.bf16.msra.mxu0 %v10280_v14  ;;  %5365 = vmatprep.subr.bf16.mxu1 %v10285_v15  ;;  %v10355_v14 = vld [vmem:[#allocation10 + $0xf70] ss:$48 sps:$4 sm:$0xff]   ;;  %v10358_v15 = vld [vmem:[#allocation10 + $0xf78] ss:$48 sps:$4 sm:$0xff]  }
 0x37a   :  { %5488 = vmatprep.subr.bf16.mxu0 %v10288_v17  ;;  %v10363_v17 = vld [vmem:[#allocation10 + $0xfd4] ss:$48 sps:$4 sm:$0xff]  }
 0x37c   :  { %5366 = vmatpush1.bf16.msra.mxu1 %v10283_v18  ;;  %v10366_v18 = vld [vmem:[#allocation10 + $0xfdc] ss:$48 sps:$4 sm:$0xff]  }
 0x37d   :  { %5489 = vmatpush1.bf16.msra.mxu0 %v10286_v19  ;;  %5367 = vmatprep.subr.bf16.mxu1 %v10291_v20  ;;  %v10361_v19 = vld [vmem:[#allocation10 + $0xfd0] ss:$48 sps:$4 sm:$0xff]   ;;  %v10364_v20 = vld [vmem:[#allocation10 + $0xfd8] ss:$48 sps:$4 sm:$0xff]  }
 0x37e   :  { %5490 = vmatprep.subr.bf16.mxu0 %v10294_v21  ;;  %v10369_v21 = vld [vmem:[#allocation10 + $0x1034] ss:$48 sps:$4 sm:$0xff]  }
 0x380   :  { %5368 = vmatpush1.bf16.msra.mxu1 %v10289_v23  ;;  %v10372_v23 = vld [vmem:[#allocation10 + $0x103c] ss:$48 sps:$4 sm:$0xff]  }
 0x381   :  { %5491 = vmatpush1.bf16.msra.mxu0 %v10292_v24  ;;  %5369 = vmatprep.subr.bf16.mxu1 %v10297_v26  ;;  %v10367_v24 = vld [vmem:[#allocation10 + $0x1030] ss:$48 sps:$4 sm:$0xff]   ;;  %v10370_v26 = vld [vmem:[#allocation10 + $0x1038] ss:$48 sps:$4 sm:$0xff]  }
 0x382   :  { %5492 = vmatprep.subr.bf16.mxu0 %v10300_v27  ;;  %v10375_v27 = vld [vmem:[#allocation10 + $0x1094] ss:$48 sps:$4 sm:$0xff]  }
 0x384   :  { %5370 = vmatpush1.bf16.msra.mxu1 %v10295_v28  ;;  %v10378_v28 = vld [vmem:[#allocation10 + $0x109c] ss:$48 sps:$4 sm:$0xff]  }
 0x385   :  { %5493 = vmatpush1.bf16.msra.mxu0 %v10298_v29  ;;  %5380 = vmatprep.subr.bf16.mxu1 %v10303_v30  ;;  %v10373_v29 = vld [vmem:[#allocation10 + $0x1090] ss:$48 sps:$4 sm:$0xff]   ;;  %v10376_v30 = vld [vmem:[#allocation10 + $0x1098] ss:$48 sps:$4 sm:$0xff]  }
 0x386   :  { %5503 = vmatprep.subr.bf16.mxu0 %v10306_v31  ;;  %v10381_v31 = vld [vmem:[#allocation10 + $0x10f4] ss:$48 sps:$4 sm:$0xff]  }
 0x387   :  { %5372 = vmatmul.mubr.bf16.vlgmr.msra.gmra.mrb[8].mxu1 %v11512_v37 }
 0x388   :  { %5495 = vmatmul.mubr.bf16.vlgmr.msra.gmra.mrb[20].mxu0 %v11512_v37  ;;  %5381 = vmatpush1.bf16.msra.mxu1 %v10301_v32  ;;  %v10384_v32 = vld [vmem:[#allocation10 + $0x10fc] ss:$48 sps:$4 sm:$0xff]  }
 0x389   :  { %5412 = vmatprep.mubr.bf16.mxu1 %v11522_v39  ;;  %5504 = vmatpush1.bf16.msra.mxu0 %v10304_v33  ;;  %v10379_v33 = vld [vmem:[#allocation10 + $0x10f0] ss:$48 sps:$4 sm:$0xff]  }
 0x38a   :  { %5535 = vmatprep.mubr.bf16.mxu0 %v11522_v39  ;;  %5382 = vmatprep.subr.bf16.mxu1 %v10309_v34  ;;  %v10382_v34 = vld [vmem:[#allocation10 + $0x10f8] ss:$48 sps:$4 sm:$0xff]  }
 0x38b   :  { %5505 = vmatprep.subr.bf16.mxu0 %v10312_v35  ;;  %v10387_v35 = vld [vmem:[#allocation10 + $0x1154] ss:$48 sps:$4 sm:$0xff]  }
 0x38c   :  { %5383 = vmatpush1.bf16.msra.mxu1 %v10307_v36  ;;  %v10390_v36 = vld [vmem:[#allocation10 + $0x115c] ss:$48 sps:$4 sm:$0xff]  }
 0x38d   :  { %5506 = vmatpush1.bf16.msra.mxu0 %v10310_v8  ;;  %5384 = vmatprep.subr.bf16.mxu1 %v10315_v38  ;;  %v10385_v8 = vld [vmem:[#allocation10 + $0x1150] ss:$48 sps:$4 sm:$0xff]   ;;  %v10388_v38 = vld [vmem:[#allocation10 + $0x1158] ss:$48 sps:$4 sm:$0xff]  }
 0x38e   :  { %5507 = vmatprep.subr.bf16.mxu0 %v10318_v7  ;;  %v10393_v7 = vld [vmem:[#allocation10 + $0x11b4] ss:$48 sps:$4 sm:$0xff]  }
 0x390   :  { %5385 = vmatpush1.bf16.msra.mxu1 %v10313_v41  ;;  %v10396_v41 = vld [vmem:[#allocation10 + $0x11bc] ss:$48 sps:$4 sm:$0xff]  }
 0x391   :  { %5508 = vmatpush1.bf16.msra.mxu0 %v10316_v42  ;;  %5386 = vmatprep.subr.bf16.mxu1 %v10321_v43  ;;  %v10391_v42 = vld [vmem:[#allocation10 + $0x11b0] ss:$48 sps:$4 sm:$0xff]   ;;  %v10394_v43 = vld [vmem:[#allocation10 + $0x11b8] ss:$48 sps:$4 sm:$0xff]  }
 0x392   :  { %5509 = vmatprep.subr.bf16.mxu0 %v10324_v44  ;;  %v10399_v44 = vld [vmem:[#allocation10 + $0x24] ss:$48 sps:$4 sm:$0xff]  }
 0x394   :  { %5387 = vmatpush1.bf16.msra.mxu1 %v10319_v45  ;;  %v10402_v45 = vld [vmem:[#allocation10 + $0x2c] ss:$48 sps:$4 sm:$0xff]  }
 0x395   :  { %5510 = vmatpush1.bf16.msra.mxu0 %v10322_v46  ;;  %5388 = vmatprep.subr.bf16.mxu1 %v10327_v47  ;;  %v10397_v46 = vld [vmem:[#allocation10 + $0x20] ss:$48 sps:$4 sm:$0xff]   ;;  %v10400_v47 = vld [vmem:[#allocation10 + $0x28] ss:$48 sps:$4 sm:$0xff]  }
 0x396   :  { %5511 = vmatprep.subr.bf16.mxu0 %v10330_v48  ;;  %v10405_v48 = vld [vmem:[#allocation10 + $0x84] ss:$48 sps:$4 sm:$0xff]  }
 0x398   :  { %5389 = vmatpush1.bf16.msra.mxu1 %v10325_v49  ;;  %v10408_v49 = vld [vmem:[#allocation10 + $0x8c] ss:$48 sps:$4 sm:$0xff]  }
 0x399   :  { %5512 = vmatpush1.bf16.msra.mxu0 %v10328_v50  ;;  %5390 = vmatprep.subr.bf16.mxu1 %v10333_v51  ;;  %v10403_v50 = vld [vmem:[#allocation10 + $0x80] ss:$48 sps:$4 sm:$0xff]   ;;  %v10406_v51 = vld [vmem:[#allocation10 + $0x88] ss:$48 sps:$4 sm:$0xff]  }
 0x39a   :  { %5513 = vmatprep.subr.bf16.mxu0 %v10336_v52  ;;  %v10411_v52 = vld [vmem:[#allocation10 + $0xe4] ss:$48 sps:$4 sm:$0xff]  }
 0x39c   :  { %5391 = vmatpush1.bf16.msra.mxu1 %v10331_v53  ;;  %v10414_v53 = vld [vmem:[#allocation10 + $0xec] ss:$48 sps:$4 sm:$0xff]  }
 0x39d   :  { %5514 = vmatpush1.bf16.msra.mxu0 %v10334_v54  ;;  %5392 = vmatprep.subr.bf16.mxu1 %v10339_v55  ;;  %v10409_v54 = vld [vmem:[#allocation10 + $0xe0] ss:$48 sps:$4 sm:$0xff]   ;;  %v10412_v55 = vld [vmem:[#allocation10 + $0xe8] ss:$48 sps:$4 sm:$0xff]  }
 0x39e   :  { %5515 = vmatprep.subr.bf16.mxu0 %v10342_v63  ;;  %v10417_v63 = vld [vmem:[#allocation10 + $0x144] ss:$48 sps:$4 sm:$0xff]  }
 0x3a0   :  { %5393 = vmatpush1.bf16.msra.mxu1 %v10337_v56  ;;  %v10420_v56 = vld [vmem:[#allocation10 + $0x14c] ss:$48 sps:$4 sm:$0xff]  }
 0x3a1   :  { %5516 = vmatpush1.bf16.msra.mxu0 %v10340_v58  ;;  %5394 = vmatprep.subr.bf16.mxu1 %v10345_v60  ;;  %v10415_v58 = vld [vmem:[#allocation10 + $0x140] ss:$48 sps:$4 sm:$0xff]   ;;  %v10418_v60 = vld [vmem:[#allocation10 + $0x148] ss:$48 sps:$4 sm:$0xff]  }
 0x3a2   :  { %5517 = vmatprep.subr.bf16.mxu0 %v10348_v3  ;;  %v10423_v3 = vld [vmem:[#allocation10 + $0x1a4] ss:$48 sps:$4 sm:$0xff]  }
 0x3a4   :  { %5395 = vmatpush1.bf16.msra.mxu1 %v10343_v4  ;;  %v10426_v4 = vld [vmem:[#allocation10 + $0x1ac] ss:$48 sps:$4 sm:$0xff]  }
 0x3a5   :  { %5518 = vmatpush1.bf16.msra.mxu0 %v10346_v5  ;;  %5396 = vmatprep.subr.bf16.mxu1 %v10351_v6  ;;  %v10424_v5 = vld [vmem:[#allocation10 + $0x1a8] ss:$48 sps:$4 sm:$0xff]   ;;  %v10429_v6 = vld [vmem:[#allocation10 + $0x204] ss:$48 sps:$4 sm:$0xff]  }
 0x3a6   :  { %5519 = vmatprep.subr.bf16.mxu0 %v10354_v9  ;;  %v10432_v9 = vld [vmem:[#allocation10 + $0x20c] ss:$48 sps:$4 sm:$0xff]  }
 0x3a8   :  { %5397 = vmatpush1.bf16.msra.mxu1 %v10349_v10  ;;  %v10427_v10 = vld [vmem:[#allocation10 + $0x200] ss:$48 sps:$4 sm:$0xff]  }
 0x3a9   :  { %5520 = vmatpush1.bf16.msra.mxu0 %v10352_v11  ;;  %5398 = vmatprep.subr.bf16.mxu1 %v10357_v12  ;;  %v10430_v11 = vld [vmem:[#allocation10 + $0x208] ss:$48 sps:$4 sm:$0xff]   ;;  %v10435_v12 = vld [vmem:[#allocation10 + $0x264] ss:$48 sps:$4 sm:$0xff]  }
 0x3aa   :  { %5521 = vmatprep.subr.bf16.mxu0 %v10360_v13 }
 0x3ac   :  { %5399 = vmatpush1.bf16.msra.mxu1 %v10355_v14 }
 0x3ad   :  { %5522 = vmatpush1.bf16.msra.mxu0 %v10358_v15  ;;  %5400 = vmatprep.subr.bf16.mxu1 %v10363_v17  ;;  %v10438_v15 = vld [vmem:[#allocation10 + $0x26c] ss:$48 sps:$4 sm:$0xff]  }
 0x3ae   :  { %5523 = vmatprep.subr.bf16.mxu0 %v10366_v18 }
 0x3b0   :  { %5401 = vmatpush1.bf16.msra.mxu1 %v10361_v19 }
 0x3b1   :  { %5524 = vmatpush1.bf16.msra.mxu0 %v10364_v20  ;;  %5402 = vmatprep.subr.bf16.mxu1 %v10369_v21  ;;  %v10433_v21 = vld [vmem:[#allocation10 + $0x260] ss:$48 sps:$4 sm:$0xff]  }
 0x3b2   :  { %5525 = vmatprep.subr.bf16.mxu0 %v10372_v23 }
 0x3b4   :  { %5403 = vmatpush1.bf16.msra.mxu1 %v10367_v24 }
 0x3b5   :  { %5526 = vmatpush1.bf16.msra.mxu0 %v10370_v26  ;;  %5404 = vmatprep.subr.bf16.mxu1 %v10375_v27  ;;  %v10436_v26 = vld [vmem:[#allocation10 + $0x268] ss:$48 sps:$4 sm:$0xff]   ;;  %v10441_v27 = vld [vmem:[#allocation10 + $0x2c4] ss:$48 sps:$4 sm:$0xff]  }
 0x3b6   :  { %5527 = vmatprep.subr.bf16.mxu0 %v10378_v28  ;;  %v10444_v28 = vld [vmem:[#allocation10 + $0x2cc] ss:$48 sps:$4 sm:$0xff]  }
 0x3b8   :  { %5405 = vmatpush1.bf16.msra.mxu1 %v10373_v29  ;;  %v10439_v29 = vld [vmem:[#allocation10 + $0x2c0] ss:$48 sps:$4 sm:$0xff]  }
 0x3b9   :  { %5528 = vmatpush1.bf16.msra.mxu0 %v10376_v30  ;;  %5406 = vmatprep.subr.bf16.mxu1 %v10381_v31  ;;  %v10442_v30 = vld [vmem:[#allocation10 + $0x2c8] ss:$48 sps:$4 sm:$0xff]   ;;  %v10447_v31 = vld [vmem:[#allocation10 + $0x324] ss:$48 sps:$4 sm:$0xff]  }
 0x3ba   :  { %5529 = vmatprep.subr.bf16.mxu0 %v10384_v32  ;;  %v10450_v32 = vld [vmem:[#allocation10 + $0x32c] ss:$48 sps:$4 sm:$0xff]  }
 0x3bc   :  { %5407 = vmatpush1.bf16.msra.mxu1 %v10379_v33  ;;  %v10445_v33 = vld [vmem:[#allocation10 + $0x320] ss:$48 sps:$4 sm:$0xff]  }
 0x3bd   :  { %5530 = vmatpush1.bf16.msra.mxu0 %v10382_v34  ;;  %5408 = vmatprep.subr.bf16.mxu1 %v10387_v35  ;;  %v10448_v34 = vld [vmem:[#allocation10 + $0x328] ss:$48 sps:$4 sm:$0xff]   ;;  %v10453_v35 = vld [vmem:[#allocation10 + $0x384] ss:$48 sps:$4 sm:$0xff]  }
 0x3be   :  { %5531 = vmatprep.subr.bf16.mxu0 %v10390_v36  ;;  %v10456_v36 = vld [vmem:[#allocation10 + $0x38c] ss:$48 sps:$4 sm:$0xff]  }
 0x3c0   :  { %5409 = vmatpush1.bf16.msra.mxu1 %v10385_v8  ;;  %v10451_v8 = vld [vmem:[#allocation10 + $0x380] ss:$48 sps:$4 sm:$0xff]  }
 0x3c1   :  { %5532 = vmatpush1.bf16.msra.mxu0 %v10388_v38  ;;  %5410 = vmatprep.subr.bf16.mxu1 %v10393_v7  ;;  %v10454_v38 = vld [vmem:[#allocation10 + $0x388] ss:$48 sps:$4 sm:$0xff]   ;;  %v10459_v7 = vld [vmem:[#allocation10 + $0x3e4] ss:$48 sps:$4 sm:$0xff]  }
 0x3c2   :  { %5533 = vmatprep.subr.bf16.mxu0 %v10396_v41  ;;  %v10462_v41 = vld [vmem:[#allocation10 + $0x3ec] ss:$48 sps:$4 sm:$0xff]  }
 0x3c4   :  { %5411 = vmatpush1.bf16.msra.mxu1 %v10391_v42  ;;  %v10457_v42 = vld [vmem:[#allocation10 + $0x3e0] ss:$48 sps:$4 sm:$0xff]  }
 0x3c5   :  { %5534 = vmatpush1.bf16.msra.mxu0 %v10394_v43  ;;  %5544 = vmatprep.subr.bf16.mxu1 %v10399_v44  ;;  %v10460_v43 = vld [vmem:[#allocation10 + $0x3e8] ss:$48 sps:$4 sm:$0xff]   ;;  %v10465_v44 = vld [vmem:[#allocation10 + $0x444] ss:$48 sps:$4 sm:$0xff]  }
 0x3c6   :  { %5667 = vmatprep.subr.bf16.mxu0 %v10402_v45  ;;  %v10468_v45 = vld [vmem:[#allocation10 + $0x44c] ss:$48 sps:$4 sm:$0xff]  }
 0x3c7   :  { %5413 = vmatmul.mubr.bf16.vlgmr.msra.gmra.mrb[8].mxu1 %v11531_v59 }
 0x3c8   :  { %5536 = vmatmul.mubr.bf16.vlgmr.msra.gmra.mrb[20].mxu0 %v11531_v59  ;;  %5545 = vmatpush1.bf16.msra.mxu1 %v10397_v46  ;;  %v10463_v46 = vld [vmem:[#allocation10 + $0x440] ss:$48 sps:$4 sm:$0xff]  }
 0x3c9   :  { %5576 = vmatprep.mubr.bf16.mxu1 %v11494_v0  ;;  %5668 = vmatpush1.bf16.msra.mxu0 %v10400_v47  ;;  %v10466_v47 = vld [vmem:[#allocation10 + $0x448] ss:$48 sps:$4 sm:$0xff]  }
 0x3ca   :  { %5699 = vmatprep.mubr.bf16.mxu0 %v11494_v0  ;;  %5546 = vmatprep.subr.bf16.mxu1 %v10405_v48  ;;  %v10421_v0 = vld [vmem:[#allocation10 + $0x1a0] ss:$48 sps:$4 sm:$0xff]   ;;  %v10471_v48 = vld [vmem:[#allocation10 + $0x4a4] ss:$48 sps:$4 sm:$0xff]  }
 0x3cb   :  { %5669 = vmatprep.subr.bf16.mxu0 %v10408_v49  ;;  %v10474_v49 = vld [vmem:[#allocation10 + $0x4ac] ss:$48 sps:$4 sm:$0xff]  }
 0x3cc   :  { %5547 = vmatpush1.bf16.msra.mxu1 %v10403_v50  ;;  %v10469_v50 = vld [vmem:[#allocation10 + $0x4a0] ss:$48 sps:$4 sm:$0xff]  }
 0x3cd   :  { %5670 = vmatpush1.bf16.msra.mxu0 %v10406_v51  ;;  %5548 = vmatprep.subr.bf16.mxu1 %v10411_v52  ;;  %v10472_v51 = vld [vmem:[#allocation10 + $0x4a8] ss:$48 sps:$4 sm:$0xff]   ;;  %v10477_v52 = vld [vmem:[#allocation10 + $0x504] ss:$48 sps:$4 sm:$0xff]  }
 0x3ce   :  { %5671 = vmatprep.subr.bf16.mxu0 %v10414_v53  ;;  %v10480_v53 = vld [vmem:[#allocation10 + $0x50c] ss:$48 sps:$4 sm:$0xff]  }
 0x3d0   :  { %5549 = vmatpush1.bf16.msra.mxu1 %v10409_v54  ;;  %v10475_v54 = vld [vmem:[#allocation10 + $0x500] ss:$48 sps:$4 sm:$0xff]  }
 0x3d1   :  { %5672 = vmatpush1.bf16.msra.mxu0 %v10412_v55  ;;  %5550 = vmatprep.subr.bf16.mxu1 %v10417_v63  ;;  %v10478_v55 = vld [vmem:[#allocation10 + $0x508] ss:$48 sps:$4 sm:$0xff]   ;;  %v10483_v63 = vld [vmem:[#allocation10 + $0x564] ss:$48 sps:$4 sm:$0xff]  }
 0x3d2   :  { %5673 = vmatprep.subr.bf16.mxu0 %v10420_v56  ;;  %v10486_v56 = vld [vmem:[#allocation10 + $0x56c] ss:$48 sps:$4 sm:$0xff]  }
 0x3d4   :  { %5551 = vmatpush1.bf16.msra.mxu1 %v10415_v58  ;;  %v10481_v58 = vld [vmem:[#allocation10 + $0x560] ss:$48 sps:$4 sm:$0xff]  }
 0x3d5   :  { %5674 = vmatpush1.bf16.msra.mxu0 %v10418_v60  ;;  %5552 = vmatprep.subr.bf16.mxu1 %v10423_v3  ;;  %v10484_v60 = vld [vmem:[#allocation10 + $0x568] ss:$48 sps:$4 sm:$0xff]   ;;  %v10489_v3 = vld [vmem:[#allocation10 + $0x5c4] ss:$48 sps:$4 sm:$0xff]  }
 0x3d6   :  { %5675 = vmatprep.subr.bf16.mxu0 %v10426_v4  ;;  %v10492_v4 = vld [vmem:[#allocation10 + $0x5cc] ss:$48 sps:$4 sm:$0xff]  }
 0x3d8   :  { %5553 = vmatpush1.bf16.msra.mxu1 %v10421_v0  ;;  %v10487_v0 = vld [vmem:[#allocation10 + $0x5c0] ss:$48 sps:$4 sm:$0xff]  }
 0x3d9   :  { %5676 = vmatpush1.bf16.msra.mxu0 %v10424_v5  ;;  %5554 = vmatprep.subr.bf16.mxu1 %v10429_v6  ;;  %v10490_v5 = vld [vmem:[#allocation10 + $0x5c8] ss:$48 sps:$4 sm:$0xff]   ;;  %v10495_v6 = vld [vmem:[#allocation10 + $0x624] ss:$48 sps:$4 sm:$0xff]  }
 0x3da   :  { %v11549_v13 = vpop.f32.mrb[4].mxu1  ;;  %v11551_v14 = vpop.f32.mrb[16].mxu0  ;;  %5677 = vmatprep.subr.bf16.mxu0 %v10432_v9  ;;  %v10498_v9 = vld [vmem:[#allocation10 + $0x62c] ss:$48 sps:$4 sm:$0xff]  }
 0x3db   :  { %v11553_v17 = vpop.f32.mrb[5].mxu1  ;;  %v11555_v18 = vpop.f32.mrb[17].mxu0 }
 0x3dc   :  { %v5172_v19 = vpop.f32.mrb[6].mxu1  ;;  %v5295_v20 = vpop.f32.mrb[18].mxu0  ;;  %5555 = vmatpush1.bf16.msra.mxu1 %v10427_v10  ;;  %v10493_v10 = vld [vmem:[#allocation10 + $0x620] ss:$48 sps:$4 sm:$0xff]  }
 0x3dd   :  { %5678 = vmatpush1.bf16.msra.mxu0 %v10430_v11  ;;  %v5173_v23 = vpop.f32.mrb[7].mxu1  ;;  %v5296_v24 = vpop.f32.mrb[19].mxu0  ;;  %5556 = vmatprep.subr.bf16.mxu1 %v10435_v12  ;;  %v10496_v11 = vld [vmem:[#allocation10 + $0x628] ss:$48 sps:$4 sm:$0xff]   ;;  %v10501_v12 = vld [vmem:[#allocation10 + $0x684] ss:$48 sps:$4 sm:$0xff]  }
 0x3de   :  { %5679 = vmatprep.subr.bf16.mxu0 %v10438_v15  ;;  %v10504_v15 = vld [vmem:[#allocation10 + $0x68c] ss:$48 sps:$4 sm:$0xff]   ;;  %v10499_v19 = vld [vmem:[#allocation10 + $0x680] ss:$48 sps:$4 sm:$0xff]   ;;  %v10502_v20 = vld [vmem:[#allocation10 + $0x688] ss:$48 sps:$4 sm:$0xff]  }
 0x3df   :  { %v10510_v23 = vld [vmem:[#allocation10 + $0x6ec] ss:$48 sps:$4 sm:$0xff]   ;;  %v10505_v24 = vld [vmem:[#allocation10 + $0x6e0] ss:$48 sps:$4 sm:$0xff]  }
 0x3e0   :  { %5557 = vmatpush1.bf16.msra.mxu1 %v10433_v21  ;;  %v10507_v21 = vld [vmem:[#allocation10 + $0x6e4] ss:$48 sps:$4 sm:$0xff]  }
 0x3e1   :  { %5680 = vmatpush1.bf16.msra.mxu0 %v10436_v26  ;;  %5558 = vmatprep.subr.bf16.mxu1 %v10441_v27  ;;  %v10508_v26 = vld [vmem:[#allocation10 + $0x6e8] ss:$48 sps:$4 sm:$0xff]   ;;  %v10513_v27 = vld [vmem:[#allocation10 + $0x744] ss:$48 sps:$4 sm:$0xff]  }
 0x3e2   :  { %5681 = vmatprep.subr.bf16.mxu0 %v10444_v28  ;;  %v10511_v28 = vld [vmem:[#allocation10 + $0x740] ss:$48 sps:$4 sm:$0xff]  }
 0x3e4   :  { %5559 = vmatpush1.bf16.msra.mxu1 %v10439_v29  ;;  %v10514_v29 = vld [vmem:[#allocation10 + $0x748] ss:$48 sps:$4 sm:$0xff]  }
 0x3e5   :  { %5682 = vmatpush1.bf16.msra.mxu0 %v10442_v30  ;;  %5560 = vmatprep.subr.bf16.mxu1 %v10447_v31  ;;  %v10519_v30 = vld [vmem:[#allocation10 + $0x7a4] ss:$48 sps:$4 sm:$0xff]   ;;  %v10522_v31 = vld [vmem:[#allocation10 + $0x7ac] ss:$48 sps:$4 sm:$0xff]  }
 0x3e6   :  { %5683 = vmatprep.subr.bf16.mxu0 %v10450_v32  ;;  %v10520_v32 = vld [vmem:[#allocation10 + $0x7a8] ss:$48 sps:$4 sm:$0xff]  }
 0x3e8   :  { %5561 = vmatpush1.bf16.msra.mxu1 %v10445_v33  ;;  %v10525_v33 = vld [vmem:[#allocation10 + $0x804] ss:$48 sps:$4 sm:$0xff]  }
 0x3e9   :  { %5684 = vmatpush1.bf16.msra.mxu0 %v10448_v34  ;;  %5562 = vmatprep.subr.bf16.mxu1 %v10453_v35  ;;  %v10528_v34 = vld [vmem:[#allocation10 + $0x80c] ss:$48 sps:$4 sm:$0xff]   ;;  %v10523_v35 = vld [vmem:[#allocation10 + $0x800] ss:$48 sps:$4 sm:$0xff]  }
 0x3ea   :  { %5685 = vmatprep.subr.bf16.mxu0 %v10456_v36  ;;  %v10526_v36 = vld [vmem:[#allocation10 + $0x808] ss:$48 sps:$4 sm:$0xff]  }
 0x3ec   :  { %5563 = vmatpush1.bf16.msra.mxu1 %v10451_v8  ;;  %v10531_v8 = vld [vmem:[#allocation10 + $0x864] ss:$48 sps:$4 sm:$0xff]  }
 0x3ed   :  { %5686 = vmatpush1.bf16.msra.mxu0 %v10454_v38  ;;  %5564 = vmatprep.subr.bf16.mxu1 %v10459_v7  ;;  %v10534_v38 = vld [vmem:[#allocation10 + $0x86c] ss:$48 sps:$4 sm:$0xff]   ;;  %v10529_v7 = vld [vmem:[#allocation10 + $0x860] ss:$48 sps:$4 sm:$0xff]  }
 0x3ee   :  { %5687 = vmatprep.subr.bf16.mxu0 %v10462_v41  ;;  %v10532_v41 = vld [vmem:[#allocation10 + $0x868] ss:$48 sps:$4 sm:$0xff]  }
 0x3f0   :  { %5565 = vmatpush1.bf16.msra.mxu1 %v10457_v42  ;;  %v10537_v42 = vld [vmem:[#allocation10 + $0x8c4] ss:$48 sps:$4 sm:$0xff]  }
 0x3f1   :  { %5688 = vmatpush1.bf16.msra.mxu0 %v10460_v43  ;;  %5566 = vmatprep.subr.bf16.mxu1 %v10465_v44  ;;  %v10540_v43 = vld [vmem:[#allocation10 + $0x8cc] ss:$48 sps:$4 sm:$0xff]   ;;  %v10535_v44 = vld [vmem:[#allocation10 + $0x8c0] ss:$48 sps:$4 sm:$0xff]  }
 0x3f2   :  { %5689 = vmatprep.subr.bf16.mxu0 %v10468_v45  ;;  %v10538_v45 = vld [vmem:[#allocation10 + $0x8c8] ss:$48 sps:$4 sm:$0xff]  }
 0x3f4   :  { %5567 = vmatpush1.bf16.msra.mxu1 %v10463_v46  ;;  %v10543_v46 = vld [vmem:[#allocation10 + $0x924] ss:$48 sps:$4 sm:$0xff]  }
 0x3f5   :  { %5690 = vmatpush1.bf16.msra.mxu0 %v10466_v47  ;;  %5568 = vmatprep.subr.bf16.mxu1 %v10471_v48  ;;  %v10546_v47 = vld [vmem:[#allocation10 + $0x92c] ss:$48 sps:$4 sm:$0xff]   ;;  %v10541_v48 = vld [vmem:[#allocation10 + $0x920] ss:$48 sps:$4 sm:$0xff]  }
 0x3f6   :  { %5691 = vmatprep.subr.bf16.mxu0 %v10474_v49  ;;  %v10544_v49 = vld [vmem:[#allocation10 + $0x928] ss:$48 sps:$4 sm:$0xff]  }
 0x3f8   :  { %5569 = vmatpush1.bf16.msra.mxu1 %v10469_v50  ;;  %v10549_v50 = vld [vmem:[#allocation10 + $0x984] ss:$48 sps:$4 sm:$0xff]  }
 0x3f9   :  { %5692 = vmatpush1.bf16.msra.mxu0 %v10472_v51  ;;  %5570 = vmatprep.subr.bf16.mxu1 %v10477_v52  ;;  %v10552_v51 = vld [vmem:[#allocation10 + $0x98c] ss:$48 sps:$4 sm:$0xff]   ;;  %v10547_v52 = vld [vmem:[#allocation10 + $0x980] ss:$48 sps:$4 sm:$0xff]  }
 0x3fa   :  { %5693 = vmatprep.subr.bf16.mxu0 %v10480_v53  ;;  %v10550_v53 = vld [vmem:[#allocation10 + $0x988] ss:$48 sps:$4 sm:$0xff]  }
 0x3fc   :  { %5571 = vmatpush1.bf16.msra.mxu1 %v10475_v54  ;;  %v10555_v54 = vld [vmem:[#allocation10 + $0x9e4] ss:$48 sps:$4 sm:$0xff]  }
 0x3fd   :  { %5694 = vmatpush1.bf16.msra.mxu0 %v10478_v55  ;;  %5572 = vmatprep.subr.bf16.mxu1 %v10483_v63  ;;  %v10558_v55 = vld [vmem:[#allocation10 + $0x9ec] ss:$48 sps:$4 sm:$0xff]   ;;  %v10553_v63 = vld [vmem:[#allocation10 + $0x9e0] ss:$48 sps:$4 sm:$0xff]  }
 0x3fe   :  { %5695 = vmatprep.subr.bf16.mxu0 %v10486_v56  ;;  %v10556_v56 = vld [vmem:[#allocation10 + $0x9e8] ss:$48 sps:$4 sm:$0xff]  }
 0x400   :  { %5573 = vmatpush1.bf16.msra.mxu1 %v10481_v58  ;;  %v10561_v58 = vld [vmem:[#allocation10 + $0xa44] ss:$48 sps:$4 sm:$0xff]  }
 0x401   :  { %5696 = vmatpush1.bf16.msra.mxu0 %v10484_v60  ;;  %5574 = vmatprep.subr.bf16.mxu1 %v10489_v3  ;;  %v10564_v60 = vld [vmem:[#allocation10 + $0xa4c] ss:$48 sps:$4 sm:$0xff]   ;;  %v10559_v3 = vld [vmem:[#allocation10 + $0xa40] ss:$48 sps:$4 sm:$0xff]  }
 0x402   :  { %5697 = vmatprep.subr.bf16.mxu0 %v10492_v4  ;;  %v10562_v4 = vld [vmem:[#allocation10 + $0xa48] ss:$48 sps:$4 sm:$0xff]  }
 0x404   :  { %5575 = vmatpush1.bf16.msra.mxu1 %v10487_v0  ;;  %v10567_v0 = vld [vmem:[#allocation10 + $0xaa4] ss:$48 sps:$4 sm:$0xff]  }
 0x405   :  { %5698 = vmatpush1.bf16.msra.mxu0 %v10490_v5  ;;  %5585 = vmatprep.subr.bf16.mxu1 %v10495_v6  ;;  %v10570_v5 = vld [vmem:[#allocation10 + $0xaac] ss:$48 sps:$4 sm:$0xff]   ;;  %v10565_v6 = vld [vmem:[#allocation10 + $0xaa0] ss:$48 sps:$4 sm:$0xff]  }
 0x406   :  { %5708 = vmatprep.subr.bf16.mxu0 %v10498_v9  ;;  %v10568_v9 = vld [vmem:[#allocation10 + $0xaa8] ss:$48 sps:$4 sm:$0xff]  }
 0x407   :  { %5577 = vmatmul.mubr.bf16.vlgmr.msra.gmra.mrb[12].mxu1 %v11496_v22 }
 0x408   :  { %5700 = vmatmul.mubr.bf16.vlgmr.msra.gmra.mrb[24].mxu0 %v11496_v22  ;;  %5586 = vmatpush1.bf16.msra.mxu1 %v10493_v10  ;;  %v10516_v22 = vld [vmem:[#allocation10 + $0x74c] ss:$48 sps:$4 sm:$0xff]   ;;  %v10573_v10 = vld [vmem:[#allocation10 + $0xb04] ss:$48 sps:$4 sm:$0xff]  }
 0x409   :  { %5617 = vmatprep.mubr.bf16.mxu1 %v11500_v25  ;;  %5709 = vmatpush1.bf16.msra.mxu0 %v10496_v11  ;;  %v10576_v11 = vld [vmem:[#allocation10 + $0xb0c] ss:$48 sps:$4 sm:$0xff]  }
 0x40a   :  { %5740 = vmatprep.mubr.bf16.mxu0 %v11500_v25  ;;  %5587 = vmatprep.subr.bf16.mxu1 %v10501_v12  ;;  %v10517_v25 = vld [vmem:[#allocation10 + $0x7a0] ss:$48 sps:$4 sm:$0xff]  }
 0x40b   :  { %5710 = vmatprep.subr.bf16.mxu0 %v10504_v15  ;;  %v10571_v12 = vld [vmem:[#allocation10 + $0xb00] ss:$48 sps:$4 sm:$0xff]   ;;  %v10574_v15 = vld [vmem:[#allocation10 + $0xb08] ss:$48 sps:$4 sm:$0xff]  }
 0x40c   :  { %5588 = vmatpush1.bf16.msra.mxu1 %v10499_v19  ;;  %v10579_v19 = vld [vmem:[#allocation10 + $0xb64] ss:$48 sps:$4 sm:$0xff]  }
 0x40d   :  { %5711 = vmatpush1.bf16.msra.mxu0 %v10502_v20  ;;  %5589 = vmatprep.subr.bf16.mxu1 %v10507_v21  ;;  %v10582_v20 = vld [vmem:[#allocation10 + $0xb6c] ss:$48 sps:$4 sm:$0xff]   ;;  %v10577_v21 = vld [vmem:[#allocation10 + $0xb60] ss:$48 sps:$4 sm:$0xff]  }
 0x40e   :  { %5712 = vmatprep.subr.bf16.mxu0 %v10510_v23  ;;  %v10580_v23 = vld [vmem:[#allocation10 + $0xb68] ss:$48 sps:$4 sm:$0xff]  }
 0x410   :  { %5590 = vmatpush1.bf16.msra.mxu1 %v10505_v24  ;;  %v10585_v24 = vld [vmem:[#allocation10 + $0xbc4] ss:$48 sps:$4 sm:$0xff]  }
 0x411   :  { %5713 = vmatpush1.bf16.msra.mxu0 %v10508_v26  ;;  %5591 = vmatprep.subr.bf16.mxu1 %v10513_v27  ;;  %v10588_v26 = vld [vmem:[#allocation10 + $0xbcc] ss:$48 sps:$4 sm:$0xff]   ;;  %v10583_v27 = vld [vmem:[#allocation10 + $0xbc0] ss:$48 sps:$4 sm:$0xff]  }
 0x412   :  { %5714 = vmatprep.subr.bf16.mxu0 %v10516_v22  ;;  %v10586_v22 = vld [vmem:[#allocation10 + $0xbc8] ss:$48 sps:$4 sm:$0xff]  }
 0x414   :  { %5592 = vmatpush1.bf16.msra.mxu1 %v10511_v28  ;;  %v10591_v28 = vld [vmem:[#allocation10 + $0xc24] ss:$48 sps:$4 sm:$0xff]  }
 0x415   :  { %5715 = vmatpush1.bf16.msra.mxu0 %v10514_v29  ;;  %5593 = vmatprep.subr.bf16.mxu1 %v10519_v30  ;;  %v10594_v29 = vld [vmem:[#allocation10 + $0xc2c] ss:$48 sps:$4 sm:$0xff]   ;;  %v10589_v30 = vld [vmem:[#allocation10 + $0xc20] ss:$48 sps:$4 sm:$0xff]  }
 0x416   :  { %5716 = vmatprep.subr.bf16.mxu0 %v10522_v31  ;;  %v10592_v31 = vld [vmem:[#allocation10 + $0xc28] ss:$48 sps:$4 sm:$0xff]  }
 0x418   :  { %5594 = vmatpush1.bf16.msra.mxu1 %v10517_v25  ;;  %v10597_v25 = vld [vmem:[#allocation10 + $0xc84] ss:$48 sps:$4 sm:$0xff]  }
 0x419   :  { %5717 = vmatpush1.bf16.msra.mxu0 %v10520_v32  ;;  %5595 = vmatprep.subr.bf16.mxu1 %v10525_v33  ;;  %v10600_v32 = vld [vmem:[#allocation10 + $0xc8c] ss:$48 sps:$4 sm:$0xff]   ;;  %v10595_v33 = vld [vmem:[#allocation10 + $0xc80] ss:$48 sps:$4 sm:$0xff]  }
 0x41a   :  { %5718 = vmatprep.subr.bf16.mxu0 %v10528_v34  ;;  %v10598_v34 = vld [vmem:[#allocation10 + $0xc88] ss:$48 sps:$4 sm:$0xff]  }
 0x41c   :  { %5596 = vmatpush1.bf16.msra.mxu1 %v10523_v35  ;;  %v10603_v35 = vld [vmem:[#allocation10 + $0xce4] ss:$48 sps:$4 sm:$0xff]  }
 0x41d   :  { %5719 = vmatpush1.bf16.msra.mxu0 %v10526_v36  ;;  %5597 = vmatprep.subr.bf16.mxu1 %v10531_v8  ;;  %v10606_v36 = vld [vmem:[#allocation10 + $0xcec] ss:$48 sps:$4 sm:$0xff]   ;;  %v10601_v8 = vld [vmem:[#allocation10 + $0xce0] ss:$48 sps:$4 sm:$0xff]  }
 0x41e   :  { %5720 = vmatprep.subr.bf16.mxu0 %v10534_v38  ;;  %v10604_v38 = vld [vmem:[#allocation10 + $0xce8] ss:$48 sps:$4 sm:$0xff]  }
 0x420   :  { %5598 = vmatpush1.bf16.msra.mxu1 %v10529_v7  ;;  %v10609_v7 = vld [vmem:[#allocation10 + $0xd44] ss:$48 sps:$4 sm:$0xff]  }
 0x421   :  { %5721 = vmatpush1.bf16.msra.mxu0 %v10532_v41  ;;  %5599 = vmatprep.subr.bf16.mxu1 %v10537_v42  ;;  %v10607_v41 = vld [vmem:[#allocation10 + $0xd40] ss:$48 sps:$4 sm:$0xff]   ;;  %v10610_v42 = vld [vmem:[#allocation10 + $0xd48] ss:$48 sps:$4 sm:$0xff]  }
 0x422   :  { %5722 = vmatprep.subr.bf16.mxu0 %v10540_v43  ;;  %v10615_v43 = vld [vmem:[#allocation10 + $0xda4] ss:$48 sps:$4 sm:$0xff]  }
 0x424   :  { %5600 = vmatpush1.bf16.msra.mxu1 %v10535_v44  ;;  %v10618_v44 = vld [vmem:[#allocation10 + $0xdac] ss:$48 sps:$4 sm:$0xff]  }
 0x425   :  { %5723 = vmatpush1.bf16.msra.mxu0 %v10538_v45  ;;  %5601 = vmatprep.subr.bf16.mxu1 %v10543_v46  ;;  %v10616_v45 = vld [vmem:[#allocation10 + $0xda8] ss:$48 sps:$4 sm:$0xff]   ;;  %v10621_v46 = vld [vmem:[#allocation10 + $0xe04] ss:$48 sps:$4 sm:$0xff]  }
 0x426   :  { %5724 = vmatprep.subr.bf16.mxu0 %v10546_v47  ;;  %v10624_v47 = vld [vmem:[#allocation10 + $0xe0c] ss:$48 sps:$4 sm:$0xff]  }
 0x428   :  { %5602 = vmatpush1.bf16.msra.mxu1 %v10541_v48  ;;  %v10619_v48 = vld [vmem:[#allocation10 + $0xe00] ss:$48 sps:$4 sm:$0xff]  }
 0x429   :  { %5725 = vmatpush1.bf16.msra.mxu0 %v10544_v49  ;;  %5603 = vmatprep.subr.bf16.mxu1 %v10549_v50  ;;  %v10622_v49 = vld [vmem:[#allocation10 + $0xe08] ss:$48 sps:$4 sm:$0xff]   ;;  %v10627_v50 = vld [vmem:[#allocation10 + $0xe64] ss:$48 sps:$4 sm:$0xff]  }
 0x42a   :  { %5726 = vmatprep.subr.bf16.mxu0 %v10552_v51  ;;  %v10630_v51 = vld [vmem:[#allocation10 + $0xe6c] ss:$48 sps:$4 sm:$0xff]  }
 0x42c   :  { %5604 = vmatpush1.bf16.msra.mxu1 %v10547_v52  ;;  %v10625_v52 = vld [vmem:[#allocation10 + $0xe60] ss:$48 sps:$4 sm:$0xff]  }
 0x42d   :  { %5727 = vmatpush1.bf16.msra.mxu0 %v10550_v53  ;;  %5605 = vmatprep.subr.bf16.mxu1 %v10555_v54  ;;  %v10628_v53 = vld [vmem:[#allocation10 + $0xe68] ss:$48 sps:$4 sm:$0xff]   ;;  %v10633_v54 = vld [vmem:[#allocation10 + $0xec4] ss:$48 sps:$4 sm:$0xff]  }
 0x42e   :  { %5728 = vmatprep.subr.bf16.mxu0 %v10558_v55  ;;  %v10636_v55 = vld [vmem:[#allocation10 + $0xecc] ss:$48 sps:$4 sm:$0xff]  }
 0x430   :  { %5606 = vmatpush1.bf16.msra.mxu1 %v10553_v63  ;;  %v10631_v63 = vld [vmem:[#allocation10 + $0xec0] ss:$48 sps:$4 sm:$0xff]  }
 0x431   :  { %5729 = vmatpush1.bf16.msra.mxu0 %v10556_v56  ;;  %5607 = vmatprep.subr.bf16.mxu1 %v10561_v58  ;;  %v10634_v56 = vld [vmem:[#allocation10 + $0xec8] ss:$48 sps:$4 sm:$0xff]   ;;  %v10639_v58 = vld [vmem:[#allocation10 + $0xf24] ss:$48 sps:$4 sm:$0xff]  }
 0x432   :  { %5730 = vmatprep.subr.bf16.mxu0 %v10564_v60  ;;  %v10642_v60 = vld [vmem:[#allocation10 + $0xf2c] ss:$48 sps:$4 sm:$0xff]  }
 0x434   :  { %5608 = vmatpush1.bf16.msra.mxu1 %v10559_v3  ;;  %v10637_v3 = vld [vmem:[#allocation10 + $0xf20] ss:$48 sps:$4 sm:$0xff]  }
 0x435   :  { %5731 = vmatpush1.bf16.msra.mxu0 %v10562_v4  ;;  %5609 = vmatprep.subr.bf16.mxu1 %v10567_v0  ;;  %v10640_v4 = vld [vmem:[#allocation10 + $0xf28] ss:$48 sps:$4 sm:$0xff]   ;;  %v10645_v0 = vld [vmem:[#allocation10 + $0xf84] ss:$48 sps:$4 sm:$0xff]  }
 0x436   :  { %5732 = vmatprep.subr.bf16.mxu0 %v10570_v5  ;;  %v10648_v5 = vld [vmem:[#allocation10 + $0xf8c] ss:$48 sps:$4 sm:$0xff]  }
 0x438   :  { %5610 = vmatpush1.bf16.msra.mxu1 %v10565_v6  ;;  %v10643_v6 = vld [vmem:[#allocation10 + $0xf80] ss:$48 sps:$4 sm:$0xff]  }
 0x439   :  { %5733 = vmatpush1.bf16.msra.mxu0 %v10568_v9  ;;  %5611 = vmatprep.subr.bf16.mxu1 %v10573_v10  ;;  %v10646_v9 = vld [vmem:[#allocation10 + $0xf88] ss:$48 sps:$4 sm:$0xff]   ;;  %v10651_v10 = vld [vmem:[#allocation10 + $0xfe4] ss:$48 sps:$4 sm:$0xff]  }
 0x43a   :  { %5734 = vmatprep.subr.bf16.mxu0 %v10576_v11  ;;  %v10654_v11 = vld [vmem:[#allocation10 + $0xfec] ss:$48 sps:$4 sm:$0xff]  }
 0x43c   :  { %5612 = vmatpush1.bf16.msra.mxu1 %v10571_v12  ;;  %v10649_v12 = vld [vmem:[#allocation10 + $0xfe0] ss:$48 sps:$4 sm:$0xff]  }
 0x43d   :  { %5735 = vmatpush1.bf16.msra.mxu0 %v10574_v15  ;;  %5613 = vmatprep.subr.bf16.mxu1 %v10579_v19  ;;  %v10652_v15 = vld [vmem:[#allocation10 + $0xfe8] ss:$48 sps:$4 sm:$0xff]   ;;  %v10657_v19 = vld [vmem:[#allocation10 + $0x1044] ss:$48 sps:$4 sm:$0xff]  }
 0x43e   :  { %5736 = vmatprep.subr.bf16.mxu0 %v10582_v20  ;;  %v10660_v20 = vld [vmem:[#allocation10 + $0x104c] ss:$48 sps:$4 sm:$0xff]  }
 0x440   :  { %5614 = vmatpush1.bf16.msra.mxu1 %v10577_v21  ;;  %v10655_v21 = vld [vmem:[#allocation10 + $0x1040] ss:$48 sps:$4 sm:$0xff]  }
 0x441   :  { %5737 = vmatpush1.bf16.msra.mxu0 %v10580_v23  ;;  %5615 = vmatprep.subr.bf16.mxu1 %v10585_v24  ;;  %v10658_v23 = vld [vmem:[#allocation10 + $0x1048] ss:$48 sps:$4 sm:$0xff]   ;;  %v10663_v24 = vld [vmem:[#allocation10 + $0x10a4] ss:$48 sps:$4 sm:$0xff]  }
 0x442   :  { %5738 = vmatprep.subr.bf16.mxu0 %v10588_v26  ;;  %v10666_v26 = vld [vmem:[#allocation10 + $0x10ac] ss:$48 sps:$4 sm:$0xff]  }
 0x444   :  { %5616 = vmatpush1.bf16.msra.mxu1 %v10583_v27  ;;  %v10661_v27 = vld [vmem:[#allocation10 + $0x10a0] ss:$48 sps:$4 sm:$0xff]  }
 0x445   :  { %5739 = vmatpush1.bf16.msra.mxu0 %v10586_v22  ;;  %5626 = vmatprep.subr.bf16.mxu1 %v10591_v28  ;;  %v10664_v22 = vld [vmem:[#allocation10 + $0x10a8] ss:$48 sps:$4 sm:$0xff]   ;;  %v10669_v28 = vld [vmem:[#allocation10 + $0x1104] ss:$48 sps:$4 sm:$0xff]  }
 0x446   :  { %5749 = vmatprep.subr.bf16.mxu0 %v10594_v29  ;;  %v10672_v29 = vld [vmem:[#allocation10 + $0x110c] ss:$48 sps:$4 sm:$0xff]  }
 0x447   :  { %5618 = vmatmul.mubr.bf16.vlgmr.msra.gmra.mrb[12].mxu1 %v11512_v37 }
 0x448   :  { %5741 = vmatmul.mubr.bf16.vlgmr.msra.gmra.mrb[24].mxu0 %v11512_v37  ;;  %5627 = vmatpush1.bf16.msra.mxu1 %v10589_v30  ;;  %v10612_v37 = vld [vmem:[#allocation10 + $0xd4c] ss:$48 sps:$4 sm:$0xff]   ;;  %v11565_v30 = vld [vmem:[#allocation11] sm:$0xff] }
 0x449   :  { %5658 = vmatprep.mubr.bf16.mxu1 %v11522_v39  ;;  %5750 = vmatpush1.bf16.msra.mxu0 %v10592_v31  ;;  %v10667_v31 = vld [vmem:[#allocation10 + $0x1100] ss:$48 sps:$4 sm:$0xff]  }
 0x44a   :  { %5781 = vmatprep.mubr.bf16.mxu0 %v11522_v39  ;;  %5628 = vmatprep.subr.bf16.mxu1 %v10597_v25  ;;  %v10613_v39 = vld [vmem:[#allocation10 + $0xda0] ss:$48 sps:$4 sm:$0xff]   ;;  %v10670_v25 = vld [vmem:[#allocation10 + $0x1108] ss:$48 sps:$4 sm:$0xff]  }
 0x44b   :  { %5751 = vmatprep.subr.bf16.mxu0 %v10600_v32  ;;  %v10675_v32 = vld [vmem:[#allocation10 + $0x1164] ss:$48 sps:$4 sm:$0xff]  }
 0x44c   :  { %5629 = vmatpush1.bf16.msra.mxu1 %v10595_v33  ;;  %v10678_v33 = vld [vmem:[#allocation10 + $0x116c] ss:$48 sps:$4 sm:$0xff]  }
 0x44d   :  { %5752 = vmatpush1.bf16.msra.mxu0 %v10598_v34  ;;  %5630 = vmatprep.subr.bf16.mxu1 %v10603_v35  ;;  %v2119_v34 = vrot.slane %v11565_v30, %v11481_v1  ;;  %v10673_v35 = vld [vmem:[#allocation10 + $0x1160] ss:$48 sps:$4 sm:$0xff]  }
 0x44e   :  { %5753 = vmatprep.subr.bf16.mxu0 %v10606_v36  ;;  %v10676_v36 = vld [vmem:[#allocation10 + $0x1168] ss:$48 sps:$4 sm:$0xff]  }
 0x450   :  { %5631 = vmatpush1.bf16.msra.mxu1 %v10601_v8  ;;  %v10681_v8 = vld [vmem:[#allocation10 + $0x11c4] ss:$48 sps:$4 sm:$0xff]  }
 0x451   :  { %5754 = vmatpush1.bf16.msra.mxu0 %v10604_v38  ;;  %5632 = vmatprep.subr.bf16.mxu1 %v10609_v7  ;;  %v10684_v38 = vld [vmem:[#allocation10 + $0x11cc] ss:$48 sps:$4 sm:$0xff]   ;;  %v9462_v7 = vadd.f32 %v11553_v17, %v2119_v34 }
 0x452   :  { %5755 = vmatprep.subr.bf16.mxu0 %v10612_v37  ;;  %v10679_v37 = vld [vmem:[#allocation10 + $0x11c0] ss:$48 sps:$4 sm:$0xff]   ;;  %v10693_v17 = vld [vmem:[#allocation13 + $0xe0] ss:$12 sps:$4 sm:$0xff]   ;;  %v10724_v34 = vld [vmem:[#allocation13 + $0xb0] ss:$12 sps:$4 sm:$0xff]  }
 0x454   :  { %5633 = vmatpush1.bf16.msra.mxu1 %v10607_v41  ;;  %v10682_v41 = vld [vmem:[#allocation10 + $0x11c8] ss:$48 sps:$4 sm:$0xff]  }
 0x455   :  { %5756 = vmatpush1.bf16.msra.mxu0 %v10610_v42  ;;  %5634 = vmatprep.subr.bf16.mxu1 %v10615_v43  ;;  %v10687_v42 = vld [vmem:[#allocation13 + $0x4] ss:$12 sps:$4 sm:$0xff]   ;;  %v10688_v43 = vld [vmem:[#allocation13 + $0xc8] ss:$12 sps:$4 sm:$0xff]  }
 0x456   :  { %5757 = vmatprep.subr.bf16.mxu0 %v10618_v44  ;;  %v5791_v44 = vmax.f32 %v9462_v7, 0.0  ;;  %v10725_v7 = vld [vmem:[#allocation13 + $0xc0] ss:$12 sps:$4 sm:$0xff]  }
 0x458   :  { %5635 = vmatpush1.bf16.msra.mxu1 %v10613_v39  ;;  %v10685_v39 = vld [vmem:[#allocation13] ss:$12 sps:$4 sm:$0xff]  }
 0x459   :  { %5758 = vmatpush1.bf16.msra.mxu0 %v10616_v45  ;;  %5636 = vmatprep.subr.bf16.mxu1 %v10621_v46  ;;  %v10689_v45 = vld [vmem:[#allocation13 + $0x8] ss:$12 sps:$4 sm:$0xff]  }
 0x45a   :  { %5759 = vmatprep.subr.bf16.mxu0 %v10624_v47  ;;  %v10692_v46 = vld [vmem:[#allocation13 + $0x1c] ss:$12 sps:$4 sm:$0xff]   ;;  %v5803_v47 = vpack.c.bf16 %v5791_v44, %v5791_v44  ;;  %v10734_v44 = vld [vmem:[#allocation13 + $0x1a0] ss:$12 sps:$4 sm:$0xff]  }
 0x45c   :  { %5637 = vmatpush1.bf16.msra.mxu1 %v10619_v48  ;;  %v10690_v48 = vld [vmem:[#allocation13 + $0x18] ss:$12 sps:$4 sm:$0xff]  }
 0x45d   :  { %5760 = vmatpush1.bf16.msra.mxu0 %v10622_v49  ;;  %5638 = vmatprep.subr.bf16.mxu1 %v10627_v50  ;;  %v10694_v49 = vld [vmem:[#allocation13 + $0x20] ss:$12 sps:$4 sm:$0xff]  }
 0x45e   :  { %5761 = vmatprep.subr.bf16.mxu0 %v10630_v51  ;;  %v10697_v50 = vld [vmem:[#allocation13 + $0x34] ss:$12 sps:$4 sm:$0xff]   ;;  %v10698_v51 = vld [vmem:[#allocation13 + $0xf8] ss:$12 sps:$4 sm:$0xff]  }
 0x460   :  { %5639 = vmatpush1.bf16.msra.mxu1 %v10625_v52  ;;  %v10695_v52 = vld [vmem:[#allocation13 + $0x30] ss:$12 sps:$4 sm:$0xff]  }
 0x461   :  { %5762 = vmatpush1.bf16.msra.mxu0 %v10628_v53  ;;  %5640 = vmatprep.subr.bf16.mxu1 %v10633_v54  ;;  %v10699_v53 = vld [vmem:[#allocation13 + $0x38] ss:$12 sps:$4 sm:$0xff]  }
 0x462   :  { %5763 = vmatprep.subr.bf16.mxu0 %v10636_v55  ;;  %v10702_v54 = vld [vmem:[#allocation13 + $0x4c] ss:$12 sps:$4 sm:$0xff]   ;;  %v10703_v55 = vld [vmem:[#allocation13 + $0x110] ss:$12 sps:$4 sm:$0xff]  }
 0x464   :  { %5641 = vmatpush1.bf16.msra.mxu1 %v10631_v63  ;;  %v10704_v63 = vld [vmem:[#allocation13 + $0x50] ss:$12 sps:$4 sm:$0xff]  }
 0x465   :  { %5764 = vmatpush1.bf16.msra.mxu0 %v10634_v56  ;;  %5642 = vmatprep.subr.bf16.mxu1 %v10639_v58  ;;  %v10707_v56 = vld [vmem:[#allocation13 + $0x64] ss:$12 sps:$4 sm:$0xff]   ;;  %v10708_v58 = vld [vmem:[#allocation13 + $0x128] ss:$12 sps:$4 sm:$0xff]  }
 0x466   :  { %5765 = vmatprep.subr.bf16.mxu0 %v10642_v60  ;;  %v10705_v60 = vld [vmem:[#allocation13 + $0x60] ss:$12 sps:$4 sm:$0xff]  }
 0x468   :  { %5643 = vmatpush1.bf16.msra.mxu1 %v10637_v3  ;;  %v10709_v3 = vld [vmem:[#allocation13 + $0x68] ss:$12 sps:$4 sm:$0xff]  }
 0x469   :  { %5766 = vmatpush1.bf16.msra.mxu0 %v10640_v4  ;;  %5644 = vmatprep.subr.bf16.mxu1 %v10645_v0  ;;  %v10712_v4 = vld [vmem:[#allocation13 + $0x7c] ss:$12 sps:$4 sm:$0xff]   ;;  %v10713_v0 = vld [vmem:[#allocation13 + $0x140] ss:$12 sps:$4 sm:$0xff]  }
 0x46a   :  { %5767 = vmatprep.subr.bf16.mxu0 %v10648_v5  ;;  %v10710_v5 = vld [vmem:[#allocation13 + $0x78] ss:$12 sps:$4 sm:$0xff]  }
 0x46c   :  { %5645 = vmatpush1.bf16.msra.mxu1 %v10643_v6  ;;  %v10714_v6 = vld [vmem:[#allocation13 + $0x80] ss:$12 sps:$4 sm:$0xff]  }
 0x46d   :  { %5768 = vmatpush1.bf16.msra.mxu0 %v10646_v9  ;;  %5646 = vmatprep.subr.bf16.mxu1 %v10651_v10  ;;  %v10717_v9 = vld [vmem:[#allocation13 + $0x94] ss:$12 sps:$4 sm:$0xff]   ;;  %v2115_v10 = vrot.slane %v11565_v30, %v11476_v62 }
 0x46e   :  { %5769 = vmatprep.subr.bf16.mxu0 %v10654_v11 }
 0x470   :  { %5647 = vmatpush1.bf16.msra.mxu1 %v10649_v12  ;;  %v10718_v12 = vld [vmem:[#allocation13 + $0x158] ss:$12 sps:$4 sm:$0xff]  }
 0x471   :  { %5770 = vmatpush1.bf16.msra.mxu0 %v10652_v15  ;;  %5648 = vmatprep.subr.bf16.mxu1 %v10657_v19  ;;  %v2127_v15 = vrot.slane %v11565_v30, %v11484_v2 }
 0x472   :  { %5771 = vmatprep.subr.bf16.mxu0 %v10660_v20 }
 0x474   :  { %5649 = vmatpush1.bf16.msra.mxu1 %v10655_v21 }
 0x475   :  { %5772 = vmatpush1.bf16.msra.mxu0 %v10658_v23  ;;  %5650 = vmatprep.subr.bf16.mxu1 %v10663_v24  ;;  %v10715_v24 = vld [vmem:[#allocation13 + $0x90] ss:$12 sps:$4 sm:$0xff]  }
 0x476   :  { %5773 = vmatprep.subr.bf16.mxu0 %v10666_v26 }
 0x478   :  { %5651 = vmatpush1.bf16.msra.mxu1 %v10661_v27 }
 0x479   :  { %5774 = vmatpush1.bf16.msra.mxu0 %v10664_v22  ;;  %5652 = vmatprep.subr.bf16.mxu1 %v10669_v28  ;;  %v10719_v22 = vld [vmem:[#allocation13 + $0x98] ss:$12 sps:$4 sm:$0xff]  }
 0x47a   :  { %5775 = vmatprep.subr.bf16.mxu0 %v10672_v29  ;;  %v10722_v28 = vld [vmem:[#allocation13 + $0xac] ss:$12 sps:$4 sm:$0xff]   ;;  %v9461_v29 = vadd.f32 %v11549_v13, %v2115_v10  ;;  %v10729_v13 = vld [vmem:[#allocation13 + $0x188] ss:$12 sps:$4 sm:$0xff]   ;;  %v10763_v10 = vld [vmem:[#allocation13 + $0x2f0] ss:$12 sps:$4 sm:$0xff]  }
 0x47c   :  { %5653 = vmatpush1.bf16.msra.mxu1 %v10667_v31 }
 0x47d   :  { %5776 = vmatpush1.bf16.msra.mxu0 %v10670_v25  ;;  %5654 = vmatprep.subr.bf16.mxu1 %v10675_v32  ;;  %v10723_v25 = vld [vmem:[#allocation13 + $0x170] ss:$12 sps:$4 sm:$0xff]   ;;  %v9464_v32 = vadd.f32 %v11555_v18, %v2127_v15  ;;  %v10733_v18 = vld [vmem:[#allocation13 + $0x260] ss:$12 sps:$4 sm:$0xff]   ;;  %v10760_v15 = vld [vmem:[#allocation13 + $0x168] ss:$12 sps:$4 sm:$0xff]  }
 0x47e   :  { %5777 = vmatprep.subr.bf16.mxu0 %v10678_v33  ;;  %v10720_v33 = vld [vmem:[#allocation13 + $0xa8] ss:$12 sps:$4 sm:$0xff]  }
 0x480   :  { %5655 = vmatpush1.bf16.msra.mxu1 %v10673_v35  ;;  %v10727_v35 = vld [vmem:[#allocation13 + $0xc4] ss:$12 sps:$4 sm:$0xff]  }
 0x481   :  { %5778 = vmatpush1.bf16.msra.mxu0 %v10676_v36  ;;  %5656 = vmatprep.subr.bf16.mxu1 %v10681_v8  ;;  %v5790_v36 = vmax.f32 %v9461_v29, 0.0  ;;  %v10728_v8 = vld [vmem:[#allocation13 + $0x248] ss:$12 sps:$4 sm:$0xff]  }
 0x482   :  { %5779 = vmatprep.subr.bf16.mxu0 %v10684_v38  ;;  %v5793_v38 = vmax.f32 %v9464_v32, 0.0  ;;  %v10772_v29 = vld [vmem:[#allocation13 + $0x19c] ss:$12 sps:$4 sm:$0xff]   ;;  %v10774_v32 = vld [vmem:[#allocation13 + $0x320] ss:$12 sps:$4 sm:$0xff]  }
 0x484   :  { %5657 = vmatpush1.bf16.msra.mxu1 %v10679_v37  ;;  %v11586_v37 = vpack.c.bf16 %v5790_v36, %v5790_v36  ;;  %v10779_v36 = vld [vmem:[#allocation13 + $0x338] ss:$12 sps:$4 sm:$0xff]  }
 0x485   :  { %5780 = vmatpush1.bf16.msra.mxu0 %v10682_v41  ;;  %7751 = vmatprep.subr.bf16.mxu1 %v10687_v42  ;;  %v10732_v41 = vld [vmem:[#allocation13 + $0xdc] ss:$12 sps:$4 sm:$0xff]   ;;  %v11588_v42 = vpack.c.bf16 %v5793_v38, %v5793_v38 }
 0x486   :  { %9303 = vmatprep.subr.bf16.mxu0 %v10688_v43  ;;  %v10730_v43 = vld [vmem:[#allocation13 + $0xd8] ss:$12 sps:$4 sm:$0xff]   ;;  %v10783_v38 = vld [vmem:[#allocation13 + $0x410] ss:$12 sps:$4 sm:$0xff]  }
 0x487   :  { %5659 = vmatmul.mubr.bf16.vlgmr.msra.gmra.mrb[12].mxu1 %v11531_v59 }
 0x488   :  { %5782 = vmatmul.mubr.bf16.vlgmr.msra.gmra.mrb[24].mxu0 %v11531_v59  ;;  %7752 = vmatpush1.bf16.msra.mxu1 %v10685_v39  ;;  %v10700_v59 = vld [vmem:[#allocation13 + $0x48] ss:$12 sps:$4 sm:$0xff]  }
 0x489   :  { %7783 = vmatprep.mubr.bf16.mxu1 %v5803_v47  ;;  %9304 = vmatpush3.bf16.msra.mxu0 %v10689_v45  ;;  %v10737_v39 = vld [vmem:[#allocation13 + $0xf4] ss:$12 sps:$4 sm:$0xff]   ;;  %v10738_v45 = vld [vmem:[#allocation13 + $0x278] ss:$12 sps:$4 sm:$0xff]  }
 0x48a   :  { %8029 = vmatprep.mubr.bf16.mxu0 %v5803_v47  ;;  %7753 = vmatprep.subr.bf16.mxu1 %v10692_v46  ;;  %v10735_v46 = vld [vmem:[#allocation13 + $0xf0] ss:$12 sps:$4 sm:$0xff]   ;;  %v10739_v47 = vld [vmem:[#allocation13 + $0x1b8] ss:$12 sps:$4 sm:$0xff]  }
 0x48b   :  { %9305 = vmatprep.subr.bf16.mxu0 %v10693_v17  ;;  %v10742_v17 = vld [vmem:[#allocation13 + $0x10c] ss:$12 sps:$4 sm:$0xff]  }
 0x48c   :  { %7754 = vmatpush1.bf16.msra.mxu1 %v10690_v48  ;;  %v10743_v48 = vld [vmem:[#allocation13 + $0x290] ss:$12 sps:$4 sm:$0xff]  }
 0x48d   :  { %9306 = vmatpush3.bf16.msra.mxu0 %v10694_v49  ;;  %7755 = vmatprep.subr.bf16.mxu1 %v10697_v50  ;;  %v10740_v49 = vld [vmem:[#allocation13 + $0x108] ss:$12 sps:$4 sm:$0xff]   ;;  %v10744_v50 = vld [vmem:[#allocation13 + $0x1d0] ss:$12 sps:$4 sm:$0xff]  }
 0x48e   :  { %9307 = vmatprep.subr.bf16.mxu0 %v10698_v51  ;;  %v10747_v51 = vld [vmem:[#allocation13 + $0x124] ss:$12 sps:$4 sm:$0xff]  }
 0x490   :  { %7756 = vmatpush1.bf16.msra.mxu1 %v10695_v52  ;;  %v10748_v52 = vld [vmem:[#allocation13 + $0x2a8] ss:$12 sps:$4 sm:$0xff]  }
 0x491   :  { %9308 = vmatpush3.bf16.msra.mxu0 %v10699_v53  ;;  %7757 = vmatprep.subr.bf16.mxu1 %v10702_v54  ;;  %v10745_v53 = vld [vmem:[#allocation13 + $0x120] ss:$12 sps:$4 sm:$0xff]   ;;  %v10749_v54 = vld [vmem:[#allocation13 + $0x1e8] ss:$12 sps:$4 sm:$0xff]  }
 0x492   :  { %9309 = vmatprep.subr.bf16.mxu0 %v10703_v55  ;;  %v10752_v55 = vld [vmem:[#allocation13 + $0x13c] ss:$12 sps:$4 sm:$0xff]  }
 0x494   :  { %7758 = vmatpush1.bf16.msra.mxu1 %v10700_v59  ;;  %v10753_v59 = vld [vmem:[#allocation13 + $0x2c0] ss:$12 sps:$4 sm:$0xff]  }
 0x495   :  { %9310 = vmatpush3.bf16.msra.mxu0 %v10704_v63  ;;  %7759 = vmatprep.subr.bf16.mxu1 %v10707_v56  ;;  %v10750_v63 = vld [vmem:[#allocation13 + $0x138] ss:$12 sps:$4 sm:$0xff]   ;;  %v10754_v56 = vld [vmem:[#allocation13 + $0x200] ss:$12 sps:$4 sm:$0xff]  }
 0x496   :  { %9311 = vmatprep.subr.bf16.mxu0 %v10708_v58  ;;  %v10757_v58 = vld [vmem:[#allocation13 + $0x154] ss:$12 sps:$4 sm:$0xff]  }
 0x498   :  { %7760 = vmatpush1.bf16.msra.mxu1 %v10705_v60  ;;  %v2123_v60 = vrot.slane %v11565_v30, %v11507_v16 }
 0x499   :  { %9312 = vmatpush3.bf16.msra.mxu0 %v10709_v3  ;;  %7761 = vmatprep.subr.bf16.mxu1 %v10712_v4  ;;  %v10758_v3 = vld [vmem:[#allocation13 + $0x2d8] ss:$12 sps:$4 sm:$0xff]   ;;  %v2135_v4 = vrot.slane %v11565_v30, %v546_v57  ;;  %v10768_v57 = vld [vmem:[#allocation13 + $0x3c8] ss:$12 sps:$4 sm:$0xff]  }
 0x49a   :  { %v11574_v11 = vpop.f32.mrb[8].mxu1  ;;  %9313 = vmatprep.subr.bf16.mxu0 %v10713_v0  ;;  %v10755_v0 = vld [vmem:[#allocation13 + $0x150] ss:$12 sps:$4 sm:$0xff]  }
 0x49b   :  { %v11578_v19 = vpop.f32.mrb[20].mxu0  ;;  %v11580_v20 = vpop.f32.mrb[9].mxu1 }
 0x49c   :  { %v11582_v21 = vpop.f32.mrb[21].mxu0  ;;  %v5418_v23 = vpop.f32.mrb[10].mxu1  ;;  %7762 = vmatpush1.bf16.msra.mxu1 %v10710_v5  ;;  %v10759_v5 = vld [vmem:[#allocation13 + $0x218] ss:$12 sps:$4 sm:$0xff]  }
 0x49d   :  { %v5541_v26 = vpop.f32.mrb[22].mxu0  ;;  %9314 = vmatpush3.bf16.msra.mxu0 %v10714_v6  ;;  %v5419_v27 = vpop.f32.mrb[11].mxu1  ;;  %7763 = vmatprep.subr.bf16.mxu1 %v10717_v9  ;;  %v10762_v6 = vld [vmem:[#allocation13 + $0x16c] ss:$12 sps:$4 sm:$0xff]   ;;  %v9463_v9 = vadd.f32 %v11551_v14, %v2123_v60  ;;  %v10764_v23 = vld [vmem:[#allocation13 + $0x230] ss:$12 sps:$4 sm:$0xff]  }
 0x49e   :  { %v5542_v31 = vpop.f32.mrb[23].mxu0  ;;  %9315 = vmatprep.subr.bf16.mxu0 %v10718_v12  ;;  %v9466_v12 = vadd.f32 %v11580_v20, %v2135_v4  ;;  %v10773_v20 = vld [vmem:[#allocation13 + $0x3e0] ss:$12 sps:$4 sm:$0xff]   ;;  %v10809_v4 = vld [vmem:[#allocation13 + $0x488] ss:$12 sps:$4 sm:$0xff]  }
 0x49f   :  { %v5792_v26 = vmax.f32 %v9463_v9, 0.0  ;;  %v10814_v9 = vld [vmem:[#allocation13 + $0x4a0] ss:$12 sps:$4 sm:$0xff]  }
 0x4a0   :  { %7764 = vmatpush1.bf16.msra.mxu1 %v10715_v24  ;;  %v10767_v24 = vld [vmem:[#allocation13 + $0x184] ss:$12 sps:$4 sm:$0xff]   ;;  %v5795_v27 = vmax.f32 %v9466_v12, 0.0 }
 0x4a1   :  { %9316 = vmatpush3.bf16.msra.mxu0 %v10719_v22  ;;  %7765 = vmatprep.subr.bf16.mxu1 %v10722_v28  ;;  %v10765_v22 = vld [vmem:[#allocation13 + $0x180] ss:$12 sps:$4 sm:$0xff]   ;;  %v10769_v28 = vld [vmem:[#allocation13 + $0x308] ss:$12 sps:$4 sm:$0xff]   ;;  %v11599_v14 = vpack.c.bf16 %v5792_v26, %v5792_v26  ;;  %v10818_v12 = vld [vmem:[#allocation13 + $0x578] ss:$12 sps:$4 sm:$0xff]  }
 0x4a2   :  { %9317 = vmatprep.subr.bf16.mxu0 %v10723_v25  ;;  %v11602_v31 = vpack.c.bf16 %v5795_v27, %v5795_v27  ;;  %v10770_v25 = vld [vmem:[#allocation13 + $0x198] ss:$12 sps:$4 sm:$0xff]   ;;  %v10823_v26 = vld [vmem:[#allocation13 + $0x590] ss:$12 sps:$4 sm:$0xff]  }
 0x4a3   :  { %v10824_v27 = vld [vmem:[#allocation13 + $0x4d0] ss:$12 sps:$4 sm:$0xff]  }
 0x4a4   :  { %7766 = vmatpush1.bf16.msra.mxu1 %v10720_v33  ;;  %v10777_v33 = vld [vmem:[#allocation13 + $0x1b4] ss:$12 sps:$4 sm:$0xff]  }
 0x4a5   :  { %9318 = vmatpush3.bf16.msra.mxu0 %v10724_v34  ;;  %7767 = vmatprep.subr.bf16.mxu1 %v10727_v35  ;;  %v10778_v34 = vld [vmem:[#allocation13 + $0x3f8] ss:$12 sps:$4 sm:$0xff]   ;;  %v10775_v35 = vld [vmem:[#allocation13 + $0x1b0] ss:$12 sps:$4 sm:$0xff]  }
 0x4a6   :  { %9325 = vmatprep.subr.bf16.mxu0 %v10728_v8  ;;  %v10782_v8 = vld [vmem:[#allocation13 + $0x1cc] ss:$12 sps:$4 sm:$0xff]  }
 0x4a8   :  { %8030 = vmatmul.mubr.bf16.vlgmr.msra.gmra.mrb[28].mxu0 %v11586_v37  ;;  %7768 = vmatpush1.bf16.msra.mxu1 %v10725_v7  ;;  %v10780_v7 = vld [vmem:[#allocation13 + $0x1c8] ss:$12 sps:$4 sm:$0xff]  }
 0x4a9   :  { %9326 = vmatpush3.bf16.msra.mxu0 %v10729_v13  ;;  %8069 = vmatprep.mubr.bf16.mxu0 %v11588_v42  ;;  %v10784_v13 = vld [vmem:[#allocation13 + $0x350] ss:$12 sps:$4 sm:$0xff]  }
 0x4aa   :  { %7769 = vmatprep.subr.bf16.mxu1 %v10732_v41  ;;  %9327 = vmatprep.subr.bf16.mxu0 %v10733_v18  ;;  %v10788_v41 = vld [vmem:[#allocation13 + $0x428] ss:$12 sps:$4 sm:$0xff]   ;;  %v10785_v18 = vld [vmem:[#allocation13 + $0x1e0] ss:$12 sps:$4 sm:$0xff]  }
 0x4ac   :  { %7770 = vmatpush1.bf16.msra.mxu1 %v10730_v43  ;;  %v10792_v43 = vld [vmem:[#allocation13 + $0x1fc] ss:$12 sps:$4 sm:$0xff]  }
 0x4ad   :  { %9328 = vmatpush3.bf16.msra.mxu0 %v10734_v44  ;;  %7771 = vmatprep.subr.bf16.mxu1 %v10737_v39  ;;  %v10793_v44 = vld [vmem:[#allocation13 + $0x440] ss:$12 sps:$4 sm:$0xff]   ;;  %v2142_v39 = vsub.s32 7, %v11473_v61 }
 0x4ae   :  { %9329 = vmatprep.subr.bf16.mxu0 %v10738_v45  ;;  %v10790_v45 = vld [vmem:[#allocation13 + $0x1f8] ss:$12 sps:$4 sm:$0xff]  }
 0x4b0   :  { %7772 = vmatpush1.bf16.msra.mxu1 %v10735_v46  ;;  %v10794_v46 = vld [vmem:[#allocation13 + $0x380] ss:$12 sps:$4 sm:$0xff]  }
 0x4b1   :  { %9330 = vmatpush3.bf16.msra.mxu0 %v10739_v47  ;;  %7773 = vmatprep.subr.bf16.mxu1 %v10742_v17  ;;  %v10797_v47 = vld [vmem:[#allocation13 + $0x214] ss:$12 sps:$4 sm:$0xff]   ;;  %v2131_v17 = vrot.slane %v11565_v30, %v542_v40  ;;  %v10804_v40 = vld [vmem:[#allocation13 + $0x3b0] ss:$12 sps:$4 sm:$0xff]  }
 0x4b2   :  { %9331 = vmatprep.subr.bf16.mxu0 %v10743_v48  ;;  %v10798_v48 = vld [vmem:[#allocation13 + $0x458] ss:$12 sps:$4 sm:$0xff]  }
 0x4b4   :  { %7774 = vmatpush1.bf16.msra.mxu1 %v10740_v49  ;;  %v2143_v49 = vrot.slane %v11565_v30, %v2142_v39  ;;  %v10845_v39 = vld [vmem:[#allocation13 + $0x300] ss:$12 sps:$4 sm:$0xff]  }
 0x4b5   :  { %9332 = vmatpush3.bf16.msra.mxu0 %v10744_v50  ;;  %7775 = vmatprep.subr.bf16.mxu1 %v10747_v51  ;;  %v10795_v50 = vld [vmem:[#allocation13 + $0x210] ss:$12 sps:$4 sm:$0xff]   ;;  %v10799_v51 = vld [vmem:[#allocation13 + $0x398] ss:$12 sps:$4 sm:$0xff]  }
 0x4b6   :  { %9333 = vmatprep.subr.bf16.mxu0 %v10748_v52  ;;  %v10802_v52 = vld [vmem:[#allocation13 + $0x22c] ss:$12 sps:$4 sm:$0xff]  }
 0x4b8   :  { %7776 = vmatpush1.bf16.msra.mxu1 %v10745_v53  ;;  %v9465_v53 = vadd.f32 %v11574_v11, %v2131_v17  ;;  %v10848_v17 = vld [vmem:[#allocation13 + $0x318] ss:$12 sps:$4 sm:$0xff]  }
 0x4b9   :  { %9334 = vmatpush3.bf16.msra.mxu0 %v10749_v54  ;;  %7777 = vmatprep.subr.bf16.mxu1 %v10752_v55  ;;  %v10803_v54 = vld [vmem:[#allocation13 + $0x470] ss:$12 sps:$4 sm:$0xff]   ;;  %v9468_v55 = vadd.f32 %v11582_v21, %v2143_v49  ;;  %v10813_v21 = vld [vmem:[#allocation13 + $0x560] ss:$12 sps:$4 sm:$0xff]  }
 0x4ba   :  { %9335 = vmatprep.subr.bf16.mxu0 %v10753_v59  ;;  %v10800_v59 = vld [vmem:[#allocation13 + $0x228] ss:$12 sps:$4 sm:$0xff]   ;;  %v10899_v49 = vld [vmem:[#allocation13 + $0x620] ss:$12 sps:$4 sm:$0xff]  }
 0x4bb   :  { %v5797_v60 = vmax.f32 %v9468_v55, 0.0  ;;  %v10859_v55 = vld [vmem:[#allocation13 + $0x364] ss:$12 sps:$4 sm:$0xff]  }
 0x4bc   :  { %7778 = vmatpush1.bf16.msra.mxu1 %v10750_v63  ;;  %v10807_v63 = vld [vmem:[#allocation13 + $0x244] ss:$12 sps:$4 sm:$0xff]  }
 0x4bd   :  { %9336 = vmatpush3.bf16.msra.mxu0 %v10754_v56  ;;  %7779 = vmatprep.subr.bf16.mxu1 %v10757_v58  ;;  %v5794_v56 = vmax.f32 %v9465_v53, 0.0  ;;  %v10808_v58 = vld [vmem:[#allocation13 + $0x548] ss:$12 sps:$4 sm:$0xff]   ;;  %v10904_v53 = vld [vmem:[#allocation13 + $0x638] ss:$12 sps:$4 sm:$0xff]  }
 0x4be   :  { %9337 = vmatprep.subr.bf16.mxu0 %v10758_v3  ;;  %v10805_v3 = vld [vmem:[#allocation13 + $0x240] ss:$12 sps:$4 sm:$0xff]  }
 0x4bf   :  { %v11614_v11 = vpack.c.bf16 %v5794_v56, %v5794_v56  ;;  %v10914_v56 = vld [vmem:[#allocation13 + $0x668] ss:$12 sps:$4 sm:$0xff]  }
 0x4c0   :  { %7780 = vmatpush1.bf16.msra.mxu1 %v10755_v0  ;;  %v10812_v0 = vld [vmem:[#allocation13 + $0x25c] ss:$12 sps:$4 sm:$0xff]  }
 0x4c1   :  { %9338 = vmatpush3.bf16.msra.mxu0 %v10759_v5  ;;  %7781 = vmatprep.subr.bf16.mxu1 %v10762_v6  ;;  %v11616_v5 = vpack.c.bf16 %v5797_v60, %v5797_v60  ;;  %v10810_v6 = vld [vmem:[#allocation13 + $0x258] ss:$12 sps:$4 sm:$0xff]  }
 0x4c2   :  { %9339 = vmatprep.subr.bf16.mxu0 %v10763_v10  ;;  %v10817_v10 = vld [vmem:[#allocation13 + $0x274] ss:$12 sps:$4 sm:$0xff]   ;;  %v10860_v60 = vld [vmem:[#allocation13 + $0x378] ss:$12 sps:$4 sm:$0xff]  }
 0x4c4   :  { %7782 = vmatpush1.bf16.msra.mxu1 %v10760_v15  ;;  %v10815_v15 = vld [vmem:[#allocation13 + $0x270] ss:$12 sps:$4 sm:$0xff]  }
 0x4c5   :  { %9340 = vmatpush3.bf16.msra.mxu0 %v10764_v23  ;;  %7792 = vmatprep.subr.bf16.mxu1 %v10767_v24  ;;  %v10819_v23 = vld [vmem:[#allocation13 + $0x4b8] ss:$12 sps:$4 sm:$0xff]  }
 0x4c6   :  { %9347 = vmatprep.subr.bf16.mxu0 %v10768_v57  ;;  %v10822_v24 = vld [vmem:[#allocation13 + $0x28c] ss:$12 sps:$4 sm:$0xff]   ;;  %v10820_v57 = vld [vmem:[#allocation13 + $0x288] ss:$12 sps:$4 sm:$0xff]  }
 0x4c7   :  { %7784 = vmatmul.mubr.bf16.vlgmr.msra.gmra.mrb[16].mxu1 %v11586_v37  ;;  %v10787_v37 = vld [vmem:[#allocation13 + $0x1e4] ss:$12 sps:$4 sm:$0xff]  }
 0x4c8   :  { %8070 = vmatmul.mubr.bf16.vlgmr.msra.gmra.mrb[32].mxu0 %v11599_v14  ;;  %7793 = vmatpush1.bf16.msra.mxu1 %v10765_v22  ;;  %v10827_v22 = vld [vmem:[#allocation13 + $0x2a4] ss:$12 sps:$4 sm:$0xff]  }
 0x4c9   :  { %7824 = vmatprep.mubr.bf16.mxu1 %v11588_v42  ;;  %9348 = vmatpush3.bf16.msra.mxu0 %v10769_v28  ;;  %v10789_v42 = vld [vmem:[#allocation13 + $0x368] ss:$12 sps:$4 sm:$0xff]  }
 0x4ca   :  { %8109 = vmatprep.mubr.bf16.mxu0 %v11602_v31  ;;  %7794 = vmatprep.subr.bf16.mxu1 %v10772_v29  ;;  %v10828_v28 = vld [vmem:[#allocation13 + $0x5a8] ss:$12 sps:$4 sm:$0xff]   ;;  %v10825_v29 = vld [vmem:[#allocation13 + $0x2a0] ss:$12 sps:$4 sm:$0xff]  }
 0x4cb   :  { %9349 = vmatprep.subr.bf16.mxu0 %v10773_v20  ;;  %v10829_v20 = vld [vmem:[#allocation13 + $0x4e8] ss:$12 sps:$4 sm:$0xff]  }
 0x4cc   :  { %7795 = vmatpush1.bf16.msra.mxu1 %v10770_v25  ;;  %v10832_v25 = vld [vmem:[#allocation13 + $0x2bc] ss:$12 sps:$4 sm:$0xff]  }
 0x4cd   :  { %9350 = vmatpush3.bf16.msra.mxu0 %v10774_v32  ;;  %7796 = vmatprep.subr.bf16.mxu1 %v10777_v33  ;;  %v2138_v32 = vsub.s32 6, %v11473_v61  ;;  %v10833_v33 = vld [vmem:[#allocation13 + $0x5c0] ss:$12 sps:$4 sm:$0xff]  }
 0x4ce   :  { %9351 = vmatprep.subr.bf16.mxu0 %v10778_v34  ;;  %v10830_v34 = vld [vmem:[#allocation13 + $0x2b8] ss:$12 sps:$4 sm:$0xff]  }
 0x4d0   :  { %7797 = vmatpush1.bf16.msra.mxu1 %v10775_v35  ;;  %v10834_v35 = vld [vmem:[#allocation13 + $0x500] ss:$12 sps:$4 sm:$0xff]  }
 0x4d1   :  { %9352 = vmatpush3.bf16.msra.mxu0 %v10779_v36  ;;  %7798 = vmatprep.subr.bf16.mxu1 %v10782_v8  ;;  %v10837_v36 = vld [vmem:[#allocation13 + $0x2d4] ss:$12 sps:$4 sm:$0xff]   ;;  %v2139_v8 = vrot.slane %v11565_v30, %v2138_v32 }
 0x4d2   :  { %9353 = vmatprep.subr.bf16.mxu0 %v10783_v38  ;;  %v10838_v38 = vld [vmem:[#allocation13 + $0x5d8] ss:$12 sps:$4 sm:$0xff]   ;;  %v10890_v30 = vld [vmem:[#allocation13 + $0x6c8] ss:$12 sps:$4 sm:$0xff]   ;;  %v10881_v32 = vld [vmem:[#allocation13 + $0x420] ss:$12 sps:$4 sm:$0xff]  }
 0x4d3   :  { %v9467_v61 = vadd.f32 %v11578_v19, %v2139_v8  ;;  %v10894_v19 = vld [vmem:[#allocation13 + $0x608] ss:$12 sps:$4 sm:$0xff]   ;;  %v10893_v8 = vld [vmem:[#allocation13 + $0x46c] ss:$12 sps:$4 sm:$0xff]  }
 0x4d4   :  { %7799 = vmatpush1.bf16.msra.mxu1 %v10780_v7  ;;  %v10835_v7 = vld [vmem:[#allocation13 + $0x2d0] ss:$12 sps:$4 sm:$0xff]  }
 0x4d5   :  { %9354 = vmatpush3.bf16.msra.mxu0 %v10784_v13  ;;  %7800 = vmatprep.subr.bf16.mxu1 %v10787_v37  ;;  %v10839_v13 = vld [vmem:[#allocation13 + $0x518] ss:$12 sps:$4 sm:$0xff]  }
 0x4d6   :  { %9355 = vmatprep.subr.bf16.mxu0 %v10788_v41  ;;  %v10842_v37 = vld [vmem:[#allocation13 + $0x2ec] ss:$12 sps:$4 sm:$0xff]   ;;  %v10843_v41 = vld [vmem:[#allocation13 + $0x5f0] ss:$12 sps:$4 sm:$0xff]  }
 0x4d8   :  { %7801 = vmatpush1.bf16.msra.mxu1 %v10785_v18  ;;  %v10840_v18 = vld [vmem:[#allocation13 + $0x2e8] ss:$12 sps:$4 sm:$0xff]  }
 0x4d9   :  { %9356 = vmatpush3.bf16.msra.mxu0 %v10789_v42  ;;  %7802 = vmatprep.subr.bf16.mxu1 %v10792_v43  ;;  %v10844_v42 = vld [vmem:[#allocation13 + $0x530] ss:$12 sps:$4 sm:$0xff]  }
 0x4da   :  { %9357 = vmatprep.subr.bf16.mxu0 %v10793_v44  ;;  %v10847_v43 = vld [vmem:[#allocation13 + $0x304] ss:$12 sps:$4 sm:$0xff]   ;;  %v5796_v44 = vmax.f32 %v9467_v61, 0.0 }
 0x4db   :  { %v10901_v61 = vld [vmem:[#allocation13 + $0x498] ss:$12 sps:$4 sm:$0xff]  }
 0x4dc   :  { %7803 = vmatpush1.bf16.msra.mxu1 %v10790_v45  ;;  %v10850_v45 = vld [vmem:[#allocation13 + $0x31c] ss:$12 sps:$4 sm:$0xff]  }
 0x4dd   :  { %9358 = vmatpush3.bf16.msra.mxu0 %v10794_v46  ;;  %7804 = vmatprep.subr.bf16.mxu1 %v10797_v47  ;;  %v11623_v46 = vpack.c.bf16 %v5796_v44, %v5796_v44  ;;  %v10895_v47 = vld [vmem:[#allocation13 + $0x6e0] ss:$12 sps:$4 sm:$0xff]   ;;  %v10918_v44 = vld [vmem:[#allocation13 + $0x4e4] ss:$12 sps:$4 sm:$0xff]  }
 0x4de   :  { %9359 = vmatprep.subr.bf16.mxu0 %v10798_v48  ;;  %v10853_v48 = vld [vmem:[#allocation13 + $0x334] ss:$12 sps:$4 sm:$0xff]  }
 0x4e0   :  { %7805 = vmatpush1.bf16.msra.mxu1 %v10795_v50  ;;  %v10900_v50 = vld [vmem:[#allocation13 + $0x6f8] ss:$12 sps:$4 sm:$0xff]  }
 0x4e1   :  { %9360 = vmatpush3.bf16.msra.mxu0 %v10799_v51  ;;  %7806 = vmatprep.subr.bf16.mxu1 %v10802_v52  ;;  %v10851_v51 = vld [vmem:[#allocation13 + $0x330] ss:$12 sps:$4 sm:$0xff]   ;;  %v10856_v52 = vld [vmem:[#allocation13 + $0x34c] ss:$12 sps:$4 sm:$0xff]  }
 0x4e2   :  { %9361 = vmatprep.subr.bf16.mxu0 %v10803_v54  ;;  %v10854_v54 = vld [vmem:[#allocation13 + $0x348] ss:$12 sps:$4 sm:$0xff]  }
 0x4e4   :  { %7807 = vmatpush1.bf16.msra.mxu1 %v10800_v59  ;;  %v10910_v59 = vld [vmem:[#allocation13 + $0x728] ss:$12 sps:$4 sm:$0xff]  }
 0x4e5   :  { %9362 = vmatpush3.bf16.msra.mxu0 %v10804_v40  ;;  %7808 = vmatprep.subr.bf16.mxu1 %v10807_v63  ;;  %v10857_v40 = vld [vmem:[#allocation13 + $0x360] ss:$12 sps:$4 sm:$0xff]   ;;  %v10862_v63 = vld [vmem:[#allocation13 + $0x37c] ss:$12 sps:$4 sm:$0xff]  }
 0x4e6   :  { %9369 = vmatprep.subr.bf16.mxu0 %v10808_v58  ;;  %v10915_v58 = vld [vmem:[#allocation13 + $0x740] ss:$12 sps:$4 sm:$0xff]  }
 0x4e8   :  { %8110 = vmatmul.mubr.bf16.vlgmr.msra.gmra.mrb[36].mxu0 %v11614_v11  ;;  %7809 = vmatpush1.bf16.msra.mxu1 %v10805_v3  ;;  %v10865_v3 = vld [vmem:[#allocation13 + $0x394] ss:$12 sps:$4 sm:$0xff]  }
 0x4e9   :  { %9370 = vmatpush3.bf16.msra.mxu0 %v10809_v4  ;;  %8149 = vmatprep.mubr.bf16.mxu0 %v11616_v5  ;;  %v10919_v4 = vld [vmem:[#allocation13 + $0x680] ss:$12 sps:$4 sm:$0xff]  }
 0x4ea   :  { %7810 = vmatprep.subr.bf16.mxu1 %v10812_v0  ;;  %9371 = vmatprep.subr.bf16.mxu0 %v10813_v21  ;;  %v10920_v0 = vld [vmem:[#allocation13 + $0x758] ss:$12 sps:$4 sm:$0xff]   ;;  %v10863_v21 = vld [vmem:[#allocation13 + $0x390] ss:$12 sps:$4 sm:$0xff]  }
 0x4ec   :  { %7811 = vmatpush1.bf16.msra.mxu1 %v10810_v6  ;;  %v10868_v6 = vld [vmem:[#allocation13 + $0x3ac] ss:$12 sps:$4 sm:$0xff]  }
 0x4ed   :  { %9372 = vmatpush3.bf16.msra.mxu0 %v10814_v9  ;;  %7812 = vmatprep.subr.bf16.mxu1 %v10817_v10  ;;  %v10924_v9 = vld [vmem:[#allocation13 + $0x698] ss:$12 sps:$4 sm:$0xff]   ;;  %v10925_v10 = vld [vmem:[#allocation13 + $0x770] ss:$12 sps:$4 sm:$0xff]  }
 0x4ee   :  { %9373 = vmatprep.subr.bf16.mxu0 %v10818_v12  ;;  %v10866_v12 = vld [vmem:[#allocation13 + $0x3a8] ss:$12 sps:$4 sm:$0xff]  }
 0x4f0   :  { %7813 = vmatpush1.bf16.msra.mxu1 %v10815_v15  ;;  %v10871_v15 = vld [vmem:[#allocation13 + $0x3c4] ss:$12 sps:$4 sm:$0xff]  }
 0x4f1   :  { %9374 = vmatpush3.bf16.msra.mxu0 %v10819_v23  ;;  %7814 = vmatprep.subr.bf16.mxu1 %v10822_v24  ;;  %v10929_v23 = vld [vmem:[#allocation13 + $0x6b0] ss:$12 sps:$4 sm:$0xff]   ;;  %v10930_v24 = vld [vmem:[#allocation13 + $0x848] ss:$12 sps:$4 sm:$0xff]  }
 0x4f2   :  { %9375 = vmatprep.subr.bf16.mxu0 %v10823_v26  ;;  %v10869_v26 = vld [vmem:[#allocation13 + $0x3c0] ss:$12 sps:$4 sm:$0xff]  }
 0x4f4   :  { %7815 = vmatpush1.bf16.msra.mxu1 %v10820_v57  ;;  %v10874_v57 = vld [vmem:[#allocation13 + $0x3dc] ss:$12 sps:$4 sm:$0xff]  }
 0x4f5   :  { %9376 = vmatpush3.bf16.msra.mxu0 %v10824_v27  ;;  %7816 = vmatprep.subr.bf16.mxu1 %v10827_v22  ;;  %v10872_v27 = vld [vmem:[#allocation13 + $0x3d8] ss:$12 sps:$4 sm:$0xff]   ;;  %v10877_v22 = vld [vmem:[#allocation13 + $0x3f4] ss:$12 sps:$4 sm:$0xff]  }
 0x4f6   :  { %9377 = vmatprep.subr.bf16.mxu0 %v10828_v28  ;;  %v10875_v28 = vld [vmem:[#allocation13 + $0x3f0] ss:$12 sps:$4 sm:$0xff]  }
 0x4f8   :  { %7817 = vmatpush1.bf16.msra.mxu1 %v10825_v29  ;;  %v10880_v29 = vld [vmem:[#allocation13 + $0x40c] ss:$12 sps:$4 sm:$0xff]  }
 0x4f9   :  { %9378 = vmatpush3.bf16.msra.mxu0 %v10829_v20  ;;  %7818 = vmatprep.subr.bf16.mxu1 %v10832_v25  ;;  %v10878_v20 = vld [vmem:[#allocation13 + $0x408] ss:$12 sps:$4 sm:$0xff]   ;;  %v10883_v25 = vld [vmem:[#allocation13 + $0x424] ss:$12 sps:$4 sm:$0xff]  }
 0x4fa   :  { %9379 = vmatprep.subr.bf16.mxu0 %v10833_v33  ;;  %v10886_v33 = vld [vmem:[#allocation13 + $0x43c] ss:$12 sps:$4 sm:$0xff]  }
 0x4fc   :  { %7819 = vmatpush1.bf16.msra.mxu1 %v10830_v34  ;;  %v10884_v34 = vld [vmem:[#allocation13 + $0x438] ss:$12 sps:$4 sm:$0xff]  }
 0x4fd   :  { %9380 = vmatpush3.bf16.msra.mxu0 %v10834_v35  ;;  %7820 = vmatprep.subr.bf16.mxu1 %v10837_v36  ;;  %v10889_v35 = vld [vmem:[#allocation13 + $0x454] ss:$12 sps:$4 sm:$0xff]   ;;  %v10887_v36 = vld [vmem:[#allocation13 + $0x450] ss:$12 sps:$4 sm:$0xff]  }
 0x4fe   :  { %9381 = vmatprep.subr.bf16.mxu0 %v10838_v38  ;;  %v10891_v38 = vld [vmem:[#allocation13 + $0x468] ss:$12 sps:$4 sm:$0xff]  }
 0x500   :  { %7821 = vmatpush1.bf16.msra.mxu1 %v10835_v7  ;;  %v10898_v7 = vld [vmem:[#allocation13 + $0x484] ss:$12 sps:$4 sm:$0xff]  }
 0x501   :  { %9382 = vmatpush3.bf16.msra.mxu0 %v10839_v13  ;;  %7822 = vmatprep.subr.bf16.mxu1 %v10842_v37  ;;  %v10896_v13 = vld [vmem:[#allocation13 + $0x480] ss:$12 sps:$4 sm:$0xff]   ;;  %v10903_v37 = vld [vmem:[#allocation13 + $0x49c] ss:$12 sps:$4 sm:$0xff]  }
 0x502   :  { %9383 = vmatprep.subr.bf16.mxu0 %v10843_v41  ;;  %v10908_v41 = vld [vmem:[#allocation13 + $0x4b4] ss:$12 sps:$4 sm:$0xff]  }
 0x504   :  { %7823 = vmatpush1.bf16.msra.mxu1 %v10840_v18  ;;  %v10906_v18 = vld [vmem:[#allocation13 + $0x4b0] ss:$12 sps:$4 sm:$0xff]  }
 0x505   :  { %9384 = vmatpush3.bf16.msra.mxu0 %v10844_v42  ;;  %7833 = vmatprep.subr.bf16.mxu1 %v10847_v43  ;;  %v10913_v42 = vld [vmem:[#allocation13 + $0x4cc] ss:$12 sps:$4 sm:$0xff]   ;;  %v10911_v43 = vld [vmem:[#allocation13 + $0x4c8] ss:$12 sps:$4 sm:$0xff]  }
 0x506   :  { %9391 = vmatprep.subr.bf16.mxu0 %v10890_v30  ;;  %v10916_v30 = vld [vmem:[#allocation13 + $0x4e0] ss:$12 sps:$4 sm:$0xff]  }
 0x507   :  { %7825 = vmatmul.mubr.bf16.vlgmr.msra.gmra.mrb[16].mxu1 %v11599_v14  ;;  %v10905_v14 = vld [vmem:[#allocation13 + $0x710] ss:$12 sps:$4 sm:$0xff]  }
 0x508   :  { %8150 = vmatmul.mubr.bf16.vlgmr.msra.gmra.mrb[40].mxu0 %v11623_v46  ;;  %7834 = vmatpush1.bf16.msra.mxu1 %v10845_v39  ;;  %v11630_v39 = vld [vmem:[#allocation11 + $0x8] sm:$0xf] }
 0x509   :  { %7865 = vmatprep.mubr.bf16.mxu1 %v11602_v31  ;;  %7835 = vmatprep.subr.bf16.mxu1 %v10850_v45  ;;  %v10909_v31 = vld [vmem:[#allocation13 + $0x650] ss:$12 sps:$4 sm:$0xff]   ;;  %v2151_v45 = vrot.slane %v11630_v39, %v11481_v1 }
 0x50a   :  { %9392 = vmatpush3.bf16.msra.mxu0 %v10894_v19  ;;  %v10921_v19 = vld [vmem:[#allocation13 + $0x4f8] ss:$12 sps:$4 sm:$0xff]  }
 0x50b   :  { %9393 = vmatprep.subr.bf16.mxu0 %v10895_v47  ;;  %v2159_v47 = vrot.slane %v11630_v39, %v11484_v2 }
 0x50c   :  { %7836 = vmatpush1.bf16.msra.mxu1 %v10848_v17  ;;  %v10928_v17 = vld [vmem:[#allocation13 + $0x514] ss:$12 sps:$4 sm:$0xff]  }
 0x50d   :  { %7837 = vmatprep.subr.bf16.mxu1 %v10853_v48 }
 0x50e   :  { %9394 = vmatpush3.bf16.msra.mxu0 %v10899_v49 }
 0x50f   :  { %9395 = vmatprep.subr.bf16.mxu0 %v10900_v50 }
 0x510   :  { %7838 = vmatpush1.bf16.msra.mxu1 %v10851_v51 }
 0x511   :  { %7839 = vmatprep.subr.bf16.mxu1 %v10856_v52 }
 0x512   :  { %9396 = vmatpush3.bf16.msra.mxu0 %v10904_v53 }
 0x513   :  { %9397 = vmatprep.subr.bf16.mxu0 %v10905_v14 }
 0x514   :  { %7840 = vmatpush1.bf16.msra.mxu1 %v10854_v54  ;;  %v10926_v54 = vld [vmem:[#allocation13 + $0x510] ss:$12 sps:$4 sm:$0xff]  }
 0x515   :  { %7841 = vmatprep.subr.bf16.mxu1 %v10859_v55 }
 0x516   :  { %9398 = vmatpush3.bf16.msra.mxu0 %v10909_v31 }
 0x517   :  { %9399 = vmatprep.subr.bf16.mxu0 %v10910_v59 }
 0x518   :  { %7842 = vmatpush1.bf16.msra.mxu1 %v10857_v40 }
 0x519   :  { %7843 = vmatprep.subr.bf16.mxu1 %v10862_v63  ;;  %v10933_v63 = vld [vmem:[#allocation13 + $0x52c] ss:$12 sps:$4 sm:$0xff]  }
 0x51a   :  { %9400 = vmatpush3.bf16.msra.mxu0 %v10914_v56 }
 0x51b   :  { %9401 = vmatprep.subr.bf16.mxu0 %v10915_v58 }
 0x51c   :  { %7844 = vmatpush1.bf16.msra.mxu1 %v10860_v60 }
 0x51d   :  { %7845 = vmatprep.subr.bf16.mxu1 %v10865_v3  ;;  %v10931_v3 = vld [vmem:[#allocation13 + $0x528] ss:$12 sps:$4 sm:$0xff]  }
 0x51e   :  { %9402 = vmatpush3.bf16.msra.mxu0 %v10919_v4  ;;  %v10934_v4 = vld [vmem:[#allocation13 + $0x788] ss:$12 sps:$4 sm:$0xff]  }
 0x51f   :  { %9403 = vmatprep.subr.bf16.mxu0 %v10920_v0 }
 0x520   :  { %7846 = vmatpush1.bf16.msra.mxu1 %v10863_v21  ;;  %v10935_v21 = vld [vmem:[#allocation13 + $0x860] ss:$12 sps:$4 sm:$0xff]  }
 0x521   :  { %7847 = vmatprep.subr.bf16.mxu1 %v10868_v6  ;;  %v10938_v6 = vld [vmem:[#allocation13 + $0x544] ss:$12 sps:$4 sm:$0xff]  }
 0x522   :  { %9404 = vmatpush3.bf16.msra.mxu0 %v10924_v9 }
 0x523   :  { %9405 = vmatprep.subr.bf16.mxu0 %v10925_v10  ;;  %v10936_v10 = vld [vmem:[#allocation13 + $0x540] ss:$12 sps:$4 sm:$0xff]  }
 0x524   :  { %7848 = vmatpush1.bf16.msra.mxu1 %v10866_v12  ;;  %v10939_v12 = vld [vmem:[#allocation13 + $0x7a0] ss:$12 sps:$4 sm:$0xff]  }
 0x525   :  { %7849 = vmatprep.subr.bf16.mxu1 %v10871_v15  ;;  %v10940_v15 = vld [vmem:[#allocation13 + $0x878] ss:$12 sps:$4 sm:$0xff]  }
 0x526   :  { %9406 = vmatpush3.bf16.msra.mxu0 %v10929_v23  ;;  %v10943_v23 = vld [vmem:[#allocation13 + $0x55c] ss:$12 sps:$4 sm:$0xff]  }
 0x527   :  { %9413 = vmatprep.subr.bf16.mxu0 %v10930_v24  ;;  %v10941_v24 = vld [vmem:[#allocation13 + $0x558] ss:$12 sps:$4 sm:$0xff]  }
 0x528   :  { %7850 = vmatpush1.bf16.msra.mxu1 %v10869_v26  ;;  %v10944_v26 = vld [vmem:[#allocation13 + $0x7b8] ss:$12 sps:$4 sm:$0xff]  }
 0x529   :  { %7851 = vmatprep.subr.bf16.mxu1 %v10874_v57  ;;  %v10945_v57 = vld [vmem:[#allocation13 + $0x890] ss:$12 sps:$4 sm:$0xff]  }
 0x52c   :  { %7852 = vmatpush1.bf16.msra.mxu1 %v10872_v27  ;;  %v10948_v27 = vld [vmem:[#allocation13 + $0x574] ss:$12 sps:$4 sm:$0xff]  }
 0x52d   :  { %7853 = vmatprep.subr.bf16.mxu1 %v10877_v22  ;;  %v10946_v22 = vld [vmem:[#allocation13 + $0x570] ss:$12 sps:$4 sm:$0xff]  }
 0x530   :  { %7854 = vmatpush1.bf16.msra.mxu1 %v10875_v28  ;;  %v10949_v28 = vld [vmem:[#allocation13 + $0x7d0] ss:$12 sps:$4 sm:$0xff]  }
 0x531   :  { %7855 = vmatprep.subr.bf16.mxu1 %v10880_v29  ;;  %v10950_v29 = vld [vmem:[#allocation13 + $0x8a8] ss:$12 sps:$4 sm:$0xff]  }
 0x534   :  { %7856 = vmatpush1.bf16.msra.mxu1 %v10878_v20  ;;  %v10953_v20 = vld [vmem:[#allocation13 + $0x58c] ss:$12 sps:$4 sm:$0xff]  }
 0x535   :  { %7857 = vmatprep.subr.bf16.mxu1 %v10883_v25  ;;  %v10951_v25 = vld [vmem:[#allocation13 + $0x588] ss:$12 sps:$4 sm:$0xff]  }
 0x538   :  { %7858 = vmatpush1.bf16.msra.mxu1 %v10881_v32  ;;  %v10954_v32 = vld [vmem:[#allocation13 + $0x7e8] ss:$12 sps:$4 sm:$0xff]  }
 0x539   :  { %7859 = vmatprep.subr.bf16.mxu1 %v10886_v33  ;;  %v10955_v33 = vld [vmem:[#allocation13 + $0x8c0] ss:$12 sps:$4 sm:$0xff]  }
 0x53c   :  { %7860 = vmatpush1.bf16.msra.mxu1 %v10884_v34  ;;  %v10958_v34 = vld [vmem:[#allocation13 + $0x5a4] ss:$12 sps:$4 sm:$0xff]  }
 0x53d   :  { %7861 = vmatprep.subr.bf16.mxu1 %v10889_v35  ;;  %v10956_v35 = vld [vmem:[#allocation13 + $0x5a0] ss:$12 sps:$4 sm:$0xff]  }
 0x540   :  { %7862 = vmatpush1.bf16.msra.mxu1 %v10887_v36  ;;  %v10959_v36 = vld [vmem:[#allocation13 + $0x800] ss:$12 sps:$4 sm:$0xff]  }
 0x541   :  { %7863 = vmatprep.subr.bf16.mxu1 %v10893_v8  ;;  %v2155_v8 = vrot.slane %v11630_v39, %v11507_v16 }
 0x544   :  { %7864 = vmatpush1.bf16.msra.mxu1 %v10891_v38  ;;  %v10960_v38 = vld [vmem:[#allocation13 + $0x8d8] ss:$12 sps:$4 sm:$0xff]  }
 0x545   :  { %7874 = vmatprep.subr.bf16.mxu1 %v10898_v7  ;;  %v10963_v7 = vld [vmem:[#allocation13 + $0x5bc] ss:$12 sps:$4 sm:$0xff]  }
 0x547   :  { %7866 = vmatmul.mubr.bf16.vlgmr.msra.gmra.mrb[16].mxu1 %v11614_v11  ;;  %v10923_v11 = vld [vmem:[#allocation13 + $0x4fc] ss:$12 sps:$4 sm:$0xff]  }
 0x548   :  { %7875 = vmatpush1.bf16.msra.mxu1 %v10896_v13  ;;  %7906 = vmatprep.mubr.bf16.mxu1 %v11616_v5  ;;  %v2147_v5 = vrot.slane %v11630_v39, %v11476_v62  ;;  %v10961_v13 = vld [vmem:[#allocation13 + $0x5b8] ss:$12 sps:$4 sm:$0xff]  }
 0x549   :  { %7876 = vmatprep.subr.bf16.mxu1 %v10903_v37  ;;  %v10964_v37 = vld [vmem:[#allocation13 + $0x818] ss:$12 sps:$4 sm:$0xff]  }
 0x54c   :  { %7877 = vmatpush1.bf16.msra.mxu1 %v10901_v61 }
 0x54d   :  { %7878 = vmatprep.subr.bf16.mxu1 %v10908_v41  ;;  %v10965_v41 = vld [vmem:[#allocation13 + $0x8f0] ss:$12 sps:$4 sm:$0xff]  }
 0x550   :  { %7879 = vmatpush1.bf16.msra.mxu1 %v10906_v18  ;;  %v10968_v18 = vld [vmem:[#allocation13 + $0x5d4] ss:$12 sps:$4 sm:$0xff]  }
 0x551   :  { %7880 = vmatprep.subr.bf16.mxu1 %v10913_v42 }
 0x554   :  { %7881 = vmatpush1.bf16.msra.mxu1 %v10911_v43 }
 0x555   :  { %7882 = vmatprep.subr.bf16.mxu1 %v10918_v44  ;;  %v10966_v44 = vld [vmem:[#allocation13 + $0x5d0] ss:$12 sps:$4 sm:$0xff]  }
 0x558   :  { %7883 = vmatpush1.bf16.msra.mxu1 %v10916_v30  ;;  %v10969_v30 = vld [vmem:[#allocation13 + $0x830] ss:$12 sps:$4 sm:$0xff]  }
 0x559   :  { %7884 = vmatprep.subr.bf16.mxu1 %v10923_v11 }
 0x55a   :  { %v5660_v48 = vpop.f32.mrb[12].mxu1 }
 0x55b   :  { %v9469_v49 = vadd.f32 %v5660_v48, %v2147_v5  ;;  %v11638_v50 = vpop.f32.mrb[24].mxu0  ;;  %v5662_v51 = vpop.f32.mrb[13].mxu1  ;;  %v10975_v48 = vld [vmem:[#allocation13 + $0x604] ss:$12 sps:$4 sm:$0xff]  }
 0x55c   :  { %v9470_v52 = vadd.f32 %v5662_v51, %v2151_v45  ;;  %v5785_v53 = vpop.f32.mrb[25].mxu0  ;;  %v5664_v14 = vpop.f32.mrb[14].mxu1  ;;  %7885 = vmatpush1.bf16.msra.mxu1 %v10921_v19  ;;  %v9471_v61 = vadd.f32 %v11638_v50, %v2155_v8  ;;  %v10972_v45 = vld [vmem:[#allocation13 + $0x5ec] ss:$12 sps:$4 sm:$0xff]   ;;  %v10978_v50 = vld [vmem:[#allocation13 + $0x61c] ss:$12 sps:$4 sm:$0xff]  }
 0x55d   :  { %v5798_v55 = vmax.f32 %v9469_v49, 0.0  ;;  %v9472_v31 = vadd.f32 %v5785_v53, %v2159_v47  ;;  %v5787_v59 = vpop.f32.mrb[26].mxu0  ;;  %v5665_v40 = vpop.f32.mrb[15].mxu1  ;;  %7886 = vmatprep.subr.bf16.mxu1 %v10928_v17  ;;  %v10970_v47 = vld [vmem:[#allocation13 + $0x5e8] ss:$12 sps:$4 sm:$0xff]  }
 0x55e   :  { %v5799_v56 = vmax.f32 %v9470_v52, 0.0  ;;  %v5788_v2 = vpop.f32.mrb[27].mxu0  ;;  %v5800_v39 = vmax.f32 %v9471_v61, 0.0  ;;  %v10973_v49 = vld [vmem:[#allocation13 + $0x600] ss:$12 sps:$4 sm:$0xff]  }
 0x55f   :  { %v5801_v58 = vmax.f32 %v9472_v31, 0.0  ;;  %v11642_v0 = vpack.c.bf16 %v5798_v55, %v5798_v55  ;;  %v10976_v51 = vld [vmem:[#allocation13 + $0x618] ss:$12 sps:$4 sm:$0xff]   ;;  %v10981_v52 = vld [vmem:[#allocation13 + $0x634] ss:$12 sps:$4 sm:$0xff]  }
 0x560   :  { %v11640_v60 = vpack.c.bf16 %v5799_v56, %v5799_v56  ;;  %7887 = vmatpush1.bf16.msra.mxu1 %v10926_v54  ;;  %v11652_v17 = vpack.c.bf16 %v5800_v39, %v5800_v39  ;;  %v10979_v53 = vld [vmem:[#allocation13 + $0x630] ss:$12 sps:$4 sm:$0xff]   ;;  %v10984_v14 = vld [vmem:[#allocation13 + $0x64c] ss:$12 sps:$4 sm:$0xff]   ;;  %v10982_v54 = vld [vmem:[#allocation13 + $0x648] ss:$12 sps:$4 sm:$0xff]  }
 0x561   :  { %7888 = vmatprep.subr.bf16.mxu1 %v10933_v63  ;;  %v11645_v9 = vpack.c.bf16 %v5801_v58, %v5801_v58  ;;  %v10987_v55 = vld [vmem:[#allocation13 + $0x664] ss:$12 sps:$4 sm:$0xff]   ;;  %v10985_v31 = vld [vmem:[#allocation13 + $0x660] ss:$12 sps:$4 sm:$0xff]   ;;  %v10990_v59 = vld [vmem:[#allocation13 + $0x67c] ss:$12 sps:$4 sm:$0xff]  }
 0x562   :  { %8189 = vmatprep.mubr.bf16.mxu0 %v11640_v60  ;;  %v11657_v40 = vld [vmem:[#allocation14] sm:$0x7]  ;;  %v11018_v61 = vld [vmem:[#allocation13 + $0x768] ss:$12 sps:$4 sm:$0xff]   ;;  %v11032_v39 = vld [vmem:[#allocation13 + $0x7cc] ss:$12 sps:$4 sm:$0xff]  }
 0x563   :  { %8190 = vmatmul.mubr.bf16.vlgmr.msra.gmra.mrb[44].mxu0 %v11642_v0  ;;  %v6211_v63 = vrot.slane %v11657_v40, %v11507_v16  ;;  %v10993_v56 = vld [vmem:[#allocation13 + $0x694] ss:$12 sps:$4 sm:$0xff]   ;;  %v11002_v16 = vld [vmem:[#allocation13 + $0x6dc] ss:$12 sps:$4 sm:$0xff]  }
 0x564   :  { %9414 = vmatpush3.bf16.msra.mxu0 %v10934_v4  ;;  %7889 = vmatpush1.bf16.msra.mxu1 %v10931_v3 }
 0x565   :  { %8229 = vmatprep.mubr.bf16.mxu0 %v11645_v9  ;;  %9415 = vmatprep.subr.bf16.mxu0 %v10935_v21 }
 0x566   :  { %7890 = vmatprep.subr.bf16.mxu1 %v10938_v6  ;;  %v10996_v6 = vld [vmem:[#allocation13 + $0x6ac] ss:$12 sps:$4 sm:$0xff]  }
 0x568   :  { %9416 = vmatpush3.bf16.msra.mxu0 %v10939_v12  ;;  %7891 = vmatpush1.bf16.msra.mxu1 %v10936_v10 }
 0x569   :  { %9417 = vmatprep.subr.bf16.mxu0 %v10940_v15  ;;  %7892 = vmatprep.subr.bf16.mxu1 %v10943_v23  ;;  %v10994_v15 = vld [vmem:[#allocation13 + $0x6a8] ss:$12 sps:$4 sm:$0xff]   ;;  %v10999_v23 = vld [vmem:[#allocation13 + $0x6c4] ss:$12 sps:$4 sm:$0xff]  }
 0x56c   :  { %9418 = vmatpush3.bf16.msra.mxu0 %v10944_v26  ;;  %7893 = vmatpush1.bf16.msra.mxu1 %v10941_v24  ;;  %v10997_v24 = vld [vmem:[#allocation13 + $0x6c0] ss:$12 sps:$4 sm:$0xff]   ;;  %v11000_v26 = vld [vmem:[#allocation13 + $0x6d8] ss:$12 sps:$4 sm:$0xff]  }
 0x56d   :  { %9419 = vmatprep.subr.bf16.mxu0 %v10945_v57  ;;  %7894 = vmatprep.subr.bf16.mxu1 %v10948_v27  ;;  %v11005_v57 = vld [vmem:[#allocation13 + $0x6f4] ss:$12 sps:$4 sm:$0xff]   ;;  %v11003_v27 = vld [vmem:[#allocation13 + $0x6f0] ss:$12 sps:$4 sm:$0xff]  }
 0x570   :  { %9420 = vmatpush3.bf16.msra.mxu0 %v10949_v28  ;;  %7895 = vmatpush1.bf16.msra.mxu1 %v10946_v22  ;;  %v11008_v22 = vld [vmem:[#allocation13 + $0x70c] ss:$12 sps:$4 sm:$0xff]   ;;  %v11006_v28 = vld [vmem:[#allocation13 + $0x708] ss:$12 sps:$4 sm:$0xff]  }
 0x571   :  { %9421 = vmatprep.subr.bf16.mxu0 %v10950_v29  ;;  %7896 = vmatprep.subr.bf16.mxu1 %v10953_v20  ;;  %v11011_v29 = vld [vmem:[#allocation13 + $0x724] ss:$12 sps:$4 sm:$0xff]   ;;  %v11009_v20 = vld [vmem:[#allocation13 + $0x720] ss:$12 sps:$4 sm:$0xff]  }
 0x574   :  { %9422 = vmatpush3.bf16.msra.mxu0 %v10954_v32  ;;  %7897 = vmatpush1.bf16.msra.mxu1 %v10951_v25  ;;  %v11014_v25 = vld [vmem:[#allocation13 + $0x73c] ss:$12 sps:$4 sm:$0xff]   ;;  %v11012_v32 = vld [vmem:[#allocation13 + $0x738] ss:$12 sps:$4 sm:$0xff]  }
 0x575   :  { %9423 = vmatprep.subr.bf16.mxu0 %v10955_v33  ;;  %7898 = vmatprep.subr.bf16.mxu1 %v10958_v34  ;;  %v11017_v33 = vld [vmem:[#allocation13 + $0x754] ss:$12 sps:$4 sm:$0xff]  }
 0x578   :  { %9424 = vmatpush3.bf16.msra.mxu0 %v10959_v36  ;;  %7899 = vmatpush1.bf16.msra.mxu1 %v10956_v35  ;;  %v11015_v36 = vld [vmem:[#allocation13 + $0x750] ss:$12 sps:$4 sm:$0xff]  }
 0x579   :  { %9425 = vmatprep.subr.bf16.mxu0 %v10960_v38  ;;  %7900 = vmatprep.subr.bf16.mxu1 %v10963_v7  ;;  %v11020_v7 = vld [vmem:[#allocation13 + $0x76c] ss:$12 sps:$4 sm:$0xff]  }
 0x57b   :  { %v9319_v42 = vpop.f32.mrb[28].mxu0 }
 0x57c   :  { %v9320_v43 = vpop.f32.mrb[29].mxu0  ;;  %9426 = vmatpush3.bf16.msra.mxu0 %v10964_v37  ;;  %7901 = vmatpush1.bf16.msra.mxu1 %v10961_v13 }
 0x57d   :  { %v9321_v11 = vadd.f32 %v9320_v43, %v9319_v42  ;;  %v9322_v5 = vpop.f32.mrb[30].mxu0  ;;  %9427 = vmatprep.subr.bf16.mxu0 %v10965_v41  ;;  %7902 = vmatprep.subr.bf16.mxu1 %v10968_v18  ;;  %v11023_v41 = vld [vmem:[#allocation13 + $0x784] ss:$12 sps:$4 sm:$0xff]   ;;  %v11021_v18 = vld [vmem:[#allocation13 + $0x780] ss:$12 sps:$4 sm:$0xff]  }
 0x57e   :  { %v9323_v19 = vpop.f32.mrb[31].mxu0  ;;  %v11026_v42 = vld [vmem:[#allocation13 + $0x79c] ss:$12 sps:$4 sm:$0xff]   ;;  %v11024_v43 = vld [vmem:[#allocation13 + $0x798] ss:$12 sps:$4 sm:$0xff]  }
 0x57f   :  { %v8032_v3 = vadd.f32 %v9321_v11, %v6211_v63  ;;  %v11030_v11 = vld [vmem:[#allocation13 + $0x7c8] ss:$12 sps:$4 sm:$0xff]   ;;  %v11035_v5 = vld [vmem:[#allocation13 + $0x7e4] ss:$12 sps:$4 sm:$0xff]  }
 0x580   :  { %9428 = vmatpush3.bf16.msra.mxu0 %v10969_v30  ;;  %7903 = vmatpush1.bf16.msra.mxu1 %v10966_v44  ;;  %v11029_v44 = vld [vmem:[#allocation13 + $0x7b4] ss:$12 sps:$4 sm:$0xff]   ;;  %v11027_v30 = vld [vmem:[#allocation13 + $0x7b0] ss:$12 sps:$4 sm:$0xff]  }
 0x581   :  { %7904 = vmatprep.subr.bf16.mxu1 %v10972_v45  ;;  %v11033_v45 = vld [vmem:[#allocation13 + $0x7e0] ss:$12 sps:$4 sm:$0xff]   ;;  %v11038_v19 = vld [vmem:[#allocation13 + $0x7fc] ss:$12 sps:$4 sm:$0xff]  }
 0x582   :  { %v11053_v63 = vld [vmem:[#allocation13 + $0x874] ss:$12 sps:$4 sm:$0xff]  }
 0x583   :  { %8230 = vmatmul.mubr.bf16.vlgmr.msra.gmra.mrb[48].mxu0 %v11652_v17 }
 0x584   :  { %7905 = vmatpush1.bf16.msra.mxu1 %v10970_v47  ;;  %v11041_v47 = vld [vmem:[#allocation13 + $0x814] ss:$12 sps:$4 sm:$0xff]  }
 0x585   :  { %7915 = vmatprep.subr.bf16.mxu1 %v10975_v48 }
 0x587   :  { %7907 = vmatmul.mubr.bf16.vlgmr.msra.gmra.mrb[16].mxu1 %v11623_v46  ;;  %v10988_v46 = vld [vmem:[#allocation13 + $0x678] ss:$12 sps:$4 sm:$0xff]  }
 0x588   :  { %7916 = vmatpush1.bf16.msra.mxu1 %v10973_v49  ;;  %7947 = vmatprep.mubr.bf16.mxu1 %v11640_v60  ;;  %v10991_v60 = vld [vmem:[#allocation13 + $0x690] ss:$12 sps:$4 sm:$0xff]  }
 0x589   :  { %7917 = vmatprep.subr.bf16.mxu1 %v10978_v50  ;;  %v11039_v49 = vld [vmem:[#allocation13 + $0x810] ss:$12 sps:$4 sm:$0xff]  }
 0x58c   :  { %7918 = vmatpush1.bf16.msra.mxu1 %v10976_v51 }
 0x58d   :  { %7919 = vmatprep.subr.bf16.mxu1 %v10981_v52  ;;  %v11044_v52 = vld [vmem:[#allocation13 + $0x82c] ss:$12 sps:$4 sm:$0xff]  }
 0x590   :  { %7920 = vmatpush1.bf16.msra.mxu1 %v10979_v53 }
 0x591   :  { %7921 = vmatprep.subr.bf16.mxu1 %v10984_v14 }
 0x594   :  { %7922 = vmatpush1.bf16.msra.mxu1 %v10982_v54  ;;  %v11042_v54 = vld [vmem:[#allocation13 + $0x828] ss:$12 sps:$4 sm:$0xff]  }
 0x595   :  { %7923 = vmatprep.subr.bf16.mxu1 %v10987_v55  ;;  %v11047_v55 = vld [vmem:[#allocation13 + $0x844] ss:$12 sps:$4 sm:$0xff]  }
 0x598   :  { %7924 = vmatpush1.bf16.msra.mxu1 %v10985_v31  ;;  %v11045_v31 = vld [vmem:[#allocation13 + $0x840] ss:$12 sps:$4 sm:$0xff]  }
 0x599   :  { %7925 = vmatprep.subr.bf16.mxu1 %v10990_v59  ;;  %v11050_v59 = vld [vmem:[#allocation13 + $0x85c] ss:$12 sps:$4 sm:$0xff]  }
 0x59b   :  { %v9341_v2 = vpop.f32.mrb[32].mxu0 }
 0x59c   :  { %v9342_v58 = vpop.f32.mrb[33].mxu0  ;;  %7926 = vmatpush1.bf16.msra.mxu1 %v10988_v46  ;;  %v11048_v46 = vld [vmem:[#allocation13 + $0x858] ss:$12 sps:$4 sm:$0xff]  }
 0x59d   :  { %v9343_v4 = vadd.f32 %v9342_v58, %v9341_v2  ;;  %v9344_v21 = vpop.f32.mrb[34].mxu0  ;;  %7927 = vmatprep.subr.bf16.mxu1 %v10993_v56  ;;  %v11051_v56 = vld [vmem:[#allocation13 + $0x870] ss:$12 sps:$4 sm:$0xff]   ;;  %v11056_v2 = vld [vmem:[#allocation13 + $0x88c] ss:$12 sps:$4 sm:$0xff]  }
 0x59e   :  { %v9345_v10 = vpop.f32.mrb[35].mxu0  ;;  %v11054_v58 = vld [vmem:[#allocation13 + $0x888] ss:$12 sps:$4 sm:$0xff]   ;;  %v11060_v21 = vld [vmem:[#allocation13 + $0x8b8] ss:$12 sps:$4 sm:$0xff]  }
 0x59f   :  { %v8072_v12 = vadd.f32 %v9343_v4, %v8032_v3  ;;  %v11057_v3 = vld [vmem:[#allocation13 + $0x8a0] ss:$12 sps:$4 sm:$0xff]   ;;  %v11062_v4 = vld [vmem:[#allocation13 + $0x8bc] ss:$12 sps:$4 sm:$0xff]  }
 0x5a0   :  { %7928 = vmatpush1.bf16.msra.mxu1 %v10991_v60  ;;  %v11059_v60 = vld [vmem:[#allocation13 + $0x8a4] ss:$12 sps:$4 sm:$0xff]  }
 0x5a1   :  { %7929 = vmatprep.subr.bf16.mxu1 %v10996_v6  ;;  %v11065_v6 = vld [vmem:[#allocation13 + $0x8d4] ss:$12 sps:$4 sm:$0xff]   ;;  %v11063_v10 = vld [vmem:[#allocation13 + $0x8d0] ss:$12 sps:$4 sm:$0xff]  }
 0x5a4   :  { %7930 = vmatpush1.bf16.msra.mxu1 %v10994_v15  ;;  %v11066_v15 = vld [vmem:[#allocation13 + $0x8e8] ss:$12 sps:$4 sm:$0xff]  }
 0x5a5   :  { %7931 = vmatprep.subr.bf16.mxu1 %v10999_v23 }
 0x5a8   :  { %7932 = vmatpush1.bf16.msra.mxu1 %v10997_v24 }
 0x5a9   :  { %7933 = vmatprep.subr.bf16.mxu1 %v11002_v16 }
 0x5ac   :  { %7934 = vmatpush1.bf16.msra.mxu1 %v11000_v26 }
 0x5ad   :  { %7935 = vmatprep.subr.bf16.mxu1 %v11005_v57 }
 0x5b0   :  { %7936 = vmatpush1.bf16.msra.mxu1 %v11003_v27 }
 0x5b1   :  { %7937 = vmatprep.subr.bf16.mxu1 %v11008_v22 }
 0x5b4   :  { %7938 = vmatpush1.bf16.msra.mxu1 %v11006_v28 }
 0x5b5   :  { %7939 = vmatprep.subr.bf16.mxu1 %v11011_v29 }
 0x5b8   :  { %7940 = vmatpush1.bf16.msra.mxu1 %v11009_v20 }
 0x5b9   :  { %7941 = vmatprep.subr.bf16.mxu1 %v11014_v25 }
 0x5bb   :  { %v9363_v34 = vpop.f32.mrb[36].mxu0 }
 0x5bc   :  { %v9364_v35 = vpop.f32.mrb[37].mxu0  ;;  %7942 = vmatpush1.bf16.msra.mxu1 %v11012_v32 }
 0x5bd   :  { %v9365_v8 = vadd.f32 %v9364_v35, %v9363_v34  ;;  %v9366_v38 = vpop.f32.mrb[38].mxu0  ;;  %7943 = vmatprep.subr.bf16.mxu1 %v11017_v33  ;;  %v6203_v34 = vrot.slane %v11657_v40, %v11476_v62 }
 0x5be   :  { %v9367_v13 = vpop.f32.mrb[39].mxu0 }
 0x5bf   :  { %v8112_v37 = vadd.f32 %v9365_v8, %v8072_v12  ;;  %v11068_v12 = vld [vmem:[#allocation13 + $0x8ec] ss:$12 sps:$4 sm:$0xff]  }
 0x5c0   :  { %7944 = vmatpush1.bf16.msra.mxu1 %v11015_v36 }
 0x5c1   :  { %7945 = vmatprep.subr.bf16.mxu1 %v11020_v7 }
 0x5c4   :  { %7946 = vmatpush1.bf16.msra.mxu1 %v11018_v61 }
 0x5c5   :  { %7956 = vmatprep.subr.bf16.mxu1 %v11023_v41 }
 0x5c7   :  { %7948 = vmatmul.mubr.bf16.vlgmr.msra.gmra.mrb[16].mxu1 %v11642_v0  ;;  %v11036_v0 = vld [vmem:[#allocation13 + $0x7f8] ss:$12 sps:$4 sm:$0xff]  }
 0x5c8   :  { %7957 = vmatpush1.bf16.msra.mxu1 %v11021_v18  ;;  %7988 = vmatprep.mubr.bf16.mxu1 %v11645_v9 }
 0x5c9   :  { %7958 = vmatprep.subr.bf16.mxu1 %v11026_v42 }
 0x5cc   :  { %7959 = vmatpush1.bf16.msra.mxu1 %v11024_v43 }
 0x5cd   :  { %7960 = vmatprep.subr.bf16.mxu1 %v11029_v44 }
 0x5d0   :  { %7961 = vmatpush1.bf16.msra.mxu1 %v11027_v30 }
 0x5d1   :  { %7962 = vmatprep.subr.bf16.mxu1 %v11032_v39 }
 0x5d4   :  { %7963 = vmatpush1.bf16.msra.mxu1 %v11030_v11 }
 0x5d5   :  { %7964 = vmatprep.subr.bf16.mxu1 %v11035_v5 }
 0x5d8   :  { %7965 = vmatpush1.bf16.msra.mxu1 %v11033_v45 }
 0x5d9   :  { %7966 = vmatprep.subr.bf16.mxu1 %v11038_v19 }
 0x5db   :  { %v9385_v9 = vpop.f32.mrb[40].mxu0 }
 0x5dc   :  { %v9386_v48 = vpop.f32.mrb[41].mxu0  ;;  %7967 = vmatpush1.bf16.msra.mxu1 %v11036_v0 }
 0x5dd   :  { %v9387_v50 = vadd.f32 %v9386_v48, %v9385_v9  ;;  %v9388_v51 = vpop.f32.mrb[42].mxu0  ;;  %7968 = vmatprep.subr.bf16.mxu1 %v11041_v47 }
 0x5de   :  { %v9389_v53 = vpop.f32.mrb[43].mxu0 }
 0x5df   :  { %v8152_v14 = vadd.f32 %v9387_v50, %v8112_v37 }
 0x5e0   :  { %7969 = vmatpush1.bf16.msra.mxu1 %v11039_v49 }
 0x5e1   :  { %7970 = vmatprep.subr.bf16.mxu1 %v11044_v52 }
 0x5e4   :  { %7971 = vmatpush1.bf16.msra.mxu1 %v11042_v54 }
 0x5e5   :  { %7972 = vmatprep.subr.bf16.mxu1 %v11047_v55 }
 0x5e8   :  { %7973 = vmatpush1.bf16.msra.mxu1 %v11045_v31 }
 0x5e9   :  { %7974 = vmatprep.subr.bf16.mxu1 %v11050_v59 }
 0x5ec   :  { %7975 = vmatpush1.bf16.msra.mxu1 %v11048_v46 }
 0x5ed   :  { %7976 = vmatprep.subr.bf16.mxu1 %v11053_v63 }
 0x5f0   :  { %7977 = vmatpush1.bf16.msra.mxu1 %v11051_v56 }
 0x5f1   :  { %7978 = vmatprep.subr.bf16.mxu1 %v11056_v2 }
 0x5f4   :  { %7979 = vmatpush1.bf16.msra.mxu1 %v11054_v58 }
 0x5f5   :  { %7980 = vmatprep.subr.bf16.mxu1 %v11059_v60 }
 0x5f8   :  { %7981 = vmatpush1.bf16.msra.mxu1 %v11057_v3 }
 0x5f9   :  { %7982 = vmatprep.subr.bf16.mxu1 %v11062_v4 }
 0x5fc   :  { %7983 = vmatpush1.bf16.msra.mxu1 %v11060_v21 }
 0x5fd   :  { %7984 = vmatprep.subr.bf16.mxu1 %v11065_v6 }
 0x600   :  { %7985 = vmatpush1.bf16.msra.mxu1 %v11063_v10 }
 0x601   :  { %7986 = vmatprep.subr.bf16.mxu1 %v11068_v12 }
 0x604   :  { %7987 = vmatpush1.bf16.msra.mxu1 %v11066_v15 }
 0x607   :  { %7989 = vmatmul.mubr.bf16.vlgmr.msra.gmra.mrb[16].mxu1 %v11652_v17  ;;  %v6207_v17 = vrot.slane %v11657_v40, %v11481_v1 }
 0x636   :  { %v9407_v23 = vpop.f32.mrb[44].mxu0 }
 0x637   :  { %v9408_v24 = vpop.f32.mrb[45].mxu0 }
 0x638   :  { %v9409_v16 = vadd.f32 %v9408_v24, %v9407_v23  ;;  %v9410_v26 = vpop.f32.mrb[46].mxu0 }
 0x639   :  { %v9411_v57 = vpop.f32.mrb[47].mxu0 }
 0x63a   :  { %v8192_v27 = vadd.f32 %v9409_v16, %v8152_v14 }
 0x656   :  { %v9429_v22 = vpop.f32.mrb[48].mxu0 }
 0x657   :  { %v9430_v28 = vpop.f32.mrb[49].mxu0 }
 0x658   :  { %v9431_v29 = vadd.f32 %v9430_v28, %v9429_v22  ;;  %v9432_v20 = vpop.f32.mrb[50].mxu0 }
 0x659   :  { %v9433_v25 = vpop.f32.mrb[51].mxu0 }
 0x65a   :  { %v8232_v32 = vadd.f32 %v9431_v29, %v8192_v27 }
 0x65c   :  { %11069 = vtanh.f32 %v8232_v32 }
 0x666   :  { %v11070_v33 = vpop.eup %11069 }
 0x667   :  { %8242 = vst [vmem:[#allocation16 + $0x10] sm:$0xff] %v11070_v33 }
 0x6da   :  { %v7990_v35 = vpop.f32.mrb[16].mxu1 }
 0x6db   :  { %v9473_v36 = vadd.f32 %v7990_v35, %v6203_v34  ;;  %v7992_v8 = vpop.f32.mrb[17].mxu1 }
 0x6dc   :  { %v9474_v38 = vadd.f32 %v7992_v8, %v6207_v17  ;;  %v7994_v7 = vpop.f32.mrb[18].mxu1 }
 0x6dd   :  { %11071 = vtanh.f32 %v9473_v36  ;;  %v7995_v13 = vpop.f32.mrb[19].mxu1 }
 0x6de   :  { %11073 = vtanh.f32 %v9474_v38 }
 0x6e7   :  { %v11072_v37 = vpop.eup %11071 }
 0x6e8   :  { %v11074_v61 = vpop.eup %11073  ;;  %8240 = vst [vmem:[#allocation16] sm:$0xff] %v11072_v37 }
 0x6e9   :  { %8241 = vst [vmem:[#allocation16 + $0x8] sm:$0xff] %v11074_v61 }
 0x6ea   :  { %11262 = shalt.err (!%p11259_p12)
}
 0x6eb   :  { %s11263_s12 = scalar_lea.hbm %s11688_s8, 384 }
 0x6ec   :  { %p11264_p13 = scmp.ne.s32.totalorder %s11688_s8, %s11263_s12  ;;  %p11267_p0 = scmp.lt.u32.totalorder %s11263_s12, %s11688_s8 }
 0x6ee   :  { %p11269_p1 = pnand %p11267_p0, %p11264_p13 }
 0x6f0   :  { %11272 = shalt.err (!%p11269_p1)
}
 0x6f1   :  { %8252 = dma.vmem_to_hbm [thread:$0]  %s8250_s16, 384, %s11688_s8, [#allocation4]  }
 0x6f2   :  { %11283 = dma.done.wait [#allocation4], 384  }
 0x6f3   :  { %11284 = vsyncadd [#allocation4], 4294966912 }
 0x6f4   :  { %8256 = vsyncpa [#allocation3], 1 }
 0x6f5   :  { %8257 = vsyncpa [#allocation6], 1 }
 0x6f6   :  { %8258 = vsyncpa [#allocation9], 1 }
 0x6f7   :  { %8259 = vsyncpa [#allocation12], 1 }
 0x6f8   :  { %8260 = vsyncpa [#allocation15], 1 }
 0x6f9   :  { %8261 = vsyncpa [#allocation4], 1 }

</bundles_post_ra>
